<compile_context>
chip_gen: v7x
topology: tpu7x:2x2x1
jax: 0.10.0
libtpu: 0.0.40
codegen_flags: <defaults>
</compile_context>

<pallas_src>
import functools

import jax
import jax.numpy as jnp
from jax.experimental import pallas as pl
from jax.experimental.pallas import tpu as pltpu

# ----------------------------- model dims -----------------------------------
B = 2          # batch
C_LAT = 4      # latent channels
F = 8          # frames
H = W = 16     # spatial
C_POSE = 3     # pose-embedding input channels
C_COND = 3     # controlnet condition channels
SEQ = 8        # text tokens
HID = 32       # text hidden dim
C0 = 8         # first down-block channels
C1 = 16        # second down-block / mid channels


def _silu(x):
    return x * jax.nn.sigmoid(x)


# ===================== single fused Pallas kernel ============================

def _fused_kernel(lat_ref, pose_ref, cnin_ref, vecu_ref, veccn_ref, rs_ref,
                  wp0_ref, bp0_ref, wp1_ref, bp1_ref,
                  wci_ref, wch1_ref, bch1_ref, wcm_ref, bcm_ref,
                  wul_ref, wd1_ref, bd1_ref, wu1_ref, bu1_ref, wu0_ref, bu0_ref,
                  o_ref, *, nb):
    """pose-encoder + controlnet(+xbody) + unet fused per lane-dense row block.

    Channels-first: activations are (C, R) with R rows on the lane axis, so
    every matmul is W^T(C_out, C_in) @ X(C_in, R) and every store is a plain
    unmasked lane-dense vst.  All intermediates live in VMEM/vregs.
    """
    f32 = jnp.float32
    dot = lambda w, x: jnp.dot(w, x, preferred_element_type=f32)

    # -------- pose encoder (two 1x1 convs) -----------------------------------
    f0 = _silu(dot(wp0_ref[...], pose_ref[...]) + bp0_ref[...])        # (C0, R)
    f1 = _silu(dot(wp1_ref[...], f0) + bp1_ref[...])                   # (C1, R)

    # -------- controlnet (+ xbody branch packed along output channels) -------
    h0 = _silu(dot(wci_ref[...], cnin_ref[...]) + veccn_ref[...])      # (nb*C0, R)
    h1 = _silu(dot(wch1_ref[...], h0) + bch1_ref[...])                 # (nb*C1, R)
    mid = dot(wcm_ref[...], h1) + bcm_ref[...]                         # (nb*C1, R)
    if nb == 2:
        # sublane-aligned slices (offsets 8 / 16) -> cheap branch residual sum
        d0 = h0[:C0] + h0[C0:]
        d1 = h1[:C1] + h1[C1:]
        md = mid[:C1] + mid[C1:]
    else:
        d0, d1, md = h0, h1, mid

    rs = rs_ref[...]                # (1, R): conditioning_scale * frame mask

    # -------- unet down / mid / up with residual injections ------------------
    d0u = _silu(dot(wul_ref[...], lat_ref[...]) + vecu_ref[...] + f0)  # (C0, R)
    d1u = _silu(dot(wd1_ref[...], d0u) + bd1_ref[...] + f1)            # (C1, R)
    mid_h = d1u + rs * (md + d1)
    u1 = _silu(dot(wu1_ref[...], mid_h) + bu1_ref[...])                # (C0, R)
    u0 = u1 + rs * d0
    out = dot(wu0_ref[...], u0) + bu0_ref[...]                         # (C_LAT, R)
    o_ref[...] = out.astype(o_ref.dtype)


def fused_forward_call(acts, weights, *, nb, rows):
    # Two lane-dense row blocks: both TensorCores busy on v7x, two cheap steps
    # on v5e/v6e.  Falls back to one block if rows is not 2*128-divisible.
    n_blocks = 2 if rows % 256 == 0 else 1
    r = rows // n_blocks

    def act_spec(a):      # (C, rows) activation slab -> (C, r) lane-dense block
        return pl.BlockSpec((a.shape[0], r), lambda i: (0, i))

    def w_spec(a):        # whole weight / bias: identical block every grid step
        nd = a.ndim
        return pl.BlockSpec(a.shape, lambda i, _nd=nd: (0,) * _nd)

    kernel = functools.partial(_fused_kernel, nb=nb)
    return pl.pallas_call(
        kernel,
        out_shape=jax.ShapeDtypeStruct((acts[0].shape[0], rows), jnp.float32),
        grid=(n_blocks,),
        in_specs=[act_spec(a) for a in acts] + [w_spec(w) for w in weights],
        out_specs=pl.BlockSpec((acts[0].shape[0], r), lambda i: (0, i)),
        compiler_params=pltpu.CompilerParams(dimension_semantics=("parallel",)),
    )(*acts, *weights)


# ============================== glue helpers =================================

def nchw_to_rows(x):                       # (N,C,H,W) -> (N*H*W, C)   [reference only]
    n, c, h, w = x.shape
    return jnp.transpose(x, (0, 2, 3, 1)).reshape(n * h * w, c)


def timestep_embed(t, dim):                # tiny scalar compute: glue
    half = dim // 2
    freqs = jnp.exp(-jnp.log(10000.0) * jnp.arange(half, dtype=jnp.float32) / half)
    ang = t * freqs
    return jnp.concatenate([jnp.sin(ang), jnp.cos(ang)])


def _block_diag_t(mats):
    """Block-diagonal matrix of the TRANSPOSED inputs (for channels-first)."""
    tms = [m.T for m in mats]
    if len(tms) == 1:
        return tms[0]
    a, b = tms
    ra, ca = a.shape
    rb, cb = b.shape
    top = jnp.concatenate([a, jnp.zeros((ra, cb), a.dtype)], axis=1)
    bot = jnp.concatenate([jnp.zeros((rb, ca), b.dtype), b], axis=1)
    return jnp.concatenate([top, bot], axis=0)


# ============================ ModelWrapper_Camera ============================

class ModelWrapperCamera:
    def __init__(self, unet_params, controlnet_params, pose_encoder_params,
                 controlnet_xbody_params=None):
        self.unet = unet_params
        self.controlnet = controlnet_params
        self.pose_encoder = pose_encoder_params
        self.controlnet_xbody = controlnet_xbody_params

    def forward(self, timesteps, noisy_latents, unet_encoder_hidden_states,
                encoder_hidden_states, controlnet_condition, pose_embedding,
                controlnet_xbody_condition=None, conditioning_scale=1.0,
                return_dict=False, cross_id=False):
        del return_dict  # synthetic submodules always return plain arrays
        assert pose_embedding.ndim == 5
        b, c, f_all, h, w = noisy_latents.shape
        f_cn = f_all - 1 if cross_id else f_all
        hw = h * w
        rows = b * f_all * hw
        c_pose = pose_embedding.shape[1]

        # ---- channels-first row slabs (lane axis = rows); built once by XLA
        lat_cf = jnp.transpose(noisy_latents, (1, 0, 2, 3, 4)).reshape(c, rows)
        pose_cf = jnp.transpose(pose_embedding, (1, 0, 2, 3, 4)).reshape(c_pose, rows)

        have_xbody = (controlnet_xbody_condition is not None
                      and self.controlnet_xbody is not None)
        # NOTE: the PyTorch wrapper only defines the xbody residual sum for
        # cross_id=True (otherwise it would NameError); here the xbody residuals
        # are summed whenever the xbody condition is provided.
        cn_params = [self.controlnet] + ([self.controlnet_xbody] if have_xbody else [])
        nb = len(cn_params)

        def cond_to_cf(cond):   # (b*f_cn, C, h, w) -> unet-frame-aligned (C, rows)
            cc = cond.shape[1]
            x = jnp.transpose(cond.reshape(b, f_cn, cc, h, w), (2, 0, 1, 3, 4))
            if cross_id:                       # zero frame 0 (residuals masked anyway)
                x = jnp.pad(x, ((0, 0), (0, 0), (1, 0), (0, 0), (0, 0)))
            return x.reshape(cc, rows)

        cond_cf = cond_to_cf(controlnet_condition)
        if have_xbody:
            cond_cf = jnp.concatenate(
                [cond_cf, cond_to_cf(controlnet_xbody_condition)], axis=0)
        # single [lat | cond (| cond_xbody)] slab -> one matmul for cn layer 0
        cn_in_cf = jnp.concatenate([lat_cf, cond_cf], axis=0)

        # ---- hoisted per-frame text context (+ folded biases + temb) --------
        def temb(p):
            return jax.nn.silu(timestep_embed(timesteps, C0) @ p["W_t"] + p["b_t"])

        def per_frame_to_rows(v, f_here, pad_front):   # (b*f_here, C) -> (C, rows)
            cdim = v.shape[-1]
            x = jnp.transpose(v.reshape(b, f_here, cdim), (2, 0, 1))
            if pad_front:
                x = jnp.pad(x, ((0, 0), (0, 0), (1, 0)))
            return jnp.broadcast_to(x[..., None], (cdim, b, f_all, hw)).reshape(cdim, rows)

        pu = self.unet
        vec_u = (jnp.mean(unet_encoder_hidden_states, axis=1) @ pu["W_ctx"]
                 + pu["b_ctx"] + pu["b_lat"] + temb(pu))
        vec_u_rows = per_frame_to_rows(vec_u, f_all, False)

        ehs_mean = jnp.mean(encoder_hidden_states, axis=1)
        vec_cn_rows = jnp.concatenate([
            per_frame_to_rows(
                ehs_mean @ p["W_ctx"] + p["b_ctx"] + p["b_lat"] + p["b_cond"] + temb(p),
                f_cn, cross_id)
            for p in cn_params], axis=0)

        # ---- per-row residual scale = conditioning_scale * frame mask -------
        # Data, not a compile-time constant -> no recompile per scale / cross_id.
        scale = jnp.float32(conditioning_scale)
        fmask = jnp.ones((f_all,), jnp.float32)
        if cross_id:
            fmask = fmask.at[0].set(0.0)
        rs_rows = jnp.broadcast_to((scale * fmask)[None, None, :, None],
                                   (1, b, f_all, hw)).reshape(1, rows)

        # ---- packed, transposed weights for channels-first matmuls ----------
        pp = self.pose_encoder
        wp0, bp0 = pp["W0"].T, pp["b0"].reshape(-1, 1)
        wp1, bp1 = pp["W1"].T, pp["b1"].reshape(-1, 1)

        c_in_cn = cn_in_cf.shape[0]
        wci = jnp.zeros((nb * C0, c_in_cn), jnp.float32)
        for k, p in enumerate(cn_params):
            wci = wci.at[k * C0:(k + 1) * C0, :c].set(p["W_lat"].T)
            off = c + k * p["W_cond"].shape[0]
            wci = wci.at[k * C0:(k + 1) * C0,
                         off:off + p["W_cond"].shape[0]].set(p["W_cond"].T)
        wch1 = _block_diag_t([p["W_h1"] for p in cn_params])
        wcm = _block_diag_t([p["W_mid"] for p in cn_params])
        bch1 = jnp.concatenate([p["b_h1"] for p in cn_params]).reshape(-1, 1)
        bcm = jnp.concatenate([p["b_mid"] for p in cn_params]).reshape(-1, 1)

        wul = pu["W_lat"].T
        wd1, bd1 = pu["W_d1"].T, pu["b_d1"].reshape(-1, 1)
        wu1, bu1 = pu["W_u1"].T, pu["b_u1"].reshape(-1, 1)
        wu0, bu0 = pu["W_u0"].T, pu["b_u0"].reshape(-1, 1)

        acts = (lat_cf, pose_cf, cn_in_cf, vec_u_rows, vec_cn_rows, rs_rows)
        weights = (wp0, bp0, wp1, bp1, wci, wch1, bch1, wcm, bcm,
                   wul, wd1, bd1, wu1, bu1, wu0, bu0)
        out_cf = fused_forward_call(acts, weights, nb=nb, rows=rows)

        # ---- back to the torch (b, c, f, h, w) convention --------------------
        return jnp.transpose(out_cf.reshape(c, b, f_all, h, w), (1, 0, 2, 3, 4))


# ============================ parameter init =================================

def _w(key, shape):
    return jax.random.normal(key, shape, jnp.float32) * 0.1


def init_params(key):
    ks = iter(jax.random.split(key, 64))

    pose = dict(W0=_w(next(ks), (C_POSE, C0)), b0=_w(next(ks), (C0,)),
                W1=_w(next(ks), (C0, C1)), b1=_w(next(ks), (C1,)))

    def controlnet_params():
        return dict(
            W_t=_w(next(ks), (C0, C0)), b_t=_w(next(ks), (C0,)),
            W_ctx=_w(next(ks), (HID, C0)), b_ctx=_w(next(ks), (C0,)),
            W_lat=_w(next(ks), (C_LAT, C0)), b_lat=_w(next(ks), (C0,)),
            W_cond=_w(next(ks), (C_COND, C0)), b_cond=_w(next(ks), (C0,)),
            W_h1=_w(next(ks), (C0, C1)), b_h1=_w(next(ks), (C1,)),
            W_mid=_w(next(ks), (C1, C1)), b_mid=_w(next(ks), (C1,)),
        )

    cn = controlnet_params()
    cn_xbody = controlnet_params()

    unet = dict(
        W_t=_w(next(ks), (C0, C0)), b_t=_w(next(ks), (C0,)),
        W_ctx=_w(next(ks), (HID, C0)), b_ctx=_w(next(ks), (C0,)),
        W_lat=_w(next(ks), (C_LAT, C0)), b_lat=_w(next(ks), (C0,)),
        W_d1=_w(next(ks), (C0, C1)), b_d1=_w(next(ks), (C1,)),
        W_u1=_w(next(ks), (C1, C0)), b_u1=_w(next(ks), (C0,)),
        W_u0=_w(next(ks), (C0, C_LAT)), b_u0=_w(next(ks), (C_LAT,)),
    )
    return unet, cn, pose, cn_xbody


# ========================= pure-JAX reference (check) ========================

def reference_forward(unet_p, cn_p, pose_p, cn_xb_p, timesteps, noisy_latents,
                      unet_ehs, cn_ehs, cn_cond, pose_embedding, cn_xbody_cond,
                      conditioning_scale, cross_id):
    silu = jax.nn.silu
    b, c, f_all, h, w = noisy_latents.shape
    f_cn = f_all - 1 if cross_id else f_all
    hw = h * w

    pr = jnp.transpose(pose_embedding, (0, 2, 3, 4, 1)).reshape(-1, pose_embedding.shape[1])
    f0 = silu(pr @ pose_p["W0"] + pose_p["b0"])
    f1 = silu(f0 @ pose_p["W1"] + pose_p["b1"])

    lat_t = jnp.transpose(noisy_latents, (0, 2, 3, 4, 1))
    lat_rows_all = lat_t.reshape(-1, c)
    cn_lat_rows = (lat_t[:, 1:] if cross_id else lat_t).reshape(-1, c)

    def cn_branch(p, lat_rows, cond_rows, ehs):
        temb = silu(timestep_embed(timesteps, C0) @ p["W_t"] + p["b_t"])
        vec = jnp.mean(ehs, axis=1) @ p["W_ctx"] + p["b_ctx"] + temb
        vec_rows = jnp.repeat(vec, hw, axis=0)
        h0 = silu(lat_rows @ p["W_lat"] + p["b_lat"]
                  + cond_rows @ p["W_cond"] + p["b_cond"] + vec_rows)
        h1 = silu(h0 @ p["W_h1"] + p["b_h1"])
        mid = h1 @ p["W_mid"] + p["b_mid"]
        return (h0 * conditioning_scale, h1 * conditioning_scale,
                mid * conditioning_scale)

    cond_rows = nchw_to_rows(cn_cond)
    d0, d1, md = cn_branch(cn_p, cn_lat_rows, cond_rows, cn_ehs)
    if cn_xbody_cond is not None and cn_xb_p is not None:
        d0x, d1x, mdx = cn_branch(cn_xb_p, cn_lat_rows,
                                  nchw_to_rows(cn_xbody_cond), cn_ehs)
        d0, d1, md = d0 + d0x, d1 + d1x, md + mdx

    def pad_frames(r):
        r = r.reshape(b, f_cn, hw, r.shape[-1])
        if cross_id:
            z = jnp.zeros((b, 1, hw, r.shape[-1]), r.dtype)
            r = jnp.concatenate([z, r], axis=1)
        return r.reshape(b * f_all * hw, -1)

    d0r, d1r, mdr = pad_frames(d0), pad_frames(d1), pad_frames(md)

    p = unet_p
    temb = silu(timestep_embed(timesteps, C0) @ p["W_t"] + p["b_t"])
    vec = jnp.mean(unet_ehs, axis=1) @ p["W_ctx"] + p["b_ctx"] + temb
    vec_rows = jnp.repeat(vec, hw, axis=0)
    d0u = silu(lat_rows_all @ p["W_lat"] + p["b_lat"] + vec_rows + f0)
    d1u = silu(d0u @ p["W_d1"] + p["b_d1"] + f1)
    mid_h = d1u + mdr + d1r
    u1 = silu(mid_h @ p["W_u1"] + p["b_u1"])
    u0 = u1 + d0r
    out_rows = u0 @ p["W_u0"] + p["b_u0"]
    return jnp.transpose(out_rows.reshape(b, f_all, h, w, c), (0, 4, 1, 2, 3))


# ================================== main =====================================

if __name__ == "__main__":
    keys = jax.random.split(jax.random.PRNGKey(0), 8)

    noisy_latents = jax.random.normal(keys[0], (B, C_LAT, F, H, W), jnp.float32)
    pose_embedding = jax.random.normal(keys[1], (B, C_POSE, F, H, W), jnp.float32)
    unet_ehs = jax.random.normal(keys[2], (B * F, SEQ, HID), jnp.float32)
    timesteps = jnp.float32(10.0)

    unet_p, cn_p, pose_p, cn_xb_p = init_params(jax.random.PRNGKey(42))
    model = ModelWrapperCamera(unet_p, cn_p, pose_p, cn_xb_p)

    # ---- config 1: cross_id=True, xbody controlnet present (merged branch) --
    f_cn = F - 1
    cn_ehs = jax.random.normal(keys[3], (B * f_cn, SEQ, HID), jnp.float32)
    cn_cond = jax.random.normal(keys[4], (B * f_cn, C_COND, H, W), jnp.float32)
    cn_xb_cond = jax.random.normal(keys[5], (B * f_cn, C_COND, H, W), jnp.float32)

    pred1 = model.forward(timesteps, noisy_latents, unet_ehs, cn_ehs, cn_cond,
                          pose_embedding, controlnet_xbody_condition=cn_xb_cond,
                          conditioning_scale=1.5, cross_id=True)
    pred1 = jax.block_until_ready(pred1)
    assert pred1.shape == (B, C_LAT, F, H, W), pred1.shape
    assert bool(jnp.all(jnp.isfinite(pred1)))
    ref1 = reference_forward(unet_p, cn_p, pose_p, cn_xb_p, timesteps,
                             noisy_latents, unet_ehs, cn_ehs, cn_cond,
                             pose_embedding, cn_xb_cond, 1.5, True)
    err1 = float(jnp.max(jnp.abs(pred1 - ref1)))
    assert err1 < 5e-2, f"mismatch vs reference (cross_id=True): {err1}"

    # ---- config 2: cross_id=False, no xbody ---------------------------------
    cn_ehs2 = jax.random.normal(keys[6], (B * F, SEQ, HID), jnp.float32)
    cn_cond2 = jax.random.normal(keys[7], (B * F, C_COND, H, W), jnp.float32)
    pred2 = model.forward(timesteps, noisy_latents, unet_ehs, cn_ehs2, cn_cond2,
                          pose_embedding, conditioning_scale=1.0, cross_id=False)
    pred2 = jax.block_until_ready(pred2)
    assert pred2.shape == (B, C_LAT, F, H, W), pred2.shape
    assert bool(jnp.all(jnp.isfinite(pred2)))
    ref2 = reference_forward(unet_p, cn_p, pose_p, None, timesteps,
                             noisy_latents, unet_ehs, cn_ehs2, cn_cond2,
                             pose_embedding, None, 1.0, False)
    err2 = float(jnp.max(jnp.abs(pred2 - ref2)))
    assert err2 < 5e-2, f"mismatch vs reference (cross_id=False): {err2}"

    print("KERNEL_OK")
</pallas_src>

<mosaic_0001>
module attributes {stable_mosaic.version = 11 : i64} {
  func.func @_fused_kernel(%arg0: i32, %arg1: memref<4x2048xf32, #tpu.memory_space<vmem>>, %arg2: memref<3x2048xf32, #tpu.memory_space<vmem>>, %arg3: memref<10x2048xf32, #tpu.memory_space<vmem>>, %arg4: memref<8x2048xf32, #tpu.memory_space<vmem>>, %arg5: memref<16x2048xf32, #tpu.memory_space<vmem>>, %arg6: memref<1x2048xf32, #tpu.memory_space<vmem>>, %arg7: memref<8x3xf32, #tpu.memory_space<vmem>>, %arg8: memref<8x1xf32, #tpu.memory_space<vmem>>, %arg9: memref<16x8xf32, #tpu.memory_space<vmem>>, %arg10: memref<16x1xf32, #tpu.memory_space<vmem>>, %arg11: memref<16x10xf32, #tpu.memory_space<vmem>>, %arg12: memref<32x16xf32, #tpu.memory_space<vmem>>, %arg13: memref<32x1xf32, #tpu.memory_space<vmem>>, %arg14: memref<32x32xf32, #tpu.memory_space<vmem>>, %arg15: memref<32x1xf32, #tpu.memory_space<vmem>>, %arg16: memref<8x4xf32, #tpu.memory_space<vmem>>, %arg17: memref<16x8xf32, #tpu.memory_space<vmem>>, %arg18: memref<16x1xf32, #tpu.memory_space<vmem>>, %arg19: memref<8x16xf32, #tpu.memory_space<vmem>>, %arg20: memref<8x1xf32, #tpu.memory_space<vmem>>, %arg21: memref<4x8xf32, #tpu.memory_space<vmem>>, %arg22: memref<4x1xf32, #tpu.memory_space<vmem>>, %arg23: memref<4x2048xf32, #tpu.memory_space<vmem>>) attributes {dimension_semantics = [#tpu.dimension_semantics<parallel>], iteration_bounds = array<i64: 2>, scalar_prefetch = 0 : i64, scratch_operands = 0 : i64, tpu.core_type = #tpu.core_type<tc>, window_params = [{transform_indices = @transform_0, window_bounds = array<i64: 4, 2048>}, {transform_indices = @transform_1, window_bounds = array<i64: 3, 2048>}, {transform_indices = @transform_2, window_bounds = array<i64: 10, 2048>}, {transform_indices = @transform_3, window_bounds = array<i64: 8, 2048>}, {transform_indices = @transform_4, window_bounds = array<i64: 16, 2048>}, {transform_indices = @transform_5, window_bounds = array<i64: 1, 2048>}, {pipeline_mode = #tpu.pipeline_mode<synchronous>, transform_indices = @transform_6, window_bounds = array<i64: 8, 3>}, {pipeline_mode = #tpu.pipeline_mode<synchronous>, transform_indices = @transform_7, window_bounds = array<i64: 8, 1>}, {pipeline_mode = #tpu.pipeline_mode<synchronous>, transform_indices = @transform_8, window_bounds = array<i64: 16, 8>}, {pipeline_mode = #tpu.pipeline_mode<synchronous>, transform_indices = @transform_9, window_bounds = array<i64: 16, 1>}, {pipeline_mode = #tpu.pipeline_mode<synchronous>, transform_indices = @transform_10, window_bounds = array<i64: 16, 10>}, {pipeline_mode = #tpu.pipeline_mode<synchronous>, transform_indices = @transform_11, window_bounds = array<i64: 32, 16>}, {pipeline_mode = #tpu.pipeline_mode<synchronous>, transform_indices = @transform_12, window_bounds = array<i64: 32, 1>}, {pipeline_mode = #tpu.pipeline_mode<synchronous>, transform_indices = @transform_13, window_bounds = array<i64: 32, 32>}, {pipeline_mode = #tpu.pipeline_mode<synchronous>, transform_indices = @transform_14, window_bounds = array<i64: 32, 1>}, {pipeline_mode = #tpu.pipeline_mode<synchronous>, transform_indices = @transform_15, window_bounds = array<i64: 8, 4>}, {pipeline_mode = #tpu.pipeline_mode<synchronous>, transform_indices = @transform_16, window_bounds = array<i64: 16, 8>}, {pipeline_mode = #tpu.pipeline_mode<synchronous>, transform_indices = @transform_17, window_bounds = array<i64: 16, 1>}, {pipeline_mode = #tpu.pipeline_mode<synchronous>, transform_indices = @transform_18, window_bounds = array<i64: 8, 16>}, {pipeline_mode = #tpu.pipeline_mode<synchronous>, transform_indices = @transform_19, window_bounds = array<i64: 8, 1>}, {pipeline_mode = #tpu.pipeline_mode<synchronous>, transform_indices = @transform_20, window_bounds = array<i64: 4, 8>}, {pipeline_mode = #tpu.pipeline_mode<synchronous>, transform_indices = @transform_21, window_bounds = array<i64: 4, 1>}, {transform_indices = @transform_22, window_bounds = array<i64: 4, 2048>}]} {
    %c0 = arith.constant 0 : index
    %c0_0 = arith.constant 0 : index
    %0 = vector.load %arg7[%c0, %c0_0] : memref<8x3xf32, #tpu.memory_space<vmem>>, vector<8x3xf32>
    %c0_1 = arith.constant 0 : index
    %c0_2 = arith.constant 0 : index
    %1 = vector.load %arg2[%c0_1, %c0_2] : memref<3x2048xf32, #tpu.memory_space<vmem>>, vector<3x2048xf32>
    %cst = arith.constant dense<0.000000e+00> : vector<8x2048xf32>
    %2 = tpu.matmul %0, %1, %cst {dimension_numbers = #tpu.dot_dimension_numbers<[1], [0], [0], [1], [0, 0, 1, 1], [], []>} : vector<8x3xf32>, vector<3x2048xf32>, vector<8x2048xf32> -> vector<8x2048xf32>
    %c0_3 = arith.constant 0 : index
    %c0_4 = arith.constant 0 : index
    %3 = vector.load %arg8[%c0_3, %c0_4] : memref<8x1xf32, #tpu.memory_space<vmem>>, vector<8x1xf32>
    %4 = vector.broadcast %3 : vector<8x1xf32> to vector<8x2048xf32>
    %5 = arith.addf %2, %4 : vector<8x2048xf32>
    %6 = arith.negf %5 : vector<8x2048xf32>
    %7 = math.exp %6 : vector<8x2048xf32>
    %cst_5 = arith.constant 1.000000e+00 : f32
    %8 = vector.broadcast %cst_5 : f32 to vector<8x2048xf32>
    %9 = arith.addf %8, %7 : vector<8x2048xf32>
    %10 = arith.divf %8, %9 : vector<8x2048xf32>
    %11 = arith.mulf %5, %10 : vector<8x2048xf32>
    %c0_6 = arith.constant 0 : index
    %c0_7 = arith.constant 0 : index
    %12 = vector.load %arg9[%c0_6, %c0_7] : memref<16x8xf32, #tpu.memory_space<vmem>>, vector<16x8xf32>
    %cst_8 = arith.constant dense<0.000000e+00> : vector<16x2048xf32>
    %13 = tpu.matmul %12, %11, %cst_8 {dimension_numbers = #tpu.dot_dimension_numbers<[1], [0], [0], [1], [0, 0, 1, 1], [], []>} : vector<16x8xf32>, vector<8x2048xf32>, vector<16x2048xf32> -> vector<16x2048xf32>
    %c0_9 = arith.constant 0 : index
    %c0_10 = arith.constant 0 : index
    %14 = vector.load %arg10[%c0_9, %c0_10] : memref<16x1xf32, #tpu.memory_space<vmem>>, vector<16x1xf32>
    %15 = vector.broadcast %14 : vector<16x1xf32> to vector<16x2048xf32>
    %16 = arith.addf %13, %15 : vector<16x2048xf32>
    %17 = arith.negf %16 : vector<16x2048xf32>
    %18 = math.exp %17 : vector<16x2048xf32>
    %cst_11 = arith.constant 1.000000e+00 : f32
    %19 = vector.broadcast %cst_11 : f32 to vector<16x2048xf32>
    %20 = arith.addf %19, %18 : vector<16x2048xf32>
    %21 = arith.divf %19, %20 : vector<16x2048xf32>
    %22 = arith.mulf %16, %21 : vector<16x2048xf32>
    %c0_12 = arith.constant 0 : index
    %c0_13 = arith.constant 0 : index
    %23 = vector.load %arg11[%c0_12, %c0_13] : memref<16x10xf32, #tpu.memory_space<vmem>>, vector<16x10xf32>
    %c0_14 = arith.constant 0 : index
    %c0_15 = arith.constant 0 : index
    %24 = vector.load %arg3[%c0_14, %c0_15] : memref<10x2048xf32, #tpu.memory_space<vmem>>, vector<10x2048xf32>
    %cst_16 = arith.constant dense<0.000000e+00> : vector<16x2048xf32>
    %25 = tpu.matmul %23, %24, %cst_16 {dimension_numbers = #tpu.dot_dimension_numbers<[1], [0], [0], [1], [0, 0, 1, 1], [], []>} : vector<16x10xf32>, vector<10x2048xf32>, vector<16x2048xf32> -> vector<16x2048xf32>
    %c0_17 = arith.constant 0 : index
    %c0_18 = arith.constant 0 : index
    %26 = vector.load %arg5[%c0_17, %c0_18] : memref<16x2048xf32, #tpu.memory_space<vmem>>, vector<16x2048xf32>
    %27 = arith.addf %25, %26 : vector<16x2048xf32>
    %28 = arith.negf %27 : vector<16x2048xf32>
    %29 = math.exp %28 : vector<16x2048xf32>
    %cst_19 = arith.constant 1.000000e+00 : f32
    %30 = vector.broadcast %cst_19 : f32 to vector<16x2048xf32>
    %31 = arith.addf %30, %29 : vector<16x2048xf32>
    %32 = arith.divf %30, %31 : vector<16x2048xf32>
    %33 = arith.mulf %27, %32 : vector<16x2048xf32>
    %c0_20 = arith.constant 0 : index
    %c0_21 = arith.constant 0 : index
    %34 = vector.load %arg12[%c0_20, %c0_21] : memref<32x16xf32, #tpu.memory_space<vmem>>, vector<32x16xf32>
    %cst_22 = arith.constant dense<0.000000e+00> : vector<32x2048xf32>
    %35 = tpu.matmul %34, %33, %cst_22 {dimension_numbers = #tpu.dot_dimension_numbers<[1], [0], [0], [1], [0, 0, 1, 1], [], []>} : vector<32x16xf32>, vector<16x2048xf32>, vector<32x2048xf32> -> vector<32x2048xf32>
    %c0_23 = arith.constant 0 : index
    %c0_24 = arith.constant 0 : index
    %36 = vector.load %arg13[%c0_23, %c0_24] : memref<32x1xf32, #tpu.memory_space<vmem>>, vector<32x1xf32>
    %37 = vector.broadcast %36 : vector<32x1xf32> to vector<32x2048xf32>
    %38 = arith.addf %35, %37 : vector<32x2048xf32>
    %39 = arith.negf %38 : vector<32x2048xf32>
    %40 = math.exp %39 : vector<32x2048xf32>
    %cst_25 = arith.constant 1.000000e+00 : f32
    %41 = vector.broadcast %cst_25 : f32 to vector<32x2048xf32>
    %42 = arith.addf %41, %40 : vector<32x2048xf32>
    %43 = arith.divf %41, %42 : vector<32x2048xf32>
    %44 = arith.mulf %38, %43 : vector<32x2048xf32>
    %c0_26 = arith.constant 0 : index
    %c0_27 = arith.constant 0 : index
    %45 = vector.load %arg14[%c0_26, %c0_27] : memref<32x32xf32, #tpu.memory_space<vmem>>, vector<32x32xf32>
    %cst_28 = arith.constant dense<0.000000e+00> : vector<32x2048xf32>
    %46 = tpu.matmul %45, %44, %cst_28 {dimension_numbers = #tpu.dot_dimension_numbers<[1], [0], [0], [1], [0, 0, 1, 1], [], []>} : vector<32x32xf32>, vector<32x2048xf32>, vector<32x2048xf32> -> vector<32x2048xf32>
    %c0_29 = arith.constant 0 : index
    %c0_30 = arith.constant 0 : index
    %47 = vector.load %arg15[%c0_29, %c0_30] : memref<32x1xf32, #tpu.memory_space<vmem>>, vector<32x1xf32>
    %48 = vector.broadcast %47 : vector<32x1xf32> to vector<32x2048xf32>
    %49 = arith.addf %46, %48 : vector<32x2048xf32>
    %50 = vector.extract_strided_slice %33 {offsets = [0, 0], sizes = [8, 2048], strides = [1, 1]} : vector<16x2048xf32> to vector<8x2048xf32>
    %51 = vector.extract_strided_slice %33 {offsets = [8, 0], sizes = [8, 2048], strides = [1, 1]} : vector<16x2048xf32> to vector<8x2048xf32>
    %52 = arith.addf %50, %51 : vector<8x2048xf32>
    %53 = vector.extract_strided_slice %44 {offsets = [0, 0], sizes = [16, 2048], strides = [1, 1]} : vector<32x2048xf32> to vector<16x2048xf32>
    %54 = vector.extract_strided_slice %44 {offsets = [16, 0], sizes = [16, 2048], strides = [1, 1]} : vector<32x2048xf32> to vector<16x2048xf32>
    %55 = arith.addf %53, %54 : vector<16x2048xf32>
    %56 = vector.extract_strided_slice %49 {offsets = [0, 0], sizes = [16, 2048], strides = [1, 1]} : vector<32x2048xf32> to vector<16x2048xf32>
    %57 = vector.extract_strided_slice %49 {offsets = [16, 0], sizes = [16, 2048], strides = [1, 1]} : vector<32x2048xf32> to vector<16x2048xf32>
    %58 = arith.addf %56, %57 : vector<16x2048xf32>
    %c0_31 = arith.constant 0 : index
    %c0_32 = arith.constant 0 : index
    %59 = vector.load %arg6[%c0_31, %c0_32] : memref<1x2048xf32, #tpu.memory_space<vmem>>, vector<1x2048xf32>
    %c0_33 = arith.constant 0 : index
    %c0_34 = arith.constant 0 : index
    %60 = vector.load %arg16[%c0_33, %c0_34] : memref<8x4xf32, #tpu.memory_space<vmem>>, vector<8x4xf32>
    %c0_35 = arith.constant 0 : index
    %c0_36 = arith.constant 0 : index
    %61 = vector.load %arg1[%c0_35, %c0_36] : memref<4x2048xf32, #tpu.memory_space<vmem>>, vector<4x2048xf32>
    %cst_37 = arith.constant dense<0.000000e+00> : vector<8x2048xf32>
    %62 = tpu.matmul %60, %61, %cst_37 {dimension_numbers = #tpu.dot_dimension_numbers<[1], [0], [0], [1], [0, 0, 1, 1], [], []>} : vector<8x4xf32>, vector<4x2048xf32>, vector<8x2048xf32> -> vector<8x2048xf32>
    %c0_38 = arith.constant 0 : index
    %c0_39 = arith.constant 0 : index
    %63 = vector.load %arg4[%c0_38, %c0_39] : memref<8x2048xf32, #tpu.memory_space<vmem>>, vector<8x2048xf32>
    %64 = arith.addf %62, %63 : vector<8x2048xf32>
    %65 = arith.addf %64, %11 : vector<8x2048xf32>
    %66 = arith.negf %65 : vector<8x2048xf32>
    %67 = math.exp %66 : vector<8x2048xf32>
    %cst_40 = arith.constant 1.000000e+00 : f32
    %68 = vector.broadcast %cst_40 : f32 to vector<8x2048xf32>
    %69 = arith.addf %68, %67 : vector<8x2048xf32>
    %70 = arith.divf %68, %69 : vector<8x2048xf32>
    %71 = arith.mulf %65, %70 : vector<8x2048xf32>
    %c0_41 = arith.constant 0 : index
    %c0_42 = arith.constant 0 : index
    %72 = vector.load %arg17[%c0_41, %c0_42] : memref<16x8xf32, #tpu.memory_space<vmem>>, vector<16x8xf32>
    %cst_43 = arith.constant dense<0.000000e+00> : vector<16x2048xf32>
    %73 = tpu.matmul %72, %71, %cst_43 {dimension_numbers = #tpu.dot_dimension_numbers<[1], [0], [0], [1], [0, 0, 1, 1], [], []>} : vector<16x8xf32>, vector<8x2048xf32>, vector<16x2048xf32> -> vector<16x2048xf32>
    %c0_44 = arith.constant 0 : index
    %c0_45 = arith.constant 0 : index
    %74 = vector.load %arg18[%c0_44, %c0_45] : memref<16x1xf32, #tpu.memory_space<vmem>>, vector<16x1xf32>
    %75 = vector.broadcast %74 : vector<16x1xf32> to vector<16x2048xf32>
    %76 = arith.addf %73, %75 : vector<16x2048xf32>
    %77 = arith.addf %76, %22 : vector<16x2048xf32>
    %78 = arith.negf %77 : vector<16x2048xf32>
    %79 = math.exp %78 : vector<16x2048xf32>
    %cst_46 = arith.constant 1.000000e+00 : f32
    %80 = vector.broadcast %cst_46 : f32 to vector<16x2048xf32>
    %81 = arith.addf %80, %79 : vector<16x2048xf32>
    %82 = arith.divf %80, %81 : vector<16x2048xf32>
    %83 = arith.mulf %77, %82 : vector<16x2048xf32>
    %84 = arith.addf %58, %55 : vector<16x2048xf32>
    %85 = vector.broadcast %59 : vector<1x2048xf32> to vector<16x2048xf32>
    %86 = arith.mulf %85, %84 : vector<16x2048xf32>
    %87 = arith.addf %83, %86 : vector<16x2048xf32>
    %c0_47 = arith.constant 0 : index
    %c0_48 = arith.constant 0 : index
    %88 = vector.load %arg19[%c0_47, %c0_48] : memref<8x16xf32, #tpu.memory_space<vmem>>, vector<8x16xf32>
    %cst_49 = arith.constant dense<0.000000e+00> : vector<8x2048xf32>
    %89 = tpu.matmul %88, %87, %cst_49 {dimension_numbers = #tpu.dot_dimension_numbers<[1], [0], [0], [1], [0, 0, 1, 1], [], []>} : vector<8x16xf32>, vector<16x2048xf32>, vector<8x2048xf32> -> vector<8x2048xf32>
    %c0_50 = arith.constant 0 : index
    %c0_51 = arith.constant 0 : index
    %90 = vector.load %arg20[%c0_50, %c0_51] : memref<8x1xf32, #tpu.memory_space<vmem>>, vector<8x1xf32>
    %91 = vector.broadcast %90 : vector<8x1xf32> to vector<8x2048xf32>
    %92 = arith.addf %89, %91 : vector<8x2048xf32>
    %93 = arith.negf %92 : vector<8x2048xf32>
    %94 = math.exp %93 : vector<8x2048xf32>
    %cst_52 = arith.constant 1.000000e+00 : f32
    %95 = vector.broadcast %cst_52 : f32 to vector<8x2048xf32>
    %96 = arith.addf %95, %94 : vector<8x2048xf32>
    %97 = arith.divf %95, %96 : vector<8x2048xf32>
    %98 = arith.mulf %92, %97 : vector<8x2048xf32>
    %99 = vector.broadcast %59 : vector<1x2048xf32> to vector<8x2048xf32>
    %100 = arith.mulf %99, %52 : vector<8x2048xf32>
    %101 = arith.addf %98, %100 : vector<8x2048xf32>
    %c0_53 = arith.constant 0 : index
    %c0_54 = arith.constant 0 : index
    %102 = vector.load %arg21[%c0_53, %c0_54] : memref<4x8xf32, #tpu.memory_space<vmem>>, vector<4x8xf32>
    %cst_55 = arith.constant dense<0.000000e+00> : vector<4x2048xf32>
    %103 = tpu.matmul %102, %101, %cst_55 {dimension_numbers = #tpu.dot_dimension_numbers<[1], [0], [0], [1], [0, 0, 1, 1], [], []>} : vector<4x8xf32>, vector<8x2048xf32>, vector<4x2048xf32> -> vector<4x2048xf32>
    %c0_56 = arith.constant 0 : index
    %c0_57 = arith.constant 0 : index
    %104 = vector.load %arg22[%c0_56, %c0_57] : memref<4x1xf32, #tpu.memory_space<vmem>>, vector<4x1xf32>
    %105 = vector.broadcast %104 : vector<4x1xf32> to vector<4x2048xf32>
    %106 = arith.addf %103, %105 : vector<4x2048xf32>
    %c0_58 = arith.constant 0 : index
    %c0_59 = arith.constant 0 : index
    %107 = vector.load %arg23[%c0_58, %c0_59] : memref<4x2048xf32, #tpu.memory_space<vmem>>, vector<4x2048xf32>
    tpu.vector_store %arg23[%c0_58, %c0_59], %106 {strides = array<i32>} : memref<4x2048xf32, #tpu.memory_space<vmem>>, vector<4x2048xf32>,
    return
  }
  func.func @transform_0(%arg0: i32) -> (i32, i32) {
    %c0_i32 = arith.constant 0 : i32
    %c0_i32_0 = arith.constant 0 : i32
    return %c0_i32, %arg0 : i32, i32
  }
  func.func @transform_1(%arg0: i32) -> (i32, i32) {
    %c0_i32 = arith.constant 0 : i32
    %c0_i32_0 = arith.constant 0 : i32
    return %c0_i32, %arg0 : i32, i32
  }
  func.func @transform_2(%arg0: i32) -> (i32, i32) {
    %c0_i32 = arith.constant 0 : i32
    %c0_i32_0 = arith.constant 0 : i32
    return %c0_i32, %arg0 : i32, i32
  }
  func.func @transform_3(%arg0: i32) -> (i32, i32) {
    %c0_i32 = arith.constant 0 : i32
    %c0_i32_0 = arith.constant 0 : i32
    return %c0_i32, %arg0 : i32, i32
  }
  func.func @transform_4(%arg0: i32) -> (i32, i32) {
    %c0_i32 = arith.constant 0 : i32
    %c0_i32_0 = arith.constant 0 : i32
    return %c0_i32, %arg0 : i32, i32
  }
  func.func @transform_5(%arg0: i32) -> (i32, i32) {
    %c0_i32 = arith.constant 0 : i32
    %c0_i32_0 = arith.constant 0 : i32
    return %c0_i32, %arg0 : i32, i32
  }
  func.func @transform_6(%arg0: i32) -> (i32, i32) {
    %c0_i32 = arith.constant 0 : i32
    %c0_i32_0 = arith.constant 0 : i32
    %c0_i32_1 = arith.constant 0 : i32
    return %c0_i32, %c0_i32_0 : i32, i32
  }
  func.func @transform_7(%arg0: i32) -> (i32, i32) {
    %c0_i32 = arith.constant 0 : i32
    %c0_i32_0 = arith.constant 0 : i32
    %c0_i32_1 = arith.constant 0 : i32
    return %c0_i32, %c0_i32_0 : i32, i32
  }
  func.func @transform_8(%arg0: i32) -> (i32, i32) {
    %c0_i32 = arith.constant 0 : i32
    %c0_i32_0 = arith.constant 0 : i32
    %c0_i32_1 = arith.constant 0 : i32
    return %c0_i32, %c0_i32_0 : i32, i32
  }
  func.func @transform_9(%arg0: i32) -> (i32, i32) {
    %c0_i32 = arith.constant 0 : i32
    %c0_i32_0 = arith.constant 0 : i32
    %c0_i32_1 = arith.constant 0 : i32
    return %c0_i32, %c0_i32_0 : i32, i32
  }
  func.func @transform_10(%arg0: i32) -> (i32, i32) {
    %c0_i32 = arith.constant 0 : i32
    %c0_i32_0 = arith.constant 0 : i32
    %c0_i32_1 = arith.constant 0 : i32
    return %c0_i32, %c0_i32_0 : i32, i32
  }
  func.func @transform_11(%arg0: i32) -> (i32, i32) {
    %c0_i32 = arith.constant 0 : i32
    %c0_i32_0 = arith.constant 0 : i32
    %c0_i32_1 = arith.constant 0 : i32
    return %c0_i32, %c0_i32_0 : i32, i32
  }
  func.func @transform_12(%arg0: i32) -> (i32, i32) {
    %c0_i32 = arith.constant 0 : i32
    %c0_i32_0 = arith.constant 0 : i32
    %c0_i32_1 = arith.constant 0 : i32
    return %c0_i32, %c0_i32_0 : i32, i32
  }
  func.func @transform_13(%arg0: i32) -> (i32, i32) {
    %c0_i32 = arith.constant 0 : i32
    %c0_i32_0 = arith.constant 0 : i32
    %c0_i32_1 = arith.constant 0 : i32
    return %c0_i32, %c0_i32_0 : i32, i32
  }
  func.func @transform_14(%arg0: i32) -> (i32, i32) {
    %c0_i32 = arith.constant 0 : i32
    %c0_i32_0 = arith.constant 0 : i32
    %c0_i32_1 = arith.constant 0 : i32
    return %c0_i32, %c0_i32_0 : i32, i32
  }
  func.func @transform_15(%arg0: i32) -> (i32, i32) {
    %c0_i32 = arith.constant 0 : i32
    %c0_i32_0 = arith.constant 0 : i32
    %c0_i32_1 = arith.constant 0 : i32
    return %c0_i32, %c0_i32_0 : i32, i32
  }
  func.func @transform_16(%arg0: i32) -> (i32, i32) {
    %c0_i32 = arith.constant 0 : i32
    %c0_i32_0 = arith.constant 0 : i32
    %c0_i32_1 = arith.constant 0 : i32
    return %c0_i32, %c0_i32_0 : i32, i32
  }
  func.func @transform_17(%arg0: i32) -> (i32, i32) {
    %c0_i32 = arith.constant 0 : i32
    %c0_i32_0 = arith.constant 0 : i32
    %c0_i32_1 = arith.constant 0 : i32
    return %c0_i32, %c0_i32_0 : i32, i32
  }
  func.func @transform_18(%arg0: i32) -> (i32, i32) {
    %c0_i32 = arith.constant 0 : i32
    %c0_i32_0 = arith.constant 0 : i32
    %c0_i32_1 = arith.constant 0 : i32
    return %c0_i32, %c0_i32_0 : i32, i32
  }
  func.func @transform_19(%arg0: i32) -> (i32, i32) {
    %c0_i32 = arith.constant 0 : i32
    %c0_i32_0 = arith.constant 0 : i32
    %c0_i32_1 = arith.constant 0 : i32
    return %c0_i32, %c0_i32_0 : i32, i32
  }
  func.func @transform_20(%arg0: i32) -> (i32, i32) {
    %c0_i32 = arith.constant 0 : i32
    %c0_i32_0 = arith.constant 0 : i32
    %c0_i32_1 = arith.constant 0 : i32
    return %c0_i32, %c0_i32_0 : i32, i32
  }
  func.func @transform_21(%arg0: i32) -> (i32, i32) {
    %c0_i32 = arith.constant 0 : i32
    %c0_i32_0 = arith.constant 0 : i32
    %c0_i32_1 = arith.constant 0 : i32
    return %c0_i32, %c0_i32_0 : i32, i32
  }
  func.func @transform_22(%arg0: i32) -> (i32, i32) {
    %c0_i32 = arith.constant 0 : i32
    %c0_i32_0 = arith.constant 0 : i32
    return %c0_i32, %arg0 : i32, i32
  }
}

</mosaic_0001>

<bundles_post_ra>
// kernel: tpu_custom_call.1
= control target key start
LH: loop header
LB: loop body
LE: loop exit
PB: predicated region body
PF: predicated region fallthrough
CT: control target
= control target key end

     0   :  { %s13920_s0 = inlined_call_operand.vmem [shape: f32[4,4096], index: 0, kind: input, shape index: {}]   ;;  %s13921_s1 = inlined_call_operand.hbm [shape: f32[3,4096], index: 1, kind: input, shape index: {}]   ;;  %s13922_s2 = inlined_call_operand.hbm [shape: f32[10,4096], index: 2, kind: input, shape index: {}]   ;;  %s13923_s3 = inlined_call_operand.hbm [shape: f32[8,4096], index: 3, kind: input, shape index: {}]   ;;  %s13924_s4 = inlined_call_operand.hbm [shape: f32[16,4096], index: 4, kind: input, shape index: {}]   ;;  %s13925_s5 = inlined_call_operand.vmem [shape: f32[1,4096], index: 5, kind: input, shape index: {}]   ;;  %s13926_s6 = inlined_call_operand.vmem [shape: f32[8,3], index: 6, kind: input, shape index: {}]   ;;  %s13927_s7 = inlined_call_operand.vmem [shape: f32[8,1], index: 7, kind: input, shape index: {}]   ;;  %s13928_s8 = inlined_call_operand.vmem [shape: f32[16,8], index: 8, kind: input, shape index: {}]   ;;  %s13929_s9 = inlined_call_operand.vmem [shape: f32[16,1], index: 9, kind: input, shape index: {}]   ;;  %s13930_s10 = inlined_call_operand.vmem [shape: f32[16,10], index: 10, kind: input, shape index: {}]   ;;  %s13931_s11 = inlined_call_operand.vmem [shape: f32[32,16], index: 11, kind: input, shape index: {}]   ;;  %s13932_s12 = inlined_call_operand.vmem [shape: f32[32,1], index: 12, kind: input, shape index: {}]   ;;  %s13933_s13 = inlined_call_operand.vmem [shape: f32[32,32], index: 13, kind: input, shape index: {}]   ;;  %s13934_s14 = inlined_call_operand.vmem [shape: f32[32,1], index: 14, kind: input, shape index: {}]   ;;  %s13935_s15 = inlined_call_operand.vmem [shape: f32[8,4], index: 15, kind: input, shape index: {}]   ;;  %s13936_s16 = inlined_call_operand.vmem [shape: f32[16,8], index: 16, kind: input, shape index: {}]   ;;  %s13937_s17 = inlined_call_operand.vmem [shape: f32[16,1], index: 17, kind: input, shape index: {}]   ;;  %s13938_s18 = inlined_call_operand.vmem [shape: f32[8,16], index: 18, kind: input, shape index: {}]   ;;  %s13939_s19 = inlined_call_operand.vmem [shape: f32[8,1], index: 19, kind: input, shape index: {}]   ;;  %s13940_s20 = inlined_call_operand.vmem [shape: f32[4,8], index: 20, kind: input, shape index: {}]   ;;  %s13941_s21 = inlined_call_operand.vmem [shape: f32[4,1], index: 21, kind: input, shape index: {}]   ;;  %s13942_s22 = inlined_call_operand.hbm [shape: f32[4,4096], index: 22, kind: output, shape index: {}]  }
   0x1   :  { %14044 = sst [smem:[#allocation120_spill]] %s13920_s0 }
   0x2   :  { %14045 = sst [smem:[#allocation121_spill]] %s13921_s1 }
   0x3   :  { %14046 = sst [smem:[#allocation122_spill]] %s13922_s2 }
   0x4   :  { %14047 = sst [smem:[#allocation123_spill]] %s13923_s3 }
   0x5   :  { %14048 = sst [smem:[#allocation124_spill]] %s13924_s4 }
   0x6   :  { %14049 = sst [smem:[#allocation125_spill]] %s13925_s5 }
   0x7   :  { %14050 = sst [smem:[#allocation126_spill]] %s13926_s6 }
   0x8   :  { %14051 = sst [smem:[#allocation127_spill]] %s13930_s10 }
   0x9   :  { %14052 = sst [smem:[#allocation128_spill]] %s13931_s11 }
   0xa   :  { %14053 = sst [smem:[#allocation129_spill]] %s13933_s13 }
   0xb   :  { %14054 = sst [smem:[#allocation130_spill]] %s13935_s15 }
   0xc   :  { %14055 = sst [smem:[#allocation131_spill]] %s13936_s16 }
   0xd   :  { %14056 = sst [smem:[#allocation132_spill]] %s13938_s18 }
   0xe   :  { %14057 = sst [smem:[#allocation133_spill]] %s13939_s19 }
   0xf   :  { %14058 = sst [smem:[#allocation134_spill]] %s13940_s20 }
  0x10   :  { %14059 = sst [smem:[#allocation135_spill]] %s13942_s22 }
  0x11   :  { %27 = vsyncpa [#allocation3], 0 }
  0x12   :  { %29 = vsyncpa [#allocation3 + $0x1], 0 }
  0x13   :  { %30 = vsyncpa [#allocation6], 0 }
  0x14   :  { %32 = vsyncpa [#allocation6 + $0x1], 0 }
  0x15   :  { %33 = vsyncpa [#allocation9], 0 }
  0x16   :  { %35 = vsyncpa [#allocation9 + $0x1], 0 }
  0x17   :  { %36 = vsyncpa [#allocation4], 0 }
  0x18   :  { %38 = vsyncpa [#allocation4 + $0x1], 0  ;;  %s10769_s3 = smov 0   ;;  %s10771_s28 = smov 0  }
  0x19   :  { %s10773_s29 = smov 0   ;;  %s10775_s30 = smov 0  }
  0x1a LB: > { %14060 = sst [smem:[#allocation15_spill]] %s10629_s3  ;;  %s10790_s4 = sadd.s32 4294967295, %s10641_s30   ;;  %s10641_s30 = sphi %s10775_s30, %s14437_s30   ;;  %s10637_s29 = sphi %s10773_s29, %s14439_s29   ;;  %s10633_s28 = sphi %s10771_s28, %s14441_s28   ;;  %s10629_s3 = sphi %s10769_s3, %s14440_s3  }
  0x1b   : > { %14061 = sst [smem:[#allocation16_spill]] %s10637_s29  ;;  %s8824_s0 = sadd.s32 4294967294, %s10641_s30  }
  0x1c   : > { %14062 = sst [smem:[#allocation17_spill]] %s10641_s30  ;;  %s10794_s23 = sadd.s32 1, %s10641_s30  }
  0x1d   : > { %14063 = sst [smem:[#allocation18_spill]] %s10794_s23  ;;  %s77_s1 = sadd.s32 1, %s10637_s29 }
  0x1e   : > { %s74_s5 = ssub.s32 %s10641_s30, %s10794_s23  ;;  %p84_p0 = scmp.ne.s32.totalorder %s10637_s29, %s10633_s28 }
  0x1f   : > { %p75_p1 = scmp.eq.s32.totalorder %s74_s5, 0  ;;  %p85_p2 = scmp.eq.s32.totalorder %s10641_s30, 0 }
  0x20   : > { %p90_p3 = scmp.ne.s32.totalorder %s10633_s28, %s10629_s3  ;;  %p91_p4 = scmp.eq.s32.totalorder %s10790_s4, 0 }
  0x21   : > { %s10806_s24 = scalar_select %p75_p1, %s10637_s29, %s77_s1  }
  0x22   : > { %p86_p5 = por %p85_p2, %p84_p0  ;;  %p10808_p6 = por %p91_p4, %p90_p3 }
  0x23   : > { %14064 = sst [smem:[#allocation19_spill]] %s10806_s24  ;;  %p554_p7 = scmp.eq.s32.totalorder %s10790_s4, 1 }
  0x24   : > { %s14065_s6 = scalar_select %p10808_p6, 1, 0 }
  0x25   : > { %p560_p8 = scmp.eq.s32.totalorder %s8824_s0, 1  ;;  %p9557_p10 = scmp.lt.s32.totalorder %s10641_s30, 2 }
  0x26   : > { %p10815_p11 = por %p554_p7, %p84_p0  ;;  %s10824_s2 = sand.u32 1, %s10637_s29  }
  0x27   : > { %p10819_p12 = por %p560_p8, %p90_p3  ;;  %p10826_p13 = pnand %p9557_p10, %p86_p5 }
  0x28   : > { %s14066_s25 = scalar_select %p10815_p11, 1, 0 }
  0x29   : > { %s14068_s26 = scalar_select %p10819_p12, 1, 0 }
  0x2a   : > { %14067 = sst [smem:[#allocation20_spill]] %s14066_s25  ;;  %s656_s0 = sand.u32 1, %s10641_s30  }
  0x2b   : > { %14069 = sst [smem:[#allocation21_spill]] %s14068_s26  ;;  %s13956_s1 = sshll.u32 %s10824_s2, 8 }
  0x2c   : > { %s14070_s27 = scalar_select %p10826_p13, 1, 0 }
  0x2d   : > { %s10833_s5 = sshll.u32 %s10641_s30, 11  ;;  %s14071_s3 = sld [smem:[#allocation122_spill]] }
  0x2e   : > { %s660_s29 = scalar_lea.vmem [#allocation5], %s13956_s1  ;;  %s10845_s20 = scalar_lea.sflag [#allocation6], %s656_s0 }
  0x2f   : > { %s667_s26 = sshll.u32 %s660_s29, 4  ;;  %p10851_p1 = pneg %p10826_p13  ;;  %s10843_s26 = int_to_ptr.vmem [resolvable:$true] %s667_s26 }
  0x33   : > { %s14072_s22 = smov %s14071_s3  ;;  %s10839_s25 = scalar_lea.hbm %s14071_s3, %s10833_s5 }
  0x34   : > { %s10447_s18 = scalar_lea.hbm %s10839_s25, 4096  ;;  %s10452_s24 = scalar_lea.hbm %s14072_s22, 8192 }
  0x35   : > { %p10448_p0 = scmp.ne.s32.totalorder %s10839_s25, %s10447_s18  ;;  %p10453_p4 = scmp.lt.u32.totalorder %s10839_s25, %s14072_s22 }
  0x36   : > { %p10454_p5 = scmp.lt.u32.totalorder %s10452_s24, %s10447_s18  ;;  %p10456_p8 = scmp.lt.u32.totalorder %s10447_s18, %s10839_s25 }
  0x37   : > { %p10450_p2 = pnand %p10851_p1, %p10448_p0 }
  0x38   : > { %p10455_p7 = por %p10454_p5, %p10453_p4 }
  0x39   : > { %p10451_p3 = pneg %p10450_p2 }
  0x3a   : > { %p10457_p10 = por %p10456_p8, %p10455_p7 }
  0x3c   : > { %p10458_p9 = pnand %p10457_p10, %p10451_p3 }
  0x3e   : > { %10461 = shalt.err (!%p10458_p9)
}
  0x3f   : > { %s10462_s0 = scalar_lea.vmem %s10843_s26, 4096  ;;  %s10643_s3 = smov [#allocation5]  }
  0x40   : > { %p10463_p0 = scmp.ne.s32.totalorder %s10843_s26, %s10462_s0  ;;  %s10467_s23 = sshll.u32 %s10643_s3, 4  ;;  %s10468_s23 = int_to_ptr.vmem [resolvable:$false] %s10467_s23 }
  0x41   : > { %s10469_s1 = scalar_lea.vmem %s10468_s23, 8192  ;;  %p10470_p11 = scmp.lt.s32.totalorder %s10843_s26, %s10468_s23 }
  0x42   : > { %p10465_p2 = pnand %p10463_p0, %p10851_p1  ;;  %p10471_p6 = scmp.lt.s32.totalorder %s10469_s1, %s10462_s0 }
  0x44   : > { %p10466_p12 = pneg %p10465_p2  ;;  %p10472_p4 = por %p10471_p6, %p10470_p11 }
  0x46   : > { %p10473_p5 = pnand %p10472_p4, %p10466_p12 }
  0x48   : > { %10476 = shalt.err (!%p10473_p5)
}
  0x49   : > { %s13962_s18 = smov 4096   ;;  %s13963_s24 = smov 2048  }
  0x4a   : > { %s13964_s29 = smov 128   ;;  %p8839_p6 = scmp.ge.s32.totalorder %s10641_s30, 1 }
  0x4b   : > { %9546 = dma.hbm_to_vmem [thread:$0]  (!%p10826_p13), %s10839_s25, 4096, %s10843_s26, %s10845_s20, %s13962_s18, %s13963_s24, %s13964_s29  }
  0x4c   : > { %p723_p9 = scmp.lt.s32.totalorder %s10641_s30, 3  ;;  %s8827_s0 = sshll.u32 %s10824_s2, 6 }
  0x4d   : > { %s9253_s23 = sshll.u32 %s10641_s30, 10  ;;  %s641_s1 = scalar_lea.vmem [#allocation2], %s8827_s0 }
  0x4e   : > { %p10881_p11 = pnand %p8839_p6, %p723_p9  ;;  %s649_s22 = sshll.u32 %s641_s1, 4  ;;  %s650_s22 = int_to_ptr.vmem [resolvable:$true] %s649_s22 }
  0x4f   : > { %s14075_s11 = sld [smem:[#allocation121_spill]]  ;;  %s638_s25 = scalar_lea.sflag [#allocation3], %s10824_s2 }
  0x50   : > { %s14074_s3 = scalar_select %p10881_p11, 1, 0 }
  0x55   : > { %s10889_s19 = scalar_lea.hbm %s14075_s11, %s9253_s23  ;;  %s10482_s0 = scalar_lea.hbm %s14075_s11, 2048 }
  0x56   : > { %s10477_s26 = scalar_lea.hbm %s10889_s19, 1024  ;;  %p10483_p8 = scmp.lt.u32.totalorder %s10889_s19, %s14075_s11 }
  0x57   : > { %p10478_p12 = scmp.ne.s32.totalorder %s10889_s19, %s10477_s26  ;;  %p10484_p10 = scmp.lt.u32.totalorder %s10482_s0, %s10477_s26 }
  0x58   : > { %p10486_p2 = scmp.lt.u32.totalorder %s10477_s26, %s10889_s19 }
  0x59   : > { %p10480_p3 = pnand %p10478_p12, %p10851_p1  ;;  %p10485_p0 = por %p10484_p10, %p10483_p8 }
  0x5b   : > { %p10481_p7 = pneg %p10480_p3  ;;  %p10487_p4 = por %p10486_p2, %p10485_p0 }
  0x5d   : > { %p10488_p5 = pnand %p10487_p4, %p10481_p7 }
  0x5f   : > { %10491 = shalt.err (!%p10488_p5)
}
  0x60   : > { %s10492_s13 = scalar_lea.vmem %s650_s22, 1024  ;;  %s10647_s15 = smov [#allocation2]  }
  0x61   : > { %p10493_p6 = scmp.ne.s32.totalorder %s650_s22, %s10492_s13  ;;  %s10497_s23 = sshll.u32 %s10647_s15, 4  ;;  %s10498_s23 = int_to_ptr.vmem [resolvable:$false] %s10497_s23 }
  0x62   : > { %s10499_s18 = scalar_lea.vmem %s10498_s23, 2048  ;;  %p10500_p3 = scmp.lt.s32.totalorder %s650_s22, %s10498_s23 }
  0x63   : > { %p10495_p9 = pnand %p10493_p6, %p10851_p1  ;;  %p10501_p11 = scmp.lt.s32.totalorder %s10499_s18, %s10492_s13 }
  0x65   : > { %p10496_p12 = pneg %p10495_p9  ;;  %p10502_p13 = por %p10501_p11, %p10500_p3 }
  0x67   : > { %p10503_p8 = pnand %p10502_p13, %p10496_p12 }
  0x69   : > { %10506 = shalt.err (!%p10503_p8)
}
  0x6a   : > { %p14076_p10 = scmp.ne.s32.totalorder %s14070_s27, 0  ;;  %s8833_s24 = sshll.u32 %s10824_s2, 7 }
  0x6b   : > { %s14077_s0 = sld [smem:[#allocation123_spill]]  ;;  %s681_s13 = scalar_lea.vmem [#allocation7], %s8833_s24 }
  0x6c   : > { %9543 = dma.hbm_to_vmem [thread:$0]  (!%p14076_p10), %s10889_s19, 1024, %s650_s22, %s638_s25  }
  0x6d   : > { %s689_s15 = sshll.u32 %s681_s13, 4  ;;  %s14078_s11 = sld [smem:[#allocation124_spill]]  ;;  %s690_s15 = int_to_ptr.vmem [resolvable:$true] %s689_s15 }
  0x71   : > { %s10914_s1 = scalar_lea.hbm %s14077_s0, %s10833_s5  ;;  %s10512_s25 = scalar_lea.hbm %s14077_s0, 4096 }
  0x72   : > { %s10507_s10 = scalar_lea.hbm %s10914_s1, 2048  ;;  %p10513_p0 = scmp.lt.u32.totalorder %s10914_s1, %s14077_s0 }
  0x73   : > { %s10920_s30 = scalar_lea.hbm %s14078_s11, %s10833_s5  ;;  %p10508_p13 = scmp.ne.s32.totalorder %s10914_s1, %s10507_s10 }
  0x74   : > { %p10514_p2 = scmp.lt.u32.totalorder %s10512_s25, %s10507_s10  ;;  %p10516_p5 = scmp.lt.u32.totalorder %s10507_s10, %s10914_s1 }
  0x75   : > { %p10510_p11 = pnand %p10508_p13, %p10851_p1 }
  0x76   : > { %p10515_p4 = por %p10514_p2, %p10513_p0 }
  0x77   : > { %p10511_p7 = pneg %p10510_p11 }
  0x78   : > { %p10517_p6 = por %p10516_p5, %p10515_p4 }
  0x7a   : > { %p10518_p9 = pnand %p10517_p6, %p10511_p7 }
  0x7c   : > { %10521 = shalt.err (!%p10518_p9)
}
  0x7d   : > { %s10522_s5 = scalar_lea.vmem %s690_s15, 2048  ;;  %s10648_s24 = smov [#allocation7]  }
  0x7e   : > { %p10523_p12 = scmp.ne.s32.totalorder %s690_s15, %s10522_s5  ;;  %s10527_s13 = sshll.u32 %s10648_s24, 4  ;;  %s10528_s13 = int_to_ptr.vmem [resolvable:$false] %s10527_s13 }
  0x7f   : > { %s10529_s23 = scalar_lea.vmem %s10528_s13, 4096  ;;  %p10530_p13 = scmp.lt.s32.totalorder %s690_s15, %s10528_s13 }
  0x80   : > { %p10525_p3 = pnand %p10523_p12, %p10851_p1  ;;  %p10531_p11 = scmp.lt.s32.totalorder %s10529_s23, %s10522_s5 }
  0x82   : > { %p10526_p8 = pneg %p10525_p3  ;;  %p10532_p10 = por %p10531_p11, %p10530_p13 }
  0x84   : > { %p10533_p0 = pnand %p10532_p10, %p10526_p8 }
  0x86   : > { %10536 = shalt.err (!%p10533_p0)
}
  0x87   : > { %p14079_p2 = scmp.ne.s32.totalorder %s14070_s27, 0  ;;  %s14080_s10 = sshll.u32 %s10824_s2, 8 }
  0x88   : > { %s700_s18 = scalar_lea.vmem [#allocation8], %s14080_s10  ;;  %s697_s22 = scalar_lea.sflag [#allocation9], %s10824_s2 }
  0x89   : > { %9549 = dma.hbm_to_vmem [thread:$0]  (!%p14079_p2), %s10914_s1, 2048, %s690_s15, %s10845_s20  }
  0x8a   : > { %s707_s19 = sshll.u32 %s700_s18, 4  ;;  %s10537_s25 = scalar_lea.hbm %s10920_s30, 4096  ;;  %s10942_s19 = int_to_ptr.vmem [resolvable:$true] %s707_s19 }
  0x8b   : > { %p10538_p10 = scmp.ne.s32.totalorder %s10920_s30, %s10537_s25  ;;  %s10542_s5 = scalar_lea.hbm %s14078_s11, 8192 }
  0x8c   : > { %p10543_p5 = scmp.lt.u32.totalorder %s10920_s30, %s14078_s11  ;;  %p10544_p6 = scmp.lt.u32.totalorder %s10542_s5, %s10537_s25 }
  0x8d   : > { %p10540_p7 = pnand %p10538_p10, %p10851_p1  ;;  %p10546_p12 = scmp.lt.u32.totalorder %s10537_s25, %s10920_s30 }
  0x8e   : > { %p10545_p9 = por %p10544_p6, %p10543_p5 }
  0x8f   : > { %p10541_p4 = pneg %p10540_p7 }
  0x90   : > { %p10547_p3 = por %p10546_p12, %p10545_p9 }
  0x92   : > { %p10548_p8 = pnand %p10547_p3, %p10541_p4 }
  0x94   : > { %10551 = shalt.err (!%p10548_p8)
}
  0x95   : > { %s10552_s20 = scalar_lea.vmem %s10942_s19, 4096  ;;  %s10649_s1 = smov [#allocation8]  }
  0x96   : > { %p10553_p13 = scmp.ne.s32.totalorder %s10942_s19, %s10552_s20  ;;  %s10557_s15 = sshll.u32 %s10649_s1, 4  ;;  %s10558_s15 = int_to_ptr.vmem [resolvable:$false] %s10557_s15 }
  0x97   : > { %s10559_s23 = scalar_lea.vmem %s10558_s15, 8192  ;;  %p10560_p10 = scmp.lt.s32.totalorder %s10942_s19, %s10558_s15 }
  0x98   : > { %p10555_p11 = pnand %p10553_p13, %p10851_p1  ;;  %p10561_p7 = scmp.lt.s32.totalorder %s10559_s23, %s10552_s20 }
  0x9a   : > { %p10556_p0 = pneg %p10555_p11  ;;  %p10562_p5 = por %p10561_p7, %p10560_p10 }
  0x9c   : > { %p10563_p6 = pnand %p10562_p5, %p10556_p0 }
  0x9e   : > { %10566 = shalt.err (!%p10563_p6)
}
  0x9f   : > { %s14081_s10 = smov 128   ;;  %s14082_s18 = smov 2048  }
  0xa0   : > { %s14083_s25 = smov 4096   ;;  %p14084_p1 = scmp.ne.s32.totalorder %s14074_s3, 0 }
  0xa1   : > { %9552 = dma.hbm_to_vmem [thread:$0]  (!%p14079_p2), %s10920_s30, 4096, %s10942_s19, %s697_s22, %s14083_s25, %s14082_s18, %s14081_s10  }
  0xa2   : > { %727 = sbr.rel (%p14084_p1) target bundleno = 2151 (0x867), region = 108 }
  0xa9   : > { %s10974_s16 = sand.u32 1, %s10633_s28   ;;  %p14085_p4 = scmp.ne.s32.totalorder %s14065_s6, 0 }
  0xaa   : > { %s8840_s29 = sshll.u32 %s10974_s16, 6  ;;  %s730_s27 = scalar_lea.sflag [#allocation3], %s10974_s16 }
  0xab   : > { %s10980_s26 = scalar_lea.vmem [#allocation2], %s8840_s29 }
  0xac   : > { %10612 = dma.done.wait (%p14085_p4), %s730_s27, 1024  }
  0xad   : > { %10614 = vsyncadd (%p14085_p4), %s730_s27, 4294966272  ;;  %s738_s30 = sand.u32 1, %s10790_s4   ;;  %s8841_s2 = sshll.u32 %s10974_s16, 8 }
  0xae   : > { %s739_s3 = scalar_lea.sflag [#allocation6], %s738_s30  ;;  %s10988_s19 = scalar_lea.vmem [#allocation5], %s8841_s2 }
  0xaf   : > { %10616 = dma.done.wait (%p14085_p4), %s739_s3, 6144  }
  0xb0   : > { %10618 = vsyncadd (%p14085_p4), %s739_s3, 4294961152  ;;  %s8842_s22 = sshll.u32 %s10974_s16, 7  ;;  %s757_s24 = scalar_lea.sflag [#allocation9], %s10974_s16 }
  0xb1   : > { %s10995_s5 = scalar_lea.vmem [#allocation7], %s8842_s22  ;;  %s10998_s13 = scalar_lea.vmem [#allocation8], %s8841_s2 }
  0xb2   : > { %10620 = dma.done.wait (%p14085_p4), %s757_s24, 4096  }
  0xb3   : > { %10622 = vsyncadd (%p14085_p4), %s757_s24, 4294963200  ;;  %v13970_v0 = vmov 0.0   ;;  %v10651_v1 = vmov 0   ;;  %v862_v2 = vld [vmem:[%s10980_s26] sm:$0x77]  ;;  %vm896_vm0 = vcmask 1042432  }
  0xb4   : > { %993 = vmatprep.mubr.f32.mxu0 %v13970_v0  ;;  %1064 = vmatprep.mubr.f32.mxu1 %v13970_v0  ;;  %v863_v3 = vld [vmem:[%s10980_s26 + $0x8] sm:$0x77]  ;;  %v884_v4 = vcombine.high %v862_v2, %v862_v2  ;;  %v864_v6 = vld [vmem:[%s10980_s26 + $0x10] sm:$0x77]  ;;  %v865_v7 = vld [vmem:[%s10980_s26 + $0x18] sm:$0x77] }
  0xb5   : > { %9597 = vset.pattern.permute.xlu0 %v10651_v1  ;;  %9598 = vset.pattern.permute.xlu1 %v10651_v1  ;;  %v885_v5 = vcombine.high %v863_v3, %v863_v3  ;;  %s14086_s1 = sld [smem:[#allocation126_spill]]  ;;  %vm892_vm1 = vcmask 23552   ;;  %v886_v9 = vcombine.high %v864_v6, %v864_v6  ;;  %v887_v10 = vcombine.high %v865_v7, %v865_v7  ;;  %v866_v11 = vld [vmem:[%s10980_s26 + $0x20] sm:$0x77]  ;;  %v867_v12 = vld [vmem:[%s10980_s26 + $0x28] sm:$0x77] }
  0xb6   : > { %8848 = vmatprep.subr.msk.mxu0 %vm896_vm0, %v884_v4  ;;  %v888_v13 = vcombine.high %v866_v11, %v866_v11  ;;  %v889_v14 = vcombine.high %v867_v12, %v867_v12  ;;  %v868_v15 = vld [vmem:[%s10980_s26 + $0x30] sm:$0x77]  ;;  %v869_v16 = vld [vmem:[%s10980_s26 + $0x38] sm:$0x77]  ;;  %v870_v19 = vld [vmem:[%s13927_s7] sm:$0xff]  ;;  %vm1623_vm2 = vcmask 64512  }
  0xb7   : > { %8851 = vmatprep.subr.msk.mxu1 %vm896_vm0, %v885_v5  ;;  %8849 = vmatpush1.msk.msra.mxu0 %vm896_vm0, %v862_v2  ;;  %v890_v17 = vcombine.high %v868_v15, %v868_v15  ;;  %v891_v18 = vcombine.high %v869_v16, %v869_v16  ;;  %v3436_v20 = vld [vmem:[%s13932_s12] sm:$0xff]  ;;  %v3439_v21 = vld [vmem:[%s13932_s12 + $0x18] sm:$0xff]  ;;  %v1612_v22 = vld [vmem:[%s13929_s9 + $0x8] sm:$0xff]  ;;  %vm2543_vm3 = vcmask 1041408   ;;  %vm10652_vm4 = vmmov 1   ;;  %s14105_s20 = sld [smem:[#allocation127_spill]] }
  0xb8   : > { %8852 = vmatpush1.msk.msra.mxu1 %vm896_vm0, %v863_v3  ;;  %8854 = vmatprep.subr.msk.mxu0 %vm896_vm0, %v886_v9  ;;  %v6245_v23 = vld [vmem:[%s13937_s17 + $0x8] sm:$0xff]  ;;  %v4640_v25 = vld [vmem:[%s13934_s14 + $0x18] sm:$0xff]  ;;  %v8035_v26 = vld [vmem:[%s13941_s21] sm:$0xf]  ;;  %vm2536_vm6 = vcmask 80896   ;;  %s14138_s2 = sld [smem:[#allocation133_spill]] }
  0xb9   : > { %8857 = vmatprep.subr.msk.mxu1 %vm896_vm0, %v887_v10  ;;  %873 = vperm.xlu0 %9597, %v870_v19   ;;  %v4638_v24 = vld [vmem:[%s13934_s14 + $0x8] sm:$0xff]  ;;  %v3438_v28 = vld [vmem:[%s13932_s12 + $0x10] sm:$0xff]  ;;  %v1611_v29 = vld [vmem:[%s13929_s9] sm:$0xff]  ;;  %s14142_s24 = sld [smem:[#allocation128_spill]]  ;;  %vm3460_vm7 = vcmask 130048   ;;  %s14175_s25 = sld [smem:[#allocation129_spill]] }
  0xba   : > { %v3437_v27 = vld [vmem:[%s13932_s12 + $0x8] sm:$0xff]  ;;  %vm11266_vm5 = vmpackc.low %vm2543_vm3, %vm10652_vm4  ;;  %vm4661_vm8 = vcmask 261120   ;;  %s8845_s6 = sshll.u32 %s10790_s4, 4  ;;  %s14231_s10 = sld [smem:[#allocation120_spill]]  ;;  %vm5513_vm9 = vcmask 1043456   ;;  %vm5509_vm10 = vcmask 31744  }
  0xbb   : > { %v861_v8 = vld [vmem:[%s14086_s1] sm:$0xff]  ;;  %3447 = vperm.xlu1 %9598, %v3437_v27   ;;  %p12595_p2 = scmp.lt.s32.totalorder %s8845_s6, 31  ;;  %s14232_s26 = sld [smem:[#allocation130_spill]] }
  0xbc   : > { %8850 = vmatmul.mubr.msk.f32.vlgmr.msra.gmra.mrb[0].mxu0 %vm892_vm1, %v861_v8  ;;  %8853 = vmatmul.mubr.msk.f32.vlgmr.msra.gmra.mrb[0].mxu1 %vm892_vm1, %v861_v8  ;;  %s9257_s30 = sshll.u32 %s10790_s4, 10  ;;  %s10653_s4 = smov [#allocation10]  }
  0xbd   : > { %8855 = vmatpush1.msk.msra.mxu0 %vm896_vm0, %v864_v6  ;;  %1135 = vmatprep.mubr.f32.mxu0 %v13970_v0  ;;  %s14443_s6 = smov (!%p12595_p2, %s8845_s6), 31 }
  0xbe   : > { %8858 = vmatpush1.msk.msra.mxu1 %vm896_vm0, %v865_v7  ;;  %1206 = vmatprep.mubr.f32.mxu1 %v13970_v0  ;;  %s8846_s15 = sshll.u32 %s14443_s6, 2 }
  0xbf   : > { %8860 = vmatprep.subr.msk.mxu0 %vm896_vm0, %v888_v13  ;;  %8863 = vmatprep.subr.msk.mxu1 %vm896_vm0, %v889_v14 }
  0xc0   : > { %8856 = vmatmul.mubr.msk.f32.vlgmr.msra.gmra.mrb[2].mxu0 %vm892_vm1, %v861_v8  ;;  %8859 = vmatmul.mubr.msk.f32.vlgmr.msra.gmra.mrb[2].mxu1 %vm892_vm1, %v861_v8 }
  0xc1   : > { %8861 = vmatpush1.msk.msra.mxu0 %vm896_vm0, %v866_v11  ;;  %1277 = vmatprep.mubr.f32.mxu0 %v13970_v0 }
  0xc2   : > { %8864 = vmatpush1.msk.msra.mxu1 %vm896_vm0, %v867_v12  ;;  %1348 = vmatprep.mubr.f32.mxu1 %v13970_v0 }
  0xc3   : > { %8866 = vmatprep.subr.msk.mxu0 %vm896_vm0, %v890_v17  ;;  %8869 = vmatprep.subr.msk.mxu1 %vm896_vm0, %v891_v18 }
  0xc4   : > { %8862 = vmatmul.mubr.msk.f32.vlgmr.msra.gmra.mrb[4].mxu0 %vm892_vm1, %v861_v8  ;;  %8865 = vmatmul.mubr.msk.f32.vlgmr.msra.gmra.mrb[4].mxu1 %vm892_vm1, %v861_v8 }
  0xc5   : > { %8867 = vmatpush1.msk.msra.mxu0 %vm896_vm0, %v868_v15  ;;  %1419 = vmatprep.mubr.f32.mxu0 %v13970_v0 }
  0xc6   : > { %8870 = vmatpush1.msk.msra.mxu1 %vm896_vm0, %v869_v16  ;;  %1490 = vmatprep.mubr.f32.mxu1 %v13970_v0 }
  0xc7   : > { %3442 = vperm.xlu0 %9597, %v3436_v20   ;;  %3452 = vperm.xlu1 %9598, %v3438_v28  }
  0xc8   : > { %8868 = vmatmul.mubr.msk.f32.vlgmr.msra.gmra.mrb[6].mxu0 %vm892_vm1, %v861_v8  ;;  %8871 = vmatmul.mubr.msk.f32.vlgmr.msra.gmra.mrb[6].mxu1 %vm892_vm1, %v861_v8 }
  0xc9   : > { %1694 = vmatprep.mubr.f32.mxu0 %v13970_v0  ;;  %1771 = vmatprep.mubr.f32.mxu1 %v13970_v0 }
  0xcb   : > { %3457 = vperm.xlu0 %9597, %v3439_v21   ;;  %1615 = vperm.xlu1 %9598, %v1611_v29  }
  0xcf   : > { %1620 = vperm.xlu0 %9597, %v1612_v22  }
  0xd3   : > { %6253 = vperm.xlu0 %9597, %v6245_v23  }
  0xd7   : > { %4648 = vperm.xlu0 %9597, %v4638_v24  }
  0xdb   : > { %4658 = vperm.xlu0 %9597, %v4640_v25  }
  0xdf   : > { %8038 = vperm.xlu0 %9597, %v8035_v26  }
 0x138   : > { %v11082_v30 = vpop.permute.xlu0 %873 }
 0x18f   : > { %v995_v31 = vpop.f32.mrb[0].mxu0  ;;  %v1066_v32 = vpop.f32.mrb[0].mxu1 }
 0x190   : > { %v11085_v33 = vadd.f32 %v995_v31, %v11082_v30  ;;  %v11088_v34 = vadd.f32 %v1066_v32, %v11082_v30  ;;  %v997_v35 = vpop.f32.mrb[1].mxu0  ;;  %v1068_v36 = vpop.f32.mrb[1].mxu1 }
 0x191   : > { %v11091_v37 = vadd.f32 %v997_v35, %v11082_v30  ;;  %v11094_v38 = vadd.f32 %v1068_v36, %v11082_v30 }
 0x192   : > { %v8872_v39 = vmul.f32 -1.442695, %v11085_v33  ;;  %v8874_v40 = vmul.f32 -1.442695, %v11088_v34 }
 0x193   : > { %v8873_v41 = vmul.f32 -1.442695, %v11091_v37  ;;  %v8875_v42 = vmul.f32 -1.442695, %v11094_v38  ;;  %v1137_v43 = vpop.f32.mrb[2].mxu0  ;;  %v1208_v44 = vpop.f32.mrb[2].mxu1 }
 0x194   : > { %9615 = vpow2.f32 %v8872_v39  ;;  %v11101_v45 = vadd.f32 %v1137_v43, %v11082_v30  ;;  %v11104_v46 = vadd.f32 %v1208_v44, %v11082_v30  ;;  %v1139_v47 = vpop.f32.mrb[3].mxu0  ;;  %v1210_v48 = vpop.f32.mrb[3].mxu1 }
 0x195   : > { %9617 = vpow2.f32 %v8874_v40  ;;  %v11107_v49 = vadd.f32 %v1139_v47, %v11082_v30  ;;  %v11110_v50 = vadd.f32 %v1210_v48, %v11082_v30 }
 0x196   : > { %9619 = vpow2.f32 %v8873_v41  ;;  %v8876_v51 = vmul.f32 -1.442695, %v11101_v45  ;;  %v8878_v52 = vmul.f32 -1.442695, %v11104_v46 }
 0x197   : > { %9621 = vpow2.f32 %v8875_v42  ;;  %v8877_v53 = vmul.f32 -1.442695, %v11107_v49  ;;  %v8879_v54 = vmul.f32 -1.442695, %v11110_v50  ;;  %v1279_v55 = vpop.f32.mrb[4].mxu0  ;;  %v1350_v56 = vpop.f32.mrb[4].mxu1 }
 0x198   : > { %9623 = vpow2.f32 %v8876_v51  ;;  %v11117_v57 = vadd.f32 %v1279_v55, %v11082_v30  ;;  %v11120_v58 = vadd.f32 %v1350_v56, %v11082_v30  ;;  %v1281_v59 = vpop.f32.mrb[5].mxu0  ;;  %v1352_v60 = vpop.f32.mrb[5].mxu1  ;;  %v11160_v56 = vld [vmem:[%s13928_s8] sm:$0xff] }
 0x199   : > { %9625 = vpow2.f32 %v8878_v52  ;;  %v11123_v61 = vadd.f32 %v1281_v59, %v11082_v30  ;;  %v11126_v62 = vadd.f32 %v1352_v60, %v11082_v30 }
 0x19a   : > { %9627 = vpow2.f32 %v8877_v53  ;;  %v8880_v63 = vmul.f32 -1.442695, %v11117_v57  ;;  %v8882_v1 = vmul.f32 -1.442695, %v11120_v58 }
 0x19b   : > { %9629 = vpow2.f32 %v8879_v54  ;;  %v8881_v2 = vmul.f32 -1.442695, %v11123_v61  ;;  %v8883_v3 = vmul.f32 -1.442695, %v11126_v62  ;;  %v1421_v4 = vpop.f32.mrb[6].mxu0  ;;  %v1492_v5 = vpop.f32.mrb[6].mxu1 }
 0x19c   : > { %9631 = vpow2.f32 %v8880_v63  ;;  %v1423_v6 = vpop.f32.mrb[7].mxu0  ;;  %v1494_v7 = vpop.f32.mrb[7].mxu1  ;;  %v11133_v15 = vadd.f32 %v1421_v4, %v11082_v30  ;;  %v11137_v27 = vadd.f32 %v1492_v5, %v11082_v30 }
 0x19d   : > { %9633 = vpow2.f32 %v8882_v1  ;;  %v11140_v31 = vadd.f32 %v1423_v6, %v11082_v30  ;;  %v11143_v35 = vadd.f32 %v1494_v7, %v11082_v30 }
 0x19e   : > { %v9616_v8 = vpop.eup %9615  ;;  %9635 = vpow2.f32 %v8881_v2  ;;  %v8884_v24 = vmul.f32 -1.442695, %v11133_v15  ;;  %v8886_v42 = vmul.f32 -1.442695, %v11137_v27 }
 0x19f   : > { %v9618_v9 = vpop.eup %9617  ;;  %v1545_v10 = vadd.f32 1.0, %v9616_v8  ;;  %9637 = vpow2.f32 %v8883_v3  ;;  %v8885_v44 = vmul.f32 -1.442695, %v11140_v31  ;;  %v8887_v48 = vmul.f32 -1.442695, %v11143_v35 }
 0x1a0   : > { %v9620_v11 = vpop.eup %9619  ;;  %v1547_v12 = vadd.f32 1.0, %v9618_v9 }
 0x1a1   : > { %v9622_v13 = vpop.eup %9621  ;;  %9639 = vrcp.f32 %v1545_v10  ;;  %v1546_v14 = vadd.f32 1.0, %v9620_v11 }
 0x1a2   : > { %v9624_v16 = vpop.eup %9623  ;;  %9641 = vrcp.f32 %v1547_v12  ;;  %v1548_v17 = vadd.f32 1.0, %v9622_v13 }
 0x1a3   : > { %v9626_v18 = vpop.eup %9625  ;;  %9643 = vrcp.f32 %v1546_v14  ;;  %v1549_v19 = vadd.f32 1.0, %v9624_v16  ;;  %v2473_v14 = vld [vmem:[%s10988_s19 + $0x8] sm:$0xff] }
 0x1a4   : > { %v9628_v20 = vpop.eup %9627  ;;  %9645 = vrcp.f32 %v1548_v17  ;;  %v1551_v21 = vadd.f32 1.0, %v9626_v18  ;;  %v2489_v16 = vld [vmem:[%s10988_s19 + $0x88] sm:$0x3]  ;;  %v2475_v17 = vld [vmem:[%s10988_s19 + $0x18] sm:$0xff] }
 0x1a5   : > { %v9630_v22 = vpop.eup %9629  ;;  %9647 = vrcp.f32 %v1549_v19  ;;  %v1550_v23 = vadd.f32 1.0, %v9628_v20  ;;  %v2491_v20 = vld [vmem:[%s10988_s19 + $0x98] sm:$0x3] }
 0x1a6   : > { %v9632_v25 = vpop.eup %9631  ;;  %9649 = vrcp.f32 %v1551_v21  ;;  %v1552_v26 = vadd.f32 1.0, %v9630_v22  ;;  %v2472_v21 = vld [vmem:[%s10988_s19] sm:$0xff] }
 0x1a7   : > { %v9634_v28 = vpop.eup %9633  ;;  %9651 = vrcp.f32 %v1550_v23  ;;  %v1553_v29 = vadd.f32 1.0, %v9632_v25  ;;  %v2488_v22 = vld [vmem:[%s10988_s19 + $0x80] sm:$0x3]  ;;  %v2474_v25 = vld [vmem:[%s10988_s19 + $0x10] sm:$0xff] }
 0x1a8   : > { %v9636_v32 = vpop.eup %9635  ;;  %9653 = vrcp.f32 %v1552_v26  ;;  %v1555_v39 = vadd.f32 1.0, %v9634_v28  ;;  %v2490_v26 = vld [vmem:[%s10988_s19 + $0x90] sm:$0x3] }
 0x1a9   : > { %v9638_v36 = vpop.eup %9637  ;;  %v1554_v40 = vadd.f32 1.0, %v9636_v32  ;;  %9655 = vpow2.f32 %v8884_v24  ;;  %v9261_v32 = vpack.c.bf16 %v2488_v22, %v2472_v21 }
 0x1aa   : > { %9657 = vrcp.f32 %v1553_v29  ;;  %v1556_v41 = vadd.f32 1.0, %v9638_v36  ;;  %v9258_v29 = vpack.c.bf16 %v2489_v16, %v2473_v14  ;;  %v9267_v36 = vpack.c.bf16 %v2490_v26, %v2474_v25  ;;  %v2500_v14 = vld [vmem:[%s10988_s19 + $0xe0] sm:$0x3]  ;;  %v2486_v16 = vld [vmem:[%s10988_s19 + $0x70] sm:$0xff] }
 0x1ab   : > { %v9640_v43 = vpop.eup %9639  ;;  %9659 = vrcp.f32 %v1554_v40  ;;  %v2495_v40 = vld [vmem:[%s10988_s19 + $0xb8] sm:$0x3] }
 0x1ac   : > { %v9642_v47 = vpop.eup %9641  ;;  %9661 = vrcp.f32 %v1556_v41  ;;  %v11152_v54 = vmul.f32 %v9640_v43, %v11085_v33  ;;  %v2476_v43 = vld [vmem:[%s10988_s19 + $0x20] sm:$0xff] }
 0x1ad   : > { %v9644_v51 = vpop.eup %9643  ;;  %9663 = vrcp.f32 %v1555_v39  ;;  %v11163_v60 = vmul.f32 %v9642_v47, %v11088_v34  ;;  %v2479_v39 = vld [vmem:[%s10988_s19 + $0x38] sm:$0xff]  ;;  %v2478_v47 = vld [vmem:[%s10988_s19 + $0x30] sm:$0xff] }
 0x1ae   : > { %v9646_v30 = vpop.eup %9645  ;;  %v11149_v52 = vmul.f32 %v9644_v51, %v11091_v37  ;;  %9665 = vpow2.f32 %v8886_v42  ;;  %14088 = vst [vmem:[#allocation23_spill] sm:$0xff] %v11152_v54  ;;  %v9276_v42 = vpack.c.bf16 %v2495_v40, %v2479_v39  ;;  %v2481_v51 = vld [vmem:[%s10988_s19 + $0x48] sm:$0xff] }
 0x1af   : > { %v9648_v53 = vpop.eup %9647  ;;  %v11155_v55 = vmul.f32 %v9646_v30, %v11094_v38  ;;  %9667 = vpow2.f32 %v8885_v44  ;;  %14090 = vst [vmem:[#allocation25_spill] sm:$0xff] %v11163_v60  ;;  %v2492_v44 = vld [vmem:[%s10988_s19 + $0xa0] sm:$0x3]  ;;  %v2497_v30 = vld [vmem:[%s10988_s19 + $0xc8] sm:$0x3] }
 0x1b0   : > { %14087 = vst [vmem:[#allocation22_spill] sm:$0xff] %v11149_v52  ;;  %v9650_v59 = vpop.eup %9649  ;;  %9669 = vpow2.f32 %v8887_v48  ;;  %1630 = vmatprep.subr.mxu0 %v11149_v52  ;;  %v11175_v34 = vmul.f32 %v9648_v53, %v11101_v45  ;;  %v2494_v48 = vld [vmem:[%s10988_s19 + $0xb0] sm:$0x3]  ;;  %v11303_v53 = vld [vmem:[%s14105_s20] sm:$0xff] }
 0x1b1   : > { %14089 = vst [vmem:[#allocation24_spill] sm:$0xff] %v11155_v55  ;;  %v9652_v37 = vpop.eup %9651  ;;  %1707 = vmatprep.subr.mxu1 %v11155_v55  ;;  %1631 = vmatpush1.msra.mxu0 %v11152_v54  ;;  %v11189_v3 = vmul.f32 %v9650_v59, %v11104_v46  ;;  %v2499_v59 = vld [vmem:[%s10988_s19 + $0xd8] sm:$0x3] }
 0x1b2   : > { %v9654_v33 = vpop.eup %9653  ;;  %v11169_v38 = vmul.f32 %v9652_v37, %v11107_v49  ;;  %1708 = vmatpush1.msra.mxu1 %v11163_v60  ;;  %8888 = vmatmul.mubr.msk.f32.vlgmr.msra.gmra.mrb[8].mxu0 %vm1623_vm2, %v11160_v56  ;;  %14092 = vst [vmem:[#allocation27_spill] sm:$0xff] %v11175_v34  ;;  %v11186_v49 = vld [vmem:[%s13928_s8 + $0x8] sm:$0xff]  ;;  %v9273_v37 = vpack.c.bf16 %v2492_v44, %v2476_v43 }
 0x1b3   : > { %v9656_v63 = vpop.eup %9655  ;;  %v11178_v1 = vmul.f32 %v9654_v33, %v11110_v50  ;;  %8890 = vmatmul.mubr.msk.f32.vlgmr.msra.gmra.mrb[8].mxu1 %vm1623_vm2, %v11160_v56  ;;  %1700 = vmatprep.mubr.f32.mxu0 %v13970_v0  ;;  %14094 = vst [vmem:[#allocation29_spill] sm:$0xff] %v11189_v3  ;;  %v9279_v33 = vpack.c.bf16 %v2494_v48, %v2478_v47 }
 0x1b4   : > { %14091 = vst [vmem:[#allocation26_spill] sm:$0xff] %v11169_v38  ;;  %v9658_v2 = vpop.eup %9657  ;;  %1784 = vmatprep.subr.mxu0 %v11169_v38  ;;  %1777 = vmatprep.mubr.f32.mxu1 %v13970_v0  ;;  %v1557_v5 = vadd.f32 1.0, %v9656_v63  ;;  %v9282_v63 = vpack.c.bf16 %v2497_v30, %v2481_v51 }
 0x1b5   : > { %14093 = vst [vmem:[#allocation28_spill] sm:$0xff] %v11178_v1  ;;  %v9660_v45 = vpop.eup %9659  ;;  %1861 = vmatprep.subr.mxu1 %v11178_v1  ;;  %1785 = vmatpush1.msra.mxu0 %v11175_v34  ;;  %v11210_v8 = vmul.f32 %v9658_v2, %v11117_v57  ;;  %v2471_v2 = vld [vmem:[%s14105_s20 + $0x8] sm:$0xff] }
 0x1b6   : > { %v9662_v50 = vpop.eup %9661  ;;  %v11196_v4 = vmul.f32 %v9660_v45, %v11123_v61  ;;  %1862 = vmatpush1.msra.mxu1 %v11189_v3  ;;  %8889 = vmatmul.mubr.msk.f32.gmra.mrb[10].mxu0 %vm1623_vm2, %v11186_v49  ;;  %9671 = vrcp.f32 %v1557_v5  ;;  %v2480_v45 = vld [vmem:[%s10988_s19 + $0x40] sm:$0xff]  ;;  %v2482_v5 = vld [vmem:[%s10988_s19 + $0x50] sm:$0xff] }
 0x1b7   : > { %v9664_v46 = vpop.eup %9663  ;;  %v11202_v6 = vmul.f32 %v9662_v50, %v11126_v62  ;;  %8891 = vmatmul.mubr.msk.f32.gmra.mrb[10].mxu1 %vm1623_vm2, %v11186_v49  ;;  %1848 = vmatprep.mubr.f32.mxu0 %v13970_v0  ;;  %14097 = vst [vmem:[#allocation32_spill] sm:$0xff] %v11210_v8  ;;  %v2496_v50 = vld [vmem:[%s10988_s19 + $0xc0] sm:$0x3] }
 0x1b8   : > { %14095 = vst [vmem:[#allocation30_spill] sm:$0xff] %v11196_v4  ;;  %v9666_v7 = vpop.eup %9665  ;;  %1938 = vmatprep.subr.mxu0 %v11196_v4  ;;  %1925 = vmatprep.mubr.f32.mxu1 %v13970_v0  ;;  %v11214_v62 = vmul.f32 %v9664_v46, %v11120_v58  ;;  %v2498_v46 = vld [vmem:[%s10988_s19 + $0xd0] sm:$0x3] }
 0x1b9   : > { %14096 = vst [vmem:[#allocation31_spill] sm:$0xff] %v11202_v6  ;;  %v9668_v61 = vpop.eup %9667  ;;  %v1559_v9 = vadd.f32 1.0, %v9666_v7  ;;  %2015 = vmatprep.subr.mxu1 %v11202_v6  ;;  %v2485_v7 = vld [vmem:[%s10988_s19 + $0x68] sm:$0xff] }
 0x1ba   : > { %v9670_v10 = vpop.eup %9669  ;;  %14098 = vst [vmem:[#allocation33_spill] sm:$0xff] %v11214_v62  ;;  %v1558_v11 = vadd.f32 1.0, %v9668_v61  ;;  %8892 = vmatmul.mubr.msk.f32.vlgmr.msra.gmra.mrb[12].mxu0 %vm1623_vm2, %v11160_v56  ;;  %v2501_v61 = vld [vmem:[%s10988_s19 + $0xe8] sm:$0x3] }
 0x1bb   : > { %9673 = vrcp.f32 %v1559_v9  ;;  %v1560_v12 = vadd.f32 1.0, %v9670_v10  ;;  %8894 = vmatmul.mubr.msk.f32.vlgmr.msra.gmra.mrb[12].mxu1 %vm1623_vm2, %v11160_v56  ;;  %1939 = vmatpush1.msra.mxu0 %v11210_v8  ;;  %v2487_v9 = vld [vmem:[%s10988_s19 + $0x78] sm:$0xff] }
 0x1bc   : > { %9675 = vrcp.f32 %v1558_v11  ;;  %2016 = vmatpush1.msra.mxu1 %v11214_v62  ;;  %1854 = vmatprep.mubr.f32.mxu0 %v13970_v0  ;;  %v2503_v10 = vld [vmem:[%s10988_s19 + $0xf8] sm:$0x3]  ;;  %v9285_v11 = vpack.c.bf16 %v2496_v50, %v2480_v45 }
 0x1bd   : > { %9677 = vrcp.f32 %v1560_v12  ;;  %1931 = vmatprep.mubr.f32.mxu1 %v13970_v0  ;;  %v9291_v12 = vpack.c.bf16 %v2498_v46, %v2482_v5 }
 0x1be   : > { %8893 = vmatmul.mubr.msk.f32.gmra.mrb[14].mxu0 %vm1623_vm2, %v11186_v49 }
 0x1bf   : > { %8895 = vmatmul.mubr.msk.f32.gmra.mrb[14].mxu1 %vm1623_vm2, %v11186_v49  ;;  %2002 = vmatprep.mubr.f32.mxu0 %v13970_v0 }
 0x1c0   : > { %2079 = vmatprep.mubr.f32.mxu1 %v13970_v0  ;;  %v9672_v57 = vpop.eup %9671 }
 0x1c1   : > { %v11251_v23 = vmul.f32 %v9672_v57, %v11133_v15  ;;  %v9294_v57 = vpack.c.bf16 %v2501_v61, %v2485_v7 }
 0x1c2   : > { %8896 = vmatmul.mubr.msk.f32.vlgmr.msra.gmra.mrb[16].mxu0 %vm1623_vm2, %v11160_v56 }
 0x1c3   : > { %8898 = vmatmul.mubr.msk.f32.vlgmr.msra.gmra.mrb[16].mxu1 %vm1623_vm2, %v11160_v56  ;;  %2008 = vmatprep.mubr.f32.mxu0 %v13970_v0  ;;  %14100 = vst [vmem:[#allocation35_spill] sm:$0xff] %v11251_v23 }
 0x1c4   : > { %2085 = vmatprep.mubr.f32.mxu1 %v13970_v0 }
 0x1c5   : > { %v9674_v58 = vpop.eup %9673 }
 0x1c6   : > { %v9676_v13 = vpop.eup %9675  ;;  %8897 = vmatmul.mubr.msk.f32.gmra.mrb[18].mxu0 %vm1623_vm2, %v11186_v49  ;;  %v11260_v28 = vmul.f32 %v9674_v58, %v11137_v27  ;;  %v2493_v27 = vld [vmem:[%s10988_s19 + $0xa8] sm:$0x3]  ;;  %v9300_v58 = vpack.c.bf16 %v2503_v10, %v2487_v9 }
 0x1c7   : > { %v9678_v18 = vpop.eup %9677  ;;  %v11242_v19 = vmul.f32 %v9676_v13, %v11140_v31  ;;  %8899 = vmatmul.mubr.msk.f32.gmra.mrb[18].mxu1 %vm1623_vm2, %v11186_v49  ;;  %2156 = vmatprep.mubr.f32.mxu0 %v13970_v0  ;;  %v9264_v31 = vpack.c.bf16 %v2491_v20, %v2475_v17  ;;  %v2484_v13 = vld [vmem:[%s10988_s19 + $0x60] sm:$0xff]  ;;  %v2502_v17 = vld [vmem:[%s10988_s19 + $0xf0] sm:$0x3] }
 0x1c8   : > { %v11254_v24 = vmul.f32 %v9678_v18, %v11143_v35  ;;  %2233 = vmatprep.mubr.f32.mxu1 %v13970_v0  ;;  %14102 = vst [vmem:[#allocation37_spill] sm:$0xff] %v11260_v28  ;;  %v2477_v35 = vld [vmem:[%s10988_s19 + $0x28] sm:$0xff]  ;;  %v9297_v18 = vpack.c.bf16 %v2500_v14, %v2484_v13  ;;  %v9303_v20 = vpack.c.bf16 %v2502_v17, %v2486_v16 }
 0x1c9   : > { %14099 = vst [vmem:[#allocation34_spill] sm:$0xff] %v11242_v19  ;;  %2092 = vmatprep.subr.mxu0 %v11242_v19  ;;  %v9270_v41 = vpack.c.bf16 %v2493_v27, %v2477_v35 }
 0x1ca   : > { %14101 = vst [vmem:[#allocation36_spill] sm:$0xff] %v11254_v24  ;;  %2169 = vmatprep.subr.mxu1 %v11254_v24  ;;  %2093 = vmatpush1.msra.mxu0 %v11251_v23 }
 0x1cb   : > { %2170 = vmatpush1.msra.mxu1 %v11260_v28  ;;  %8900 = vmatmul.mubr.msk.f32.vlgmr.msra.gmra.mrb[20].mxu0 %vm1623_vm2, %v11160_v56 }
 0x1cc   : > { %8902 = vmatmul.mubr.msk.f32.vlgmr.msra.gmra.mrb[20].mxu1 %vm1623_vm2, %v11160_v56  ;;  %2162 = vmatprep.mubr.f32.mxu0 %v13970_v0  ;;  %v2483_v56 = vld [vmem:[%s10988_s19 + $0x58] sm:$0xff]  ;;  %s14325_s19 = sld [smem:[#allocation125_spill]] }
 0x1cd   : > { %2239 = vmatprep.mubr.f32.mxu1 %v13970_v0  ;;  %9260 = vmatprep.subr.msk.bf16.mxu0 %vm11266_vm5, %v9258_v29 }
 0x1ce   : > { %9266 = vmatprep.subr.msk.bf16.mxu1 %vm11266_vm5, %v9264_v31  ;;  %9263 = vmatpush1.bf16.msk.msra.mxu0 %vm11266_vm5, %v9261_v32 }
 0x1cf   : > { %8901 = vmatmul.mubr.msk.f32.gmra.mrb[22].mxu0 %vm1623_vm2, %v11186_v49  ;;  %9269 = vmatpush1.bf16.msk.msra.mxu1 %vm11266_vm5, %v9267_v36 }
 0x1d0   : > { %8903 = vmatmul.mubr.msk.f32.gmra.mrb[22].mxu1 %vm1623_vm2, %v11186_v49  ;;  %2656 = vmatprep.mubr.f32.mxu0 %v13970_v0  ;;  %v9288_v49 = vpack.c.bf16 %v2499_v59, %v2483_v56 }
 0x1d1   : > { %2733 = vmatprep.mubr.f32.mxu1 %v13970_v0  ;;  %9272 = vmatprep.subr.msk.bf16.mxu0 %vm11266_vm5, %v9270_v41 }
 0x1d2   : > { %9278 = vmatprep.subr.msk.bf16.mxu1 %vm11266_vm5, %v9276_v42  ;;  %s858_s23 = scalar_lea.vmem %s14325_s19, %s14443_s6 }
 0x1d3   : > { %8938 = vmatmul.mubr.msk.f32.vlgmr.msra.gmra.mrb[24].mxu0 %vm2536_vm6, %v11303_v53 }
 0x1d4   : > { %8942 = vmatmul.mubr.msk.f32.vlgmr.msra.gmra.mrb[24].mxu1 %vm2536_vm6, %v11303_v53  ;;  %2662 = vmatprep.mubr.f32.mxu0 %v13970_v0 }
 0x1d5   : > { %2739 = vmatprep.mubr.f32.mxu1 %v13970_v0  ;;  %9275 = vmatpush1.bf16.msk.msra.mxu0 %vm11266_vm5, %v9273_v37 }
 0x1d6   : > { %9281 = vmatpush1.bf16.msk.msra.mxu1 %vm11266_vm5, %v9279_v33  ;;  %9284 = vmatprep.subr.msk.bf16.mxu0 %vm11266_vm5, %v9282_v63 }
 0x1d7   : > { %8939 = vmatmul.mubr.msk.f32.gmra.mrb[26].mxu0 %vm2536_vm6, %v2471_v2  ;;  %9290 = vmatprep.subr.msk.bf16.mxu1 %vm11266_vm5, %v9288_v49 }
 0x1d8   : > { %8943 = vmatmul.mubr.msk.f32.gmra.mrb[26].mxu1 %vm2536_vm6, %v2471_v2  ;;  %2810 = vmatprep.mubr.f32.mxu0 %v13970_v0 }
 0x1d9   : > { %2887 = vmatprep.mubr.f32.mxu1 %v13970_v0 }
 0x1db   : > { %8946 = vmatmul.mubr.msk.f32.vlgmr.msra.gmra.mrb[28].mxu0 %vm2536_vm6, %v11303_v53 }
 0x1dc   : > { %8950 = vmatmul.mubr.msk.f32.vlgmr.msra.gmra.mrb[28].mxu1 %vm2536_vm6, %v11303_v53  ;;  %2816 = vmatprep.mubr.f32.mxu0 %v13970_v0 }
 0x1dd   : > { %2893 = vmatprep.mubr.f32.mxu1 %v13970_v0  ;;  %9287 = vmatpush1.bf16.msk.msra.mxu0 %vm11266_vm5, %v9285_v11 }
 0x1de   : > { %9293 = vmatpush1.bf16.msk.msra.mxu1 %vm11266_vm5, %v9291_v12  ;;  %9296 = vmatprep.subr.msk.bf16.mxu0 %vm11266_vm5, %v9294_v57 }
 0x1df   : > { %8947 = vmatmul.mubr.msk.f32.gmra.mrb[30].mxu0 %vm2536_vm6, %v2471_v2  ;;  %9302 = vmatprep.subr.msk.bf16.mxu1 %vm11266_vm5, %v9300_v58 }
 0x1e0   : > { %8951 = vmatmul.mubr.msk.f32.gmra.mrb[30].mxu1 %vm2536_vm6, %v2471_v2  ;;  %2964 = vmatprep.mubr.f32.mxu0 %v13970_v0 }
 0x1e1   : > { %3041 = vmatprep.mubr.f32.mxu1 %v13970_v0 }
 0x1e3   : > { %8954 = vmatmul.mubr.msk.f32.vlgmr.msra.gmra.mrb[32].mxu0 %vm2536_vm6, %v11303_v53 }
 0x1e4   : > { %8958 = vmatmul.mubr.msk.f32.vlgmr.msra.gmra.mrb[32].mxu1 %vm2536_vm6, %v11303_v53  ;;  %2970 = vmatprep.mubr.f32.mxu0 %v13970_v0 }
 0x1e5   : > { %3047 = vmatprep.mubr.f32.mxu1 %v13970_v0  ;;  %9299 = vmatpush1.bf16.msk.msra.mxu0 %vm11266_vm5, %v9297_v18 }
 0x1e6   : > { %9305 = vmatpush1.bf16.msk.msra.mxu1 %vm11266_vm5, %v9303_v20 }
 0x1e7   : > { %8955 = vmatmul.mubr.msk.f32.gmra.mrb[34].mxu0 %vm2536_vm6, %v2471_v2 }
 0x1e8   : > { %8959 = vmatmul.mubr.msk.f32.gmra.mrb[34].mxu1 %vm2536_vm6, %v2471_v2  ;;  %3118 = vmatprep.mubr.f32.mxu0 %v13970_v0 }
 0x1e9   : > { %3195 = vmatprep.mubr.f32.mxu1 %v13970_v0 }
 0x1eb   : > { %8962 = vmatmul.mubr.msk.f32.vlgmr.msra.gmra.mrb[36].mxu0 %vm2536_vm6, %v11303_v53 }
 0x1ec   : > { %8966 = vmatmul.mubr.msk.f32.vlgmr.msra.gmra.mrb[36].mxu1 %vm2536_vm6, %v11303_v53  ;;  %3124 = vmatprep.mubr.f32.mxu0 %v13970_v0 }
 0x1ed   : > { %3201 = vmatprep.mubr.f32.mxu1 %v13970_v0 }
 0x1ef   : > { %8963 = vmatmul.mubr.msk.f32.gmra.mrb[38].mxu0 %vm2536_vm6, %v2471_v2 }
 0x1f0   : > { %8967 = vmatmul.mubr.msk.f32.gmra.mrb[38].mxu1 %vm2536_vm6, %v2471_v2  ;;  %3537 = vmatprep.mubr.f32.mxu0 %v13970_v0 }
 0x1f1   : > { %3626 = vmatprep.mubr.f32.mxu1 %v13970_v0 }
 0x285   : > { %v11387_v21 = vpop.f32.mrb[8].mxu0 }
 0x286   : > { %14106 = vst [vmem:[#allocation38_spill] sm:$0xff] %v11387_v21  ;;  %v11389_v22 = vpop.f32.mrb[8].mxu1  ;;  %v11391_v25 = vpop.f32.mrb[9].mxu0 }
 0x287   : > { %14107 = vst [vmem:[#allocation39_spill] sm:$0xff] %v11389_v22  ;;  %14108 = vst [vmem:[#allocation40_spill] sm:$0xff] %v11391_v25  ;;  %v11393_v26 = vpop.f32.mrb[9].mxu1 }
 0x288   : > { %14109 = vst [vmem:[#allocation41_spill] sm:$0xff] %v11393_v26 }
 0x289   : > { %v11395_v29 = vpop.f32.mrb[10].mxu0 }
 0x28a   : > { %14110 = vst [vmem:[#allocation42_spill] sm:$0xff] %v11395_v29  ;;  %v11397_v15 = vpop.f32.mrb[10].mxu1  ;;  %v11399_v31 = vpop.f32.mrb[11].mxu0  ;;  %v2510_v29 = vld [vmem:[%s10998_s13 + $0x30] sm:$0xff] }
 0x28b   : > { %14111 = vst [vmem:[#allocation43_spill] sm:$0xff] %v11397_v15  ;;  %14112 = vst [vmem:[#allocation44_spill] sm:$0xff] %v11399_v31  ;;  %v11401_v32 = vpop.f32.mrb[11].mxu1 }
 0x28c   : > { %14113 = vst [vmem:[#allocation45_spill] sm:$0xff] %v11401_v32 }
 0x28d   : > { %v11403_v35 = vpop.f32.mrb[12].mxu0 }
 0x28e   : > { %14114 = vst [vmem:[#allocation46_spill] sm:$0xff] %v11403_v35  ;;  %v11405_v27 = vpop.f32.mrb[12].mxu1  ;;  %v11407_v36 = vpop.f32.mrb[13].mxu0 }
 0x28f   : > { %14115 = vst [vmem:[#allocation47_spill] sm:$0xff] %v11405_v27  ;;  %14116 = vst [vmem:[#allocation48_spill] sm:$0xff] %v11407_v36  ;;  %v11409_v39 = vpop.f32.mrb[13].mxu1 }
 0x290   : > { %14117 = vst [vmem:[#allocation49_spill] sm:$0xff] %v11409_v39 }
 0x291   : > { %v11411_v40 = vpop.f32.mrb[14].mxu0 }
 0x292   : > { %14118 = vst [vmem:[#allocation50_spill] sm:$0xff] %v11411_v40  ;;  %v11413_v41 = vpop.f32.mrb[14].mxu1  ;;  %v11415_v42 = vpop.f32.mrb[15].mxu0  ;;  %v7313_v40 = vld [vmem:[%s14138_s2] sm:$0xff]  ;;  %s14287_s2 = sld [smem:[#allocation131_spill]] }
 0x293   : > { %14119 = vst [vmem:[#allocation51_spill] sm:$0xff] %v11413_v41  ;;  %14120 = vst [vmem:[#allocation52_spill] sm:$0xff] %v11415_v42  ;;  %v11417_v43 = vpop.f32.mrb[15].mxu1  ;;  %v2522_v42 = vld [vmem:[%s10998_s13 + $0x90] sm:$0xff] }
 0x294   : > { %14121 = vst [vmem:[#allocation53_spill] sm:$0xff] %v11417_v43 }
 0x295   : > { %v11419_v44 = vpop.f32.mrb[16].mxu0 }
 0x296   : > { %14122 = vst [vmem:[#allocation54_spill] sm:$0xff] %v11419_v44  ;;  %v11421_v47 = vpop.f32.mrb[16].mxu1  ;;  %v11423_v48 = vpop.f32.mrb[17].mxu0 }
 0x297   : > { %14123 = vst [vmem:[#allocation55_spill] sm:$0xff] %v11421_v47  ;;  %14124 = vst [vmem:[#allocation56_spill] sm:$0xff] %v11423_v48  ;;  %v11425_v51 = vpop.f32.mrb[17].mxu1  ;;  %v2507_v48 = vld [vmem:[%s10998_s13 + $0x18] sm:$0xff] }
 0x298   : > { %14125 = vst [vmem:[#allocation57_spill] sm:$0xff] %v11425_v51 }
 0x299   : > { %v11427_v30 = vpop.f32.mrb[18].mxu0 }
 0x29a   : > { %14126 = vst [vmem:[#allocation58_spill] sm:$0xff] %v11427_v30  ;;  %v11429_v53 = vpop.f32.mrb[18].mxu1  ;;  %v11431_v56 = vpop.f32.mrb[19].mxu0 }
 0x29b   : > { %14127 = vst [vmem:[#allocation59_spill] sm:$0xff] %v11429_v53  ;;  %14128 = vst [vmem:[#allocation60_spill] sm:$0xff] %v11431_v56  ;;  %v11433_v59 = vpop.f32.mrb[19].mxu1  ;;  %v2505_v56 = vld [vmem:[%s10998_s13 + $0x8] sm:$0xff] }
 0x29c   : > { %14129 = vst [vmem:[#allocation61_spill] sm:$0xff] %v11433_v59 }
 0x29e   : > { %v11435_v37 = vpop.f32.mrb[20].mxu0 }
 0x29f   : > { %14130 = vst [vmem:[#allocation62_spill] sm:$0xff] %v11435_v37  ;;  %v11437_v33 = vpop.f32.mrb[20].mxu1  ;;  %v11439_v63 = vpop.f32.mrb[21].mxu0  ;;  %v2506_v37 = vld [vmem:[%s10998_s13 + $0x10] sm:$0xff] }
 0x2a0   : > { %14131 = vst [vmem:[#allocation63_spill] sm:$0xff] %v11437_v33  ;;  %14132 = vst [vmem:[#allocation64_spill] sm:$0xff] %v11439_v63  ;;  %v11441_v49 = vpop.f32.mrb[21].mxu1  ;;  %v2504_v33 = vld [vmem:[%s10998_s13] sm:$0xff] }
 0x2a1   : > { %14133 = vst [vmem:[#allocation65_spill] sm:$0xff] %v11441_v49 }
 0x2a2   : > { %v11443_v2 = vpop.f32.mrb[22].mxu0 }
 0x2a3   : > { %14134 = vst [vmem:[#allocation66_spill] sm:$0xff] %v11443_v2  ;;  %v11445_v45 = vpop.f32.mrb[22].mxu1  ;;  %v11447_v50 = vpop.f32.mrb[23].mxu0 }
 0x2a4   : > { %14135 = vst [vmem:[#allocation67_spill] sm:$0xff] %v11445_v45  ;;  %14136 = vst [vmem:[#allocation68_spill] sm:$0xff] %v11447_v50  ;;  %v11449_v5 = vpop.f32.mrb[23].mxu1  ;;  %v4637_v45 = vld [vmem:[%s13934_s14] sm:$0xff] }
 0x2a5   : > { %14137 = vst [vmem:[#allocation69_spill] sm:$0xff] %v11449_v5  ;;  %v6244_v5 = vld [vmem:[%s13937_s17] sm:$0xff] }
 0x2a6   : > { %v2658_v46 = vpop.f32.mrb[24].mxu0  ;;  %6248 = vperm.xlu1 %9598, %v6244_v5   ;;  %v4639_v5 = vld [vmem:[%s13934_s14 + $0x10] sm:$0xff] }
 0x2a7   : > { %v2735_v7 = vpop.f32.mrb[24].mxu1  ;;  %v2660_v61 = vpop.f32.mrb[25].mxu0  ;;  %v11495_v51 = vadd.f32 %v2658_v46, %v2504_v33  ;;  %v2521_v33 = vld [vmem:[%s10998_s13 + $0x88] sm:$0xff] }
 0x2a8   : > { %v2737_v9 = vpop.f32.mrb[25].mxu1  ;;  %v11500_v44 = vadd.f32 %v2735_v7, %v2506_v37  ;;  %v11503_v43 = vadd.f32 %v2660_v61, %v2505_v56 }
 0x2a9   : > { %v11511_v39 = vadd.f32 %v2737_v9, %v2507_v48  ;;  %v8968_v37 = vmul.f32 -1.442695, %v11495_v51 }
 0x2aa   : > { %v2664_v10 = vpop.f32.mrb[26].mxu0  ;;  %4643 = vperm.xlu1 %9598, %v4637_v45   ;;  %v2520_v45 = vld [vmem:[%s10998_s13 + $0x80] sm:$0xff]  ;;  %v8970_v61 = vmul.f32 -1.442695, %v11500_v44  ;;  %v8969_v27 = vmul.f32 -1.442695, %v11503_v43 }
 0x2ab   : > { %v2741_v11 = vpop.f32.mrb[26].mxu1  ;;  %v2666_v12 = vpop.f32.mrb[27].mxu0  ;;  %v11519_v7 = vadd.f32 %v2664_v10, %v2520_v45  ;;  %v8971_v35 = vmul.f32 -1.442695, %v11511_v39  ;;  %9679 = vpow2.f32 %v8968_v37  ;;  %v2523_v45 = vld [vmem:[%s10998_s13 + $0x98] sm:$0xff]  ;;  %v2508_v37 = vld [vmem:[%s10998_s13 + $0x20] sm:$0xff] }
 0x2ac   : > { %v11451_v57 = vpop.f32.mrb[27].mxu1  ;;  %v11527_v48 = vadd.f32 %v2666_v12, %v2521_v33  ;;  %9681 = vpow2.f32 %v8970_v61 }
 0x2ad   : > { %9683 = vpow2.f32 %v8969_v27  ;;  %v11545_v25 = vadd.f32 %v11451_v57, %v2523_v45  ;;  %v2509_v27 = vld [vmem:[%s10998_s13 + $0x28] sm:$0xff] }
 0x2ae   : > { %v11453_v58 = vpop.f32.mrb[28].mxu0  ;;  %4653 = vperm.xlu1 %9598, %v4639_v5   ;;  %v11524_v5 = vadd.f32 %v2741_v11, %v2522_v42  ;;  %v8984_v42 = vmul.f32 -1.442695, %v11519_v7  ;;  %v8985_v12 = vmul.f32 -1.442695, %v11527_v48  ;;  %9685 = vpow2.f32 %v8971_v35 }
 0x2af   : > { %v11455_v13 = vpop.f32.mrb[28].mxu1  ;;  %v11457_v14 = vpop.f32.mrb[29].mxu0 }
 0x2b0   : > { %v11459_v16 = vpop.f32.mrb[29].mxu1  ;;  %9687 = vpow2.f32 %v8984_v42  ;;  %v11549_v42 = vadd.f32 %v11453_v58, %v2508_v37  ;;  %v11557_v24 = vadd.f32 %v11457_v14, %v2509_v27  ;;  %v8987_v37 = vmul.f32 -1.442695, %v11545_v25  ;;  %v2527_v27 = vld [vmem:[%s10998_s13 + $0xb8] sm:$0xff] }
 0x2b2   : > { %v11461_v17 = vpop.f32.mrb[30].mxu0  ;;  %7316 = vperm.xlu1 %9598, %v7313_v40   ;;  %v8986_v40 = vmul.f32 -1.442695, %v11524_v5 }
 0x2b3   : > { %v11463_v18 = vpop.f32.mrb[30].mxu1  ;;  %v11465_v20 = vpop.f32.mrb[31].mxu0 }
 0x2b4   : > { %v11467_v0 = vpop.f32.mrb[31].mxu1  ;;  %9689 = vpow2.f32 %v8986_v40  ;;  %v2511_v40 = vld [vmem:[%s10998_s13 + $0x38] sm:$0xff] }
 0x2b5   : > { %9691 = vpow2.f32 %v8985_v12  ;;  %v9680_v33 = vpop.eup %9679 }
 0x2b6   : > { %v11472_v50 = vpop.f32.mrb[32].mxu0  ;;  %v9682_v31 = vpop.eup %9681  ;;  %v3304_v15 = vadd.f32 1.0, %v9680_v33  ;;  %v11553_v33 = vadd.f32 %v11455_v13, %v2510_v29  ;;  %v2525_v29 = vld [vmem:[%s10998_s13 + $0xa8] sm:$0xff] }
 0x2b7   : > { %v11477_v2 = vpop.f32.mrb[32].mxu1  ;;  %v11479_v49 = vpop.f32.mrb[33].mxu0  ;;  %v3306_v61 = vadd.f32 1.0, %v9682_v31  ;;  %v2524_v31 = vld [vmem:[%s10998_s13 + $0xa0] sm:$0xff] }
 0x2b8   : > { %v11481_v63 = vpop.f32.mrb[33].mxu1  ;;  %v9684_v26 = vpop.eup %9683  ;;  %9693 = vrcp.f32 %v3304_v15  ;;  %v11567_v14 = vadd.f32 %v11461_v17, %v2524_v31  ;;  %v11582_v31 = vadd.f32 %v11467_v0, %v2527_v27 }
 0x2b9   : > { %v9686_v22 = vpop.eup %9685  ;;  %v3305_v35 = vadd.f32 1.0, %v9684_v26  ;;  %9695 = vrcp.f32 %v3306_v61  ;;  %v2526_v26 = vld [vmem:[%s10998_s13 + $0xb0] sm:$0xff]  ;;  %v8972_v61 = vmul.f32 -1.442695, %v11549_v42 }
 0x2ba   : > { %v11485_v59 = vpop.f32.mrb[34].mxu0  ;;  %v9688_v12 = vpop.eup %9687  ;;  %v3307_v21 = vadd.f32 1.0, %v9686_v22  ;;  %v11562_v22 = vadd.f32 %v11459_v16, %v2511_v40  ;;  %v8973_v16 = vmul.f32 -1.442695, %v11557_v24  ;;  %v11577_v40 = vadd.f32 %v11465_v20, %v2525_v29 }
 0x2bb   : > { %v11491_v53 = vpop.f32.mrb[34].mxu1  ;;  %v11493_v30 = vpop.f32.mrb[35].mxu0  ;;  %9697 = vrcp.f32 %v3305_v35  ;;  %v3320_v45 = vadd.f32 1.0, %v9688_v12  ;;  %v11572_v35 = vadd.f32 %v11463_v18, %v2526_v26  ;;  %v2512_v12 = vld [vmem:[%s10998_s13 + $0x40] sm:$0xff]  ;;  %v2515_v26 = vld [vmem:[%s10998_s13 + $0x58] sm:$0xff] }
 0x2bc   : > { %v11498_v47 = vpop.f32.mrb[35].mxu1  ;;  %9699 = vrcp.f32 %v3307_v21  ;;  %v8974_v21 = vmul.f32 -1.442695, %v11553_v33  ;;  %v8975_v17 = vmul.f32 -1.442695, %v11562_v22  ;;  %v11587_v18 = vadd.f32 %v11472_v50, %v2512_v12 }
 0x2bd   : > { %9701 = vrcp.f32 %v3320_v45  ;;  %v2513_v45 = vld [vmem:[%s10998_s13 + $0x48] sm:$0xff]  ;;  %v8989_v29 = vmul.f32 -1.442695, %v11577_v40  ;;  %v11600_v50 = vadd.f32 %v11481_v63, %v2515_v26 }
 0x2be   : > { %v11506_v41 = vpop.f32.mrb[36].mxu0  ;;  %v9690_v57 = vpop.eup %9689  ;;  %v11596_v0 = vadd.f32 %v11479_v49, %v2513_v45 }
 0x2bf   : > { %v11514_v46 = vpop.f32.mrb[36].mxu1  ;;  %v11516_v36 = vpop.f32.mrb[37].mxu0  ;;  %v3322_v58 = vadd.f32 1.0, %v9690_v57  ;;  %v2514_v57 = vld [vmem:[%s10998_s13 + $0x50] sm:$0xff]  ;;  %v8979_v63 = vmul.f32 -1.442695, %v11600_v50 }
 0x2c0   : > { %v11521_v56 = vpop.f32.mrb[37].mxu1  ;;  %v9692_v15 = vpop.eup %9691  ;;  %v11592_v20 = vadd.f32 %v11477_v2, %v2514_v57  ;;  %v8977_v49 = vmul.f32 -1.442695, %v11596_v0 }
 0x2c1   : > { %v3321_v13 = vadd.f32 1.0, %v9692_v15  ;;  %9703 = vrcp.f32 %v3322_v58  ;;  %v8988_v15 = vmul.f32 -1.442695, %v11567_v14  ;;  %v8990_v58 = vmul.f32 -1.442695, %v11572_v35 }
 0x2c2   : > { %v11529_v9 = vpop.f32.mrb[38].mxu0  ;;  %v8978_v12 = vmul.f32 -1.442695, %v11592_v20 }
 0x2c3   : > { %v11532_v32 = vpop.f32.mrb[38].mxu1  ;;  %v11534_v10 = vpop.f32.mrb[39].mxu0  ;;  %9705 = vrcp.f32 %v3321_v13 }
 0x2c4   : > { %v11537_v11 = vpop.f32.mrb[39].mxu1  ;;  %9707 = vpow2.f32 %v8987_v37  ;;  %v9694_v37 = vpop.eup %9693 }
 0x2c5   : > { %9709 = vpow2.f32 %v8972_v61  ;;  %v9696_v13 = vpop.eup %9695  ;;  %v8991_v61 = vmul.f32 -1.442695, %v11582_v31 }
 0x2c6   : > { %9711 = vpow2.f32 %v8974_v21  ;;  %v9698_v27 = vpop.eup %9697  ;;  %v8976_v21 = vmul.f32 -1.442695, %v11587_v18  ;;  %v11611_v26 = vmul.f32 %v9696_v13, %v11500_v44 }
 0x2c7   : > { %9713 = vpow2.f32 %v8973_v16  ;;  %v11603_v2 = vpop.eup %9699 }
 0x2c8   : > { %9715 = vpow2.f32 %v8975_v17  ;;  %v9702_v16 = vpop.eup %9701  ;;  %v3400_v17 = vmul.f32 %v9694_v37, %v11495_v51 }
 0x2c9   : > { %9717 = vpow2.f32 %v8988_v15  ;;  %v3416_v45 = vmul.f32 %v9702_v16, %v11519_v7 }
 0x2ca   : > { %9719 = vpow2.f32 %v8990_v58  ;;  %v3401_v58 = vmul.f32 %v9698_v27, %v11503_v43 }
 0x2cb   : > { %9721 = vpow2.f32 %v8989_v29  ;;  %v9704_v57 = vpop.eup %9703  ;;  %v9308_v28 = vpack.c.bf16 %v3416_v45, %v3400_v17  ;;  %v11617_v23 = vadd.f32 %v3416_v45, %v3400_v17  ;;  %v2530_v17 = vld [vmem:[%s10998_s13 + $0xd0] sm:$0xff] }
 0x2cc   : > { %9723 = vpow2.f32 %v8991_v61  ;;  %v11615_v19 = vmul.f32 %v9704_v57, %v11524_v5 }
 0x2cd   : > { %v9706_v15 = vpop.eup %9705  ;;  %9725 = vpow2.f32 %v8976_v21  ;;  %14139 = vst [vmem:[#allocation70_spill] sm:$0xff] %v11617_v23 }
 0x2ce   : > { %v9708_v29 = vpop.eup %9707  ;;  %v3417_v51 = vmul.f32 %v9706_v15, %v11527_v48  ;;  %9727 = vpow2.f32 %v8978_v12  ;;  %v11624_v43 = vadd.f32 %v11615_v19, %v11611_v26  ;;  %v2528_v12 = vld [vmem:[%s10998_s13 + $0xc0] sm:$0xff]  ;;  %v2529_v15 = vld [vmem:[%s10998_s13 + $0xc8] sm:$0xff]  ;;  %v14145_v62 = vpack.c.bf16 %v11615_v19, %v11611_v26 }
 0x2cf   : > { %v9710_v7 = vpop.eup %9709  ;;  %v3323_v44 = vadd.f32 1.0, %v9708_v29  ;;  %9729 = vpow2.f32 %v8977_v49 }
 0x2d0   : > { %14140 = vst [vmem:[#allocation71_spill] sm:$0xff] %v11624_v43  ;;  %v9712_v5 = vpop.eup %9711  ;;  %v11626_v13 = vadd.f32 %v3417_v51, %v3401_v58  ;;  %v3308_v61 = vadd.f32 1.0, %v9710_v7  ;;  %9731 = vpow2.f32 %v8979_v63  ;;  %v9306_v27 = vpack.c.bf16 %v3417_v51, %v3401_v58  ;;  %v11634_v63 = vld [vmem:[%s14142_s24] sm:$0xff]  ;;  %v2533_v43 = vld [vmem:[%s10998_s13 + $0xe8] sm:$0xff] }
 0x2d1   : > { %v9714_v48 = vpop.eup %9713  ;;  %9733 = vrcp.f32 %v3323_v44  ;;  %v3310_v21 = vadd.f32 1.0, %v9712_v5  ;;  %v11637_v51 = vadd.f32 %v11485_v59, %v2528_v12  ;;  %v2531_v5 = vld [vmem:[%s10998_s13 + $0xd8] sm:$0xff] }
 0x2d2   : > { %14141 = vst [vmem:[#allocation72_spill] sm:$0xff] %v11626_v13  ;;  %v9716_v16 = vpop.eup %9715  ;;  %9735 = vrcp.f32 %v3308_v61  ;;  %v3309_v57 = vadd.f32 1.0, %v9714_v48  ;;  %9307 = vmatprep.subr.bf16.mxu0 %v9306_v27  ;;  %v11644_v48 = vadd.f32 %v11493_v30, %v2529_v15  ;;  %v11659_v15 = vadd.f32 %v11498_v47, %v2531_v5 }
 0x2d3   : > { %v9718_v45 = vpop.eup %9717  ;;  %9737 = vrcp.f32 %v3310_v21  ;;  %v3311_v49 = vadd.f32 1.0, %v9716_v16  ;;  %9309 = vmatpush1.bf16.msra.mxu0 %v9308_v28  ;;  %v11640_v28 = vadd.f32 %v11491_v53, %v2530_v17  ;;  %v2516_v21 = vld [vmem:[%s10998_s13 + $0x60] sm:$0xff]  ;;  %v2518_v16 = vld [vmem:[%s10998_s13 + $0x70] sm:$0xff]  ;;  %v2517_v53 = vld [vmem:[%s10998_s13 + $0x68] sm:$0xff] }
 0x2d4   : > { %v9720_v58 = vpop.eup %9719  ;;  %9739 = vrcp.f32 %v3309_v57  ;;  %v3324_v29 = vadd.f32 1.0, %v9718_v45  ;;  %v14143_v57 = vmov 0.0   ;;  %v11655_v17 = vld [vmem:[%s14142_s24 + $0x8] sm:$0xff]  ;;  %v11666_v13 = vadd.f32 %v11506_v41, %v2516_v21 }
 0x2d5   : > { %v9722_v7 = vpop.eup %9721  ;;  %9741 = vrcp.f32 %v3311_v49  ;;  %v3326_v44 = vadd.f32 1.0, %v9720_v58  ;;  %v8992_v49 = vmul.f32 -1.442695, %v11637_v51  ;;  %v2519_v58 = vld [vmem:[%s10998_s13 + $0x78] sm:$0xff]  ;;  %v8994_v37 = vmul.f32 -1.442695, %v11640_v28 }
 0x2d6   : > { %v9724_v61 = vpop.eup %9723  ;;  %9743 = vrcp.f32 %v3324_v29  ;;  %v3325_v27 = vadd.f32 1.0, %v9722_v7  ;;  %9000 = vmatmul.mubr.msk.f32.vlgmr.msra.gmra.mrb[40].mxu0 %vm3460_vm7, %v11634_v63  ;;  %v2532_v29 = vld [vmem:[%s10998_s13 + $0xe0] sm:$0xff]  ;;  %v2534_v7 = vld [vmem:[%s10998_s13 + $0xf0] sm:$0xff]  ;;  %v11673_v47 = vadd.f32 %v11514_v46, %v2518_v16  ;;  %v11676_v5 = vadd.f32 %v11516_v36, %v2517_v53 }
 0x2d7   : > { %v9726_v59 = vpop.eup %9725  ;;  %9745 = vrcp.f32 %v3326_v44  ;;  %v3327_v12 = vadd.f32 1.0, %v9724_v61  ;;  %3543 = vmatprep.mubr.f32.mxu0 %v14143_v57  ;;  %v11681_v41 = vadd.f32 %v11521_v56, %v2519_v58  ;;  %v11684_v21 = vadd.f32 %v11529_v9, %v2532_v29  ;;  %v11693_v36 = vld [vmem:[%s14142_s24 + $0x10] sm:$0xff]  ;;  %v2535_v58 = vld [vmem:[%s10998_s13 + $0xf8] sm:$0xff]  ;;  %s12626_s13 = scalar_lea.vmem %s14231_s10, %s8846_s15  ;;  %s14430_s15 = sld [smem:[#allocation135_spill]] }
 0x2d8   : > { %v9728_v30 = vpop.eup %9727  ;;  %9747 = vrcp.f32 %v3325_v27  ;;  %v3312_v45 = vadd.f32 1.0, %v9726_v59  ;;  %v8993_v59 = vmul.f32 -1.442695, %v11644_v48  ;;  %v3403_v16 = vmul.f32 %v11603_v2, %v11511_v39  ;;  %s10571_s10 = sshll.u32 %s10653_s4, 4  ;;  %s10572_s10 = int_to_ptr.vmem [resolvable:$false] %s10571_s10 }
 0x2d9   : > { %v9730_v44 = vpop.eup %9729  ;;  %9749 = vrcp.f32 %v3327_v12  ;;  %v3314_v61 = vadd.f32 1.0, %v9728_v30  ;;  %v11687_v30 = vadd.f32 %v11532_v32, %v2534_v7  ;;  %v11699_v9 = vadd.f32 %v11534_v10, %v2533_v43 }
 0x2da   : > { %v11669_v23 = vpop.eup %9731  ;;  %v3313_v27 = vadd.f32 1.0, %v9730_v44  ;;  %9001 = vmatmul.mubr.msk.f32.gmra.mrb[42].mxu0 %vm3460_vm7, %v11655_v17  ;;  %9751 = vrcp.f32 %v3312_v45  ;;  %v8995_v32 = vmul.f32 -1.442695, %v11659_v15  ;;  %v8980_v45 = vmul.f32 -1.442695, %v11666_v13 }
 0x2db   : > { %v9734_v12 = vpop.eup %9733  ;;  %3549 = vmatprep.mubr.f32.mxu0 %v14143_v57  ;;  %9753 = vrcp.f32 %v3314_v61  ;;  %v8982_v44 = vmul.f32 -1.442695, %v11673_v47  ;;  %v8981_v2 = vmul.f32 -1.442695, %v11676_v5  ;;  %v8983_v43 = vmul.f32 -1.442695, %v11681_v41 }
 0x2dc   : > { %v9736_v46 = vpop.eup %9735  ;;  %v3419_v56 = vmul.f32 %v9734_v12, %v11545_v25  ;;  %9755 = vrcp.f32 %v3313_v27  ;;  %v11712_v25 = vld [vmem:[%s14142_s24 + $0x18] sm:$0xff]  ;;  %v8996_v61 = vmul.f32 -1.442695, %v11684_v21  ;;  %v8998_v27 = vmul.f32 -1.442695, %v11687_v30 }
 0x2dd   : > { %v9738_v53 = vpop.eup %9737  ;;  %9757 = vpow2.f32 %v8992_v49  ;;  %v8997_v12 = vmul.f32 -1.442695, %v11699_v9  ;;  %s13874_s19 = scalar_lea.hbm %s14430_s15, %s9257_s30 }
 0x2de   : > { %v9740_v29 = vpop.eup %9739  ;;  %v11704_v7 = vadd.f32 %v3419_v56, %v3403_v16  ;;  %v9310_v39 = vpack.c.bf16 %v3419_v56, %v3403_v16  ;;  %9002 = vmatmul.mubr.msk.f32.gmra.mrb[44].mxu0 %vm3460_vm7, %v11693_v36  ;;  %9759 = vpow2.f32 %v8994_v37  ;;  %v11721_v16 = vadd.f32 %v11537_v11, %v2535_v58 }
 0x2df   : > { %v9742_v10 = vpop.eup %9741  ;;  %3555 = vmatprep.mubr.f32.mxu0 %v14143_v57  ;;  %9761 = vpow2.f32 %v8993_v59  ;;  %v3404_v37 = vmul.f32 %v9736_v46, %v11549_v42  ;;  %v3405_v4 = vmul.f32 %v9740_v29, %v11557_v24 }
 0x2e0   : > { %14144 = vst [vmem:[#allocation73_spill] sm:$0xff] %v11704_v7  ;;  %v9744_v49 = vpop.eup %9743  ;;  %9311 = vmatprep.subr.bf16.mxu1 %v9310_v39  ;;  %v3406_v7 = vmul.f32 %v9738_v53, %v11553_v33  ;;  %9763 = vpow2.f32 %v8995_v32  ;;  %v3407_v8 = vmul.f32 %v9742_v10, %v11562_v22 }
 0x2e1   : > { %v9746_v56 = vpop.eup %9745  ;;  %v3420_v6 = vmul.f32 %v9744_v49, %v11567_v14  ;;  %9313 = vmatpush1.bf16.msra.mxu1 %v14145_v62  ;;  %9765 = vpow2.f32 %v8980_v45 }
 0x2e2   : > { %v9748_v59 = vpop.eup %9747  ;;  %v3422_v11 = vmul.f32 %v9746_v56, %v11572_v35  ;;  %9003 = vmatmul.mubr.msk.f32.gmra.mrb[46].mxu0 %vm3460_vm7, %v11712_v25  ;;  %9767 = vpow2.f32 %v8982_v44 }
 0x2e3   : > { %v9750_v42 = vpop.eup %9749  ;;  %v9316_v33 = vpack.c.bf16 %v3420_v6, %v3404_v37  ;;  %v11734_v46 = vadd.f32 %v3420_v6, %v3404_v37  ;;  %v3421_v14 = vmul.f32 %v9748_v59, %v11577_v40  ;;  %3715 = vmatprep.mubr.f32.mxu0 %v14143_v57  ;;  %9769 = vpow2.f32 %v8981_v2 }
 0x2e4   : > { %v9320_v62 = vpack.c.bf16 %v3422_v11, %v3406_v7  ;;  %v11738_v19 = vadd.f32 %v3422_v11, %v3406_v7  ;;  %v3423_v24 = vmul.f32 %v9750_v42, %v11582_v31  ;;  %9004 = vmatmul.mubr.msk.f32.vlgmr.msra.gmra.mrb[40].mxu1 %vm3460_vm7, %v11634_v63  ;;  %v11743_v22 = vpop.eup %9751  ;;  %9771 = vpow2.f32 %v8983_v43 }
 0x2e5   : > { %14146 = vst [vmem:[#allocation74_spill] sm:$0xff] %v11734_v46  ;;  %v11745_v35 = vadd.f32 %v3421_v14, %v3405_v4  ;;  %v8999_v6 = vmul.f32 -1.442695, %v11721_v16  ;;  %3632 = vmatprep.mubr.f32.mxu1 %v14143_v57  ;;  %v9314_v40 = vpack.c.bf16 %v3421_v14, %v3405_v4  ;;  %v11749_v26 = vpop.eup %9753  ;;  %v3315_v31 = vadd.f32 1.0, %v11669_v23 }
 0x2e6   : > { %14147 = vst [vmem:[#allocation75_spill] sm:$0xff] %v11738_v19  ;;  %v11751_v53 = vadd.f32 %v3423_v24, %v3407_v8  ;;  %9773 = vpow2.f32 %v8996_v61  ;;  %v9318_v32 = vpack.c.bf16 %v3423_v24, %v3407_v8  ;;  %v11754_v45 = vpop.eup %9755 }
 0x2e7   : > { %14148 = vst [vmem:[#allocation76_spill] sm:$0xff] %v11745_v35  ;;  %9775 = vpow2.f32 %v8998_v27  ;;  %9315 = vmatprep.subr.bf16.mxu0 %v9314_v40  ;;  %v9758_v58 = vpop.eup %9757 }
 0x2e8   : > { %14149 = vst [vmem:[#allocation77_spill] sm:$0xff] %v11751_v53  ;;  %9777 = vpow2.f32 %v8997_v12  ;;  %9005 = vmatmul.mubr.msk.f32.gmra.mrb[42].mxu1 %vm3460_vm7, %v11655_v17  ;;  %9319 = vmatprep.subr.bf16.mxu1 %v9318_v32  ;;  %v9760_v29 = vpop.eup %9759  ;;  %v3328_v4 = vadd.f32 1.0, %v9758_v58  ;;  %v3408_v32 = vmul.f32 %v11743_v22, %v11587_v18 }
 0x2e9   : > { %9779 = vpow2.f32 %v8999_v6  ;;  %9317 = vmatpush1.bf16.msra.mxu0 %v9316_v33  ;;  %9321 = vmatpush1.bf16.msra.mxu1 %v9320_v62  ;;  %v9762_v7 = vpop.eup %9761  ;;  %v3330_v23 = vadd.f32 1.0, %v9760_v29 }
 0x2ea   : > { %9781 = vrcp.f32 %v3315_v31  ;;  %3638 = vmatprep.mubr.f32.mxu1 %v14143_v57  ;;  %v9764_v8 = vpop.eup %9763  ;;  %v3329_v44 = vadd.f32 1.0, %v9762_v7  ;;  %v3409_v7 = vmul.f32 %v11754_v45, %v11596_v0 }
 0x2eb   : > { %9783 = vrcp.f32 %v3328_v4  ;;  %v9766_v39 = vpop.eup %9765  ;;  %v3331_v10 = vadd.f32 1.0, %v9764_v8  ;;  %v3410_v4 = vmul.f32 %v11749_v26, %v11592_v20 }
 0x2ec   : > { %9785 = vrcp.f32 %v3330_v23  ;;  %9006 = vmatmul.mubr.msk.f32.gmra.mrb[44].mxu1 %vm3460_vm7, %v11693_v36  ;;  %9008 = vmatmul.mubr.msk.f32.vlgmr.msra.gmra.mrb[48].mxu0 %vm3460_vm7, %v11634_v63  ;;  %v9768_v2 = vpop.eup %9767  ;;  %v3316_v43 = vadd.f32 1.0, %v9766_v39 }
 0x2ed   : > { %9787 = vrcp.f32 %v3329_v44  ;;  %3644 = vmatprep.mubr.f32.mxu1 %v14143_v57  ;;  %3721 = vmatprep.mubr.f32.mxu0 %v14143_v57  ;;  %v9770_v61 = vpop.eup %9769  ;;  %v3318_v49 = vadd.f32 1.0, %v9768_v2 }
 0x2ee   : > { %9789 = vrcp.f32 %v3331_v10  ;;  %v9772_v27 = vpop.eup %9771  ;;  %v3317_v12 = vadd.f32 1.0, %v9770_v61 }
 0x2ef   : > { %9791 = vrcp.f32 %v3316_v43  ;;  %v3319_v37 = vadd.f32 1.0, %v9772_v27 }
 0x2f0   : > { %v9774_v56 = vpop.eup %9773  ;;  %9793 = vrcp.f32 %v3318_v49  ;;  %9007 = vmatmul.mubr.msk.f32.gmra.mrb[46].mxu1 %vm3460_vm7, %v11712_v25  ;;  %9009 = vmatmul.mubr.msk.f32.gmra.mrb[50].mxu0 %vm3460_vm7, %v11655_v17 }
 0x2f1   : > { %v9776_v59 = vpop.eup %9775  ;;  %9795 = vrcp.f32 %v3317_v12  ;;  %v3332_v11 = vadd.f32 1.0, %v9774_v56  ;;  %3804 = vmatprep.mubr.f32.mxu1 %v14143_v57  ;;  %3727 = vmatprep.mubr.f32.mxu0 %v14143_v57 }
 0x2f2   : > { %v9778_v42 = vpop.eup %9777  ;;  %9797 = vrcp.f32 %v3319_v37  ;;  %v3334_v33 = vadd.f32 1.0, %v9776_v59 }
 0x2f3   : > { %v9780_v14 = vpop.eup %9779  ;;  %9799 = vrcp.f32 %v3332_v11  ;;  %v3333_v62 = vadd.f32 1.0, %v9778_v42 }
 0x2f4   : > { %v9782_v24 = vpop.eup %9781  ;;  %9801 = vrcp.f32 %v3334_v33  ;;  %v3335_v6 = vadd.f32 1.0, %v9780_v14  ;;  %9012 = vmatmul.mubr.msk.f32.vlgmr.msra.gmra.mrb[48].mxu1 %vm3460_vm7, %v11634_v63  ;;  %9010 = vmatmul.mubr.msk.f32.gmra.mrb[52].mxu0 %vm3460_vm7, %v11693_v36 }
 0x2f5   : > { %v9784_v40 = vpop.eup %9783  ;;  %9803 = vrcp.f32 %v3333_v62  ;;  %3810 = vmatprep.mubr.f32.mxu1 %v14143_v57  ;;  %3733 = vmatprep.mubr.f32.mxu0 %v14143_v57  ;;  %v3411_v23 = vmul.f32 %v9782_v24, %v11600_v50  ;;  %v11877_v24 = vpop.permute.xlu1 %3447 }
 0x2f6   : > { %v9786_v31 = vpop.eup %9785  ;;  %v3424_v58 = vmul.f32 %v9784_v40, %v11637_v51  ;;  %9805 = vrcp.f32 %v3335_v6 }
 0x2f7   : > { %v9788_v29 = vpop.eup %9787  ;;  %v3426_v8 = vmul.f32 %v9786_v31, %v11640_v28 }
 0x2f8   : > { %v9790_v44 = vpop.eup %9789  ;;  %v9324_v39 = vpack.c.bf16 %v3424_v58, %v3408_v32  ;;  %v11786_v10 = vadd.f32 %v3424_v58, %v3408_v32  ;;  %v3425_v18 = vmul.f32 %v9788_v29, %v11644_v48  ;;  %9013 = vmatmul.mubr.msk.f32.gmra.mrb[50].mxu1 %vm3460_vm7, %v11655_v17  ;;  %9011 = vmatmul.mubr.msk.f32.gmra.mrb[54].mxu0 %vm3460_vm7, %v11712_v25 }
 0x2f9   : > { %v9792_v20 = vpop.eup %9791  ;;  %v9328_v51 = vpack.c.bf16 %v3426_v8, %v3410_v4  ;;  %v11793_v22 = vadd.f32 %v3426_v8, %v3410_v4  ;;  %v3427_v0 = vmul.f32 %v9790_v44, %v11659_v15  ;;  %3816 = vmatprep.mubr.f32.mxu1 %v14143_v57  ;;  %3893 = vmatprep.mubr.f32.mxu0 %v14143_v57 }
 0x2fa   : > { %14150 = vst [vmem:[#allocation78_spill] sm:$0xff] %v11786_v10  ;;  %v9794_v50 = vpop.eup %9793  ;;  %v11798_v28 = vadd.f32 %v3425_v18, %v3409_v7  ;;  %v9322_v48 = vpack.c.bf16 %v3425_v18, %v3409_v7  ;;  %v3412_v49 = vmul.f32 %v9792_v20, %v11666_v13  ;;  %v11891_v7 = vpop.permute.xlu1 %3452 }
 0x2fb   : > { %14151 = vst [vmem:[#allocation79_spill] sm:$0xff] %v11793_v22  ;;  %v9796_v26 = vpop.eup %9795  ;;  %v11800_v45 = vadd.f32 %v3427_v0, %v3411_v23  ;;  %v9326_v2 = vpack.c.bf16 %v3427_v0, %v3411_v23  ;;  %v3414_v56 = vmul.f32 %v9794_v50, %v11673_v47 }
 0x2fc   : > { %14152 = vst [vmem:[#allocation80_spill] sm:$0xff] %v11798_v28  ;;  %v9798_v43 = vpop.eup %9797  ;;  %9323 = vmatprep.subr.bf16.mxu0 %v9322_v48  ;;  %9014 = vmatmul.mubr.msk.f32.gmra.mrb[52].mxu1 %vm3460_vm7, %v11693_v36  ;;  %v3413_v37 = vmul.f32 %v9796_v26, %v11676_v5 }
 0x2fd   : > { %14153 = vst [vmem:[#allocation81_spill] sm:$0xff] %v11800_v45  ;;  %v9800_v61 = vpop.eup %9799  ;;  %9327 = vmatprep.subr.bf16.mxu1 %v9326_v2  ;;  %9325 = vmatpush1.bf16.msra.mxu0 %v9324_v39  ;;  %v3415_v59 = vmul.f32 %v9798_v43, %v11681_v41 }
 0x2fe   : > { %v9802_v15 = vpop.eup %9801  ;;  %v3428_v27 = vmul.f32 %v9800_v61, %v11684_v21  ;;  %9329 = vmatpush1.bf16.msra.mxu1 %v9328_v51  ;;  %3822 = vmatprep.mubr.f32.mxu1 %v14143_v57 }
 0x2ff   : > { %v9804_v12 = vpop.eup %9803  ;;  %v3430_v11 = vmul.f32 %v9802_v15, %v11687_v30 }
 0x300   : > { %v9806_v42 = vpop.eup %9805  ;;  %v9332_v33 = vpack.c.bf16 %v3428_v27, %v3412_v49  ;;  %v11811_v14 = vadd.f32 %v3428_v27, %v3412_v49  ;;  %v3429_v13 = vmul.f32 %v9804_v12, %v11699_v9  ;;  %9015 = vmatmul.mubr.msk.f32.gmra.mrb[54].mxu1 %vm3460_vm7, %v11712_v25  ;;  %9016 = vmatmul.mubr.msk.f32.vlgmr.msra.gmra.mrb[56].mxu0 %vm3460_vm7, %v11634_v63 }
 0x301   : > { %v9336_v21 = vpack.c.bf16 %v3430_v11, %v3414_v56  ;;  %v11818_v47 = vadd.f32 %v3430_v11, %v3414_v56  ;;  %v3431_v5 = vmul.f32 %v9806_v42, %v11721_v16  ;;  %3982 = vmatprep.mubr.f32.mxu1 %v14143_v57  ;;  %3899 = vmatprep.mubr.f32.mxu0 %v14143_v57 }
 0x302   : > { %14154 = vst [vmem:[#allocation82_spill] sm:$0xff] %v11811_v14  ;;  %v11823_v41 = vadd.f32 %v3429_v13, %v3413_v37  ;;  %v9330_v30 = vpack.c.bf16 %v3429_v13, %v3413_v37 }
 0x303   : > { %14155 = vst [vmem:[#allocation83_spill] sm:$0xff] %v11818_v47  ;;  %v11825_v62 = vadd.f32 %v3431_v5, %v3415_v59  ;;  %v9334_v9 = vpack.c.bf16 %v3431_v5, %v3415_v59 }
 0x304   : > { %14156 = vst [vmem:[#allocation84_spill] sm:$0xff] %v11823_v41  ;;  %9331 = vmatprep.subr.bf16.mxu0 %v9330_v30  ;;  %9020 = vmatmul.mubr.msk.f32.vlgmr.msra.gmra.mrb[56].mxu1 %vm3460_vm7, %v11634_v63 }
 0x305   : > { %14157 = vst [vmem:[#allocation85_spill] sm:$0xff] %v11825_v62  ;;  %9335 = vmatprep.subr.bf16.mxu1 %v9334_v9  ;;  %9333 = vmatpush1.bf16.msra.mxu0 %v9332_v33 }
 0x306   : > { %9337 = vmatpush1.bf16.msra.mxu1 %v9336_v21  ;;  %3988 = vmatprep.mubr.f32.mxu1 %v14143_v57 }
 0x307   : > { %9017 = vmatmul.mubr.msk.f32.gmra.mrb[58].mxu0 %vm3460_vm7, %v11655_v17 }
 0x308   : > { %9021 = vmatmul.mubr.msk.f32.gmra.mrb[58].mxu1 %vm3460_vm7, %v11655_v17  ;;  %3905 = vmatprep.mubr.f32.mxu0 %v14143_v57 }
 0x309   : > { %3994 = vmatprep.mubr.f32.mxu1 %v14143_v57 }
 0x30b   : > { %9018 = vmatmul.mubr.msk.f32.gmra.mrb[60].mxu0 %vm3460_vm7, %v11693_v36 }
 0x30c   : > { %9022 = vmatmul.mubr.msk.f32.gmra.mrb[60].mxu1 %vm3460_vm7, %v11693_v36  ;;  %3911 = vmatprep.mubr.f32.mxu0 %v14143_v57 }
 0x30d   : > { %4000 = vmatprep.mubr.f32.mxu1 %v14143_v57 }
 0x30f   : > { %9019 = vmatmul.mubr.msk.f32.gmra.mrb[62].mxu0 %vm3460_vm7, %v11712_v25 }
 0x310   : > { %9023 = vmatmul.mubr.msk.f32.gmra.mrb[62].mxu1 %vm3460_vm7, %v11712_v25  ;;  %4071 = vmatprep.mubr.f32.mxu0 %v14143_v57 }
 0x311   : > { %4160 = vmatprep.mubr.f32.mxu1 %v14143_v57 }
 0x313   : > { %9024 = vmatmul.mubr.msk.f32.vlgmr.msra.gmra.mrb[64].mxu0 %vm3460_vm7, %v11634_v63 }
 0x314   : > { %9028 = vmatmul.mubr.msk.f32.vlgmr.msra.gmra.mrb[64].mxu1 %vm3460_vm7, %v11634_v63  ;;  %4077 = vmatprep.mubr.f32.mxu0 %v14143_v57  ;;  %v11872_v63 = vpop.permute.xlu0 %3442 }
 0x315   : > { %4166 = vmatprep.mubr.f32.mxu1 %v14143_v57  ;;  %14158 = vst [vmem:[#allocation86_spill] sm:$0xff] %v11872_v63 }
 0x317   : > { %9025 = vmatmul.mubr.msk.f32.gmra.mrb[66].mxu0 %vm3460_vm7, %v11655_v17 }
 0x318   : > { %9029 = vmatmul.mubr.msk.f32.gmra.mrb[66].mxu1 %vm3460_vm7, %v11655_v17  ;;  %4083 = vmatprep.mubr.f32.mxu0 %v14143_v57  ;;  %v11901_v51 = vpop.permute.xlu0 %3457 }
 0x319   : > { %4172 = vmatprep.mubr.f32.mxu1 %v14143_v57  ;;  %14159 = vst [vmem:[#allocation87_spill] sm:$0xff] %v11901_v51 }
 0x31b   : > { %9026 = vmatmul.mubr.msk.f32.gmra.mrb[68].mxu0 %vm3460_vm7, %v11693_v36 }
 0x31c   : > { %9030 = vmatmul.mubr.msk.f32.gmra.mrb[68].mxu1 %vm3460_vm7, %v11693_v36  ;;  %4089 = vmatprep.mubr.f32.mxu0 %v14143_v57 }
 0x31d   : > { %4178 = vmatprep.mubr.f32.mxu1 %v14143_v57 }
 0x31f   : > { %9027 = vmatmul.mubr.msk.f32.gmra.mrb[70].mxu0 %vm3460_vm7, %v11712_v25 }
 0x320   : > { %9031 = vmatmul.mubr.msk.f32.gmra.mrb[70].mxu1 %vm3460_vm7, %v11712_v25  ;;  %4738 = vmatprep.mubr.f32.mxu0 %v14143_v57 }
 0x321   : > { %4827 = vmatprep.mubr.f32.mxu1 %v14143_v57 }
 0x3a9   : > { %v3539_v17 = vpop.f32.mrb[40].mxu0 }
 0x3aa   : > { %v11875_v16 = vadd.f32 %v3539_v17, %v11872_v63  ;;  %v3541_v36 = vpop.f32.mrb[41].mxu0 }
 0x3ab   : > { %v11880_v6 = vadd.f32 %v3541_v36, %v11872_v63 }
 0x3ac   : > { %v9032_v40 = vmul.f32 -1.442695, %v11875_v16 }
 0x3ad   : > { %v9033_v25 = vmul.f32 -1.442695, %v11880_v6  ;;  %v3545_v31 = vpop.f32.mrb[42].mxu0 }
 0x3ae   : > { %9807 = vpow2.f32 %v9032_v40  ;;  %v11885_v32 = vadd.f32 %v3545_v31, %v11877_v24  ;;  %v3547_v58 = vpop.f32.mrb[43].mxu0 }
 0x3af   : > { %9809 = vpow2.f32 %v9033_v25  ;;  %v11888_v29 = vadd.f32 %v3547_v58, %v11877_v24 }
 0x3b0   : > { %v9048_v4 = vmul.f32 -1.442695, %v11885_v32 }
 0x3b1   : > { %v9049_v23 = vmul.f32 -1.442695, %v11888_v29  ;;  %v3551_v8 = vpop.f32.mrb[44].mxu0 }
 0x3b2   : > { %9811 = vpow2.f32 %v9048_v4  ;;  %v11895_v44 = vadd.f32 %v3551_v8, %v11891_v7  ;;  %v3553_v39 = vpop.f32.mrb[45].mxu0 }
 0x3b3   : > { %9813 = vpow2.f32 %v9049_v23  ;;  %v11898_v18 = vadd.f32 %v3553_v39, %v11891_v7 }
 0x3b4   : > { %v9064_v20 = vmul.f32 -1.442695, %v11895_v44 }
 0x3b5   : > { %v9065_v0 = vmul.f32 -1.442695, %v11898_v18  ;;  %v3557_v50 = vpop.f32.mrb[46].mxu0 }
 0x3b6   : > { %9815 = vpow2.f32 %v9064_v20  ;;  %v11905_v48 = vadd.f32 %v3557_v50, %v11901_v51  ;;  %v3559_v26 = vpop.f32.mrb[47].mxu0 }
 0x3b7   : > { %v3628_v2 = vpop.f32.mrb[40].mxu1  ;;  %9817 = vpow2.f32 %v9065_v0 }
 0x3b8   : > { %v9808_v43 = vpop.eup %9807  ;;  %v11908_v61 = vadd.f32 %v3628_v2, %v11872_v63  ;;  %v3630_v15 = vpop.f32.mrb[41].mxu1  ;;  %v9080_v49 = vmul.f32 -1.442695, %v11905_v48 }
 0x3b9   : > { %v9810_v27 = vpop.eup %9809  ;;  %v4377_v12 = vadd.f32 1.0, %v9808_v43  ;;  %v11912_v56 = vadd.f32 %v3630_v15, %v11872_v63  ;;  %v11932_v43 = vadd.f32 %v3559_v26, %v11901_v51 }
 0x3ba   : > { %v9034_v37 = vmul.f32 -1.442695, %v11908_v61  ;;  %v4378_v59 = vadd.f32 1.0, %v9810_v27  ;;  %9819 = vpow2.f32 %v9080_v49 }
 0x3bb   : > { %9821 = vrcp.f32 %v4377_v12  ;;  %v9035_v11 = vmul.f32 -1.442695, %v11912_v56  ;;  %v3634_v42 = vpop.f32.mrb[42].mxu1 }
 0x3bc   : > { %v9812_v33 = vpop.eup %9811  ;;  %9823 = vpow2.f32 %v9034_v37  ;;  %v11917_v13 = vadd.f32 %v3634_v42, %v11877_v24  ;;  %v3636_v21 = vpop.f32.mrb[43].mxu1 }
 0x3bd   : > { %v9814_v5 = vpop.eup %9813  ;;  %9825 = vrcp.f32 %v4378_v59  ;;  %v4393_v30 = vadd.f32 1.0, %v9812_v33  ;;  %v11920_v9 = vadd.f32 %v3636_v21, %v11877_v24 }
 0x3be   : > { %9827 = vpow2.f32 %v9035_v11  ;;  %v9050_v17 = vmul.f32 -1.442695, %v11917_v13  ;;  %v4394_v36 = vadd.f32 1.0, %v9814_v5 }
 0x3bf   : > { %9829 = vrcp.f32 %v4393_v30  ;;  %v9051_v40 = vmul.f32 -1.442695, %v11920_v9  ;;  %v3640_v25 = vpop.f32.mrb[44].mxu1  ;;  %v3717_v31 = vpop.f32.mrb[48].mxu0  ;;  %v9081_v30 = vmul.f32 -1.442695, %v11932_v43 }
 0x3c0   : > { %v9816_v58 = vpop.eup %9815  ;;  %9831 = vpow2.f32 %v9050_v17  ;;  %v11925_v4 = vadd.f32 %v3640_v25, %v11891_v7  ;;  %v3642_v23 = vpop.f32.mrb[45].mxu1  ;;  %v11946_v17 = vadd.f32 %v3717_v31, %v11872_v63 }
 0x3c1   : > { %v3719_v8 = vpop.f32.mrb[49].mxu0  ;;  %v9818_v39 = vpop.eup %9817  ;;  %9833 = vrcp.f32 %v4394_v36  ;;  %v4409_v20 = vadd.f32 1.0, %v9816_v58  ;;  %v11928_v0 = vadd.f32 %v3642_v23, %v11891_v7 }
 0x3c2   : > { %9835 = vpow2.f32 %v9051_v40  ;;  %v9066_v50 = vmul.f32 -1.442695, %v11925_v4  ;;  %v4410_v2 = vadd.f32 1.0, %v9818_v39  ;;  %v11955_v31 = vadd.f32 %v3719_v8, %v11872_v63 }
 0x3c3   : > { %9837 = vrcp.f32 %v4409_v20  ;;  %v9067_v15 = vmul.f32 -1.442695, %v11928_v0  ;;  %v3646_v49 = vpop.f32.mrb[46].mxu1  ;;  %v3723_v27 = vpop.f32.mrb[50].mxu0 }
 0x3c4   : > { %v9820_v12 = vpop.eup %9819  ;;  %9839 = vpow2.f32 %v9066_v50  ;;  %v11936_v37 = vadd.f32 %v3646_v49, %v11901_v51  ;;  %v3648_v59 = vpop.f32.mrb[47].mxu1 }
 0x3c5   : > { %v11938_v11 = vpop.f32.mrb[51].mxu0  ;;  %v9822_v42 = vpop.eup %9821  ;;  %9841 = vrcp.f32 %v4410_v2  ;;  %v4425_v33 = vadd.f32 1.0, %v9820_v12  ;;  %v11941_v21 = vadd.f32 %v3648_v59, %v11901_v51 }
 0x3c6   : > { %v9824_v26 = vpop.eup %9823  ;;  %9843 = vpow2.f32 %v9067_v15  ;;  %v9082_v5 = vmul.f32 -1.442695, %v11936_v37  ;;  %v11960_v59 = vmul.f32 %v9822_v42, %v11875_v16 }
 0x3c7   : > { %v9826_v36 = vpop.eup %9825  ;;  %v4379_v40 = vadd.f32 1.0, %v9824_v26  ;;  %9845 = vrcp.f32 %v4425_v33  ;;  %v3806_v25 = vpop.f32.mrb[48].mxu1  ;;  %v9083_v23 = vmul.f32 -1.442695, %v11941_v21  ;;  %v9036_v26 = vmul.f32 -1.442695, %v11946_v17 }
 0x3c8   : > { %v9828_v58 = vpop.eup %9827  ;;  %9847 = vpow2.f32 %v9082_v5  ;;  %v11950_v39 = vadd.f32 %v3806_v25, %v11872_v63  ;;  %v3808_v20 = vpop.f32.mrb[49].mxu1 }
 0x3c9   : > { %v11952_v50 = vpop.f32.mrb[52].mxu0  ;;  %v9830_v2 = vpop.eup %9829  ;;  %9849 = vrcp.f32 %v4379_v40  ;;  %v4380_v15 = vadd.f32 1.0, %v9828_v58  ;;  %v11970_v16 = vadd.f32 %v3808_v20, %v11872_v63 }
 0x3ca   : > { %v11957_v49 = vpop.f32.mrb[53].mxu0  ;;  %v9832_v12 = vpop.eup %9831  ;;  %v11963_v33 = vmul.f32 %v9830_v2, %v11885_v32  ;;  %9851 = vpow2.f32 %v9081_v30  ;;  %v9038_v62 = vmul.f32 -1.442695, %v11950_v39  ;;  %v12022_v35 = vadd.f32 %v11952_v50, %v11891_v7 }
 0x3cb   : > { %v9834_v5 = vpop.eup %9833  ;;  %9853 = vrcp.f32 %v4380_v15  ;;  %v4395_v25 = vadd.f32 1.0, %v9832_v12  ;;  %v3812_v40 = vpop.f32.mrb[50].mxu1  ;;  %v11975_v15 = vadd.f32 %v3723_v27, %v11877_v24  ;;  %v9039_v27 = vmul.f32 -1.442695, %v11970_v16 }
 0x3cc   : > { %14160 = vst [vmem:[#allocation88_spill] sm:$0xff] %v11963_v33  ;;  %v9836_v58 = vpop.eup %9835  ;;  %v9340_v8 = vpack.c.bf16 %v11963_v33, %v11960_v59  ;;  %9855 = vpow2.f32 %v9083_v23  ;;  %v3814_v42 = vpop.f32.mrb[51].mxu1  ;;  %v11980_v47 = vmul.f32 %v9834_v5, %v11888_v29  ;;  %v9037_v23 = vmul.f32 -1.442695, %v11955_v31 }
 0x3cd   : > { %v11972_v32 = vpop.f32.mrb[54].mxu0  ;;  %v9838_v30 = vpop.eup %9837  ;;  %9857 = vrcp.f32 %v4395_v25  ;;  %v4396_v2 = vadd.f32 1.0, %v9836_v58  ;;  %v11986_v25 = vmul.f32 %v9826_v36, %v11880_v6  ;;  %v11990_v58 = vadd.f32 %v3812_v40, %v11877_v24 }
 0x3ce   : > { %v11977_v12 = vpop.f32.mrb[55].mxu0  ;;  %v9840_v41 = vpop.eup %9839  ;;  %14161 = vst [vmem:[#allocation89_spill] sm:$0xff] %v11980_v47  ;;  %9859 = vpow2.f32 %v9036_v26  ;;  %v9052_v22 = vmul.f32 -1.442695, %v11975_v15  ;;  %v11998_v6 = vmul.f32 %v9838_v30, %v11895_v44 }
 0x3cf   : > { %v11983_v20 = vpop.eup %9841  ;;  %9861 = vrcp.f32 %v4396_v2  ;;  %v4411_v14 = vadd.f32 1.0, %v9840_v41  ;;  %v3818_v45 = vpop.f32.mrb[52].mxu1  ;;  %v11995_v41 = vadd.f32 %v11938_v11, %v11877_v24  ;;  %v9338_v36 = vpack.c.bf16 %v11980_v47, %v11986_v25 }
 0x3d0   : > { %v9844_v28 = vpop.eup %9843  ;;  %9863 = vpow2.f32 %v9038_v62  ;;  %v3820_v29 = vpop.f32.mrb[53].mxu1 }
 0x3d1   : > { %v9846_v5 = vpop.eup %9845  ;;  %9865 = vrcp.f32 %v4411_v14  ;;  %v4412_v26 = vadd.f32 1.0, %v9844_v28  ;;  %v12006_v14 = vadd.f32 %v3814_v42, %v11877_v24  ;;  %9339 = vmatprep.subr.bf16.mxu0 %v9338_v36 }
 0x3d2   : > { %v9848_v2 = vpop.eup %9847  ;;  %v12001_v62 = vmul.f32 %v9846_v5, %v11905_v48  ;;  %9867 = vpow2.f32 %v9037_v23  ;;  %v9054_v48 = vmul.f32 -1.442695, %v11990_v58  ;;  %9341 = vmatpush1.bf16.msra.mxu0 %v9340_v8 }
 0x3d3   : > { %v9850_v40 = vpop.eup %9849  ;;  %9869 = vrcp.f32 %v4412_v26  ;;  %v4427_v28 = vadd.f32 1.0, %v9848_v2  ;;  %v12008_v10 = vpop.f32.mrb[54].mxu1  ;;  %v9053_v2 = vmul.f32 -1.442695, %v11995_v41  ;;  %v9055_v19 = vmul.f32 -1.442695, %v12006_v14 }
 0x3d4   : > { %v12010_v11 = vpop.f32.mrb[56].mxu0  ;;  %v9852_v53 = vpop.eup %9851  ;;  %9871 = vpow2.f32 %v9039_v27 }
 0x3d5   : > { %v12015_v30 = vpop.f32.mrb[55].mxu1  ;;  %v12017_v23 = vpop.f32.mrb[57].mxu0  ;;  %9873 = vrcp.f32 %v4427_v28  ;;  %v4426_v42 = vadd.f32 1.0, %v9852_v53  ;;  %v12028_v28 = vmul.f32 %v9850_v40, %v11908_v61  ;;  %v9068_v61 = vmul.f32 -1.442695, %v12022_v35 }
 0x3d6   : > { %v9854_v5 = vpop.eup %9853  ;;  %9875 = vpow2.f32 %v9052_v22  ;;  %v12034_v22 = vadd.f32 %v3818_v45, %v11891_v7 }
 0x3d7   : > { %v9856_v26 = vpop.eup %9855  ;;  %9877 = vrcp.f32 %v4426_v42  ;;  %v12025_v46 = vpop.f32.mrb[56].mxu1  ;;  %v12061_v55 = vmul.f32 %v9854_v5, %v11912_v56 }
 0x3d8   : > { %v9858_v27 = vpop.eup %9857  ;;  %v4428_v44 = vadd.f32 1.0, %v9856_v26  ;;  %9879 = vpow2.f32 %v9054_v48  ;;  %v12036_v50 = vpop.f32.mrb[57].mxu1 }
 0x3d9   : > { %v9860_v36 = vpop.eup %9859  ;;  %v12031_v53 = vmul.f32 %v9858_v27, %v11917_v13  ;;  %v12043_v13 = vadd.f32 %v11957_v49, %v11891_v7  ;;  %v12051_v27 = vadd.f32 %v3820_v29, %v11891_v7  ;;  %v9070_v49 = vmul.f32 -1.442695, %v12034_v22  ;;  %14164 = vst [vmem:[#allocation92_spill] sm:$0xff] %v12061_v55 }
 0x3da   : > { %v9862_v8 = vpop.eup %9861  ;;  %9881 = vrcp.f32 %v4428_v44  ;;  %v4381_v42 = vadd.f32 1.0, %v9860_v36  ;;  %v12045_v40 = vpop.f32.mrb[58].mxu0 }
 0x3db   : > { %14162 = vst [vmem:[#allocation90_spill] sm:$0xff] %v12031_v53  ;;  %v9864_v26 = vpop.eup %9863  ;;  %v9348_v1 = vpack.c.bf16 %v12031_v53, %v12028_v28  ;;  %9883 = vpow2.f32 %v9053_v2  ;;  %v12048_v48 = vmul.f32 %v9862_v8, %v11920_v9  ;;  %v12053_v36 = vpop.f32.mrb[58].mxu1  ;;  %v9069_v29 = vmul.f32 -1.442695, %v12043_v13 }
 0x3dc   : > { %v9866_v45 = vpop.eup %9865  ;;  %9885 = vrcp.f32 %v4381_v42  ;;  %v4383_v44 = vadd.f32 1.0, %v9864_v26  ;;  %v12055_v2 = vpop.f32.mrb[59].mxu0  ;;  %v12066_v42 = vadd.f32 %v11972_v32, %v11901_v51  ;;  %v9071_v52 = vmul.f32 -1.442695, %v12051_v27 }
 0x3dd   : > { %14163 = vst [vmem:[#allocation91_spill] sm:$0xff] %v12048_v48  ;;  %v9868_v3 = vpop.eup %9867  ;;  %9887 = vpow2.f32 %v9055_v19  ;;  %v12058_v38 = vpop.f32.mrb[59].mxu1  ;;  %v9346_v56 = vpack.c.bf16 %v12048_v48, %v12061_v55 }
 0x3de   : > { %v9870_v34 = vpop.eup %9869  ;;  %9889 = vrcp.f32 %v4383_v44  ;;  %v4382_v9 = vadd.f32 1.0, %v9868_v3  ;;  %v12068_v26 = vpop.f32.mrb[60].mxu0  ;;  %v12078_v44 = vmul.f32 %v9866_v45, %v11925_v4  ;;  %v9084_v4 = vmul.f32 -1.442695, %v12066_v42 }
 0x3df   : > { %v9872_v8 = vpop.eup %9871  ;;  %9891 = vpow2.f32 %v9068_v61  ;;  %v12073_v5 = vpop.f32.mrb[60].mxu1  ;;  %9347 = vmatprep.subr.bf16.mxu1 %v9346_v56 }
 0x3e0   : > { %v9874_v19 = vpop.eup %9873  ;;  %9893 = vrcp.f32 %v4382_v9  ;;  %v4384_v60 = vadd.f32 1.0, %v9872_v8  ;;  %v12075_v3 = vpop.f32.mrb[61].mxu0  ;;  %v12085_v9 = vadd.f32 %v12008_v10, %v11901_v51  ;;  %9349 = vmatpush1.bf16.msra.mxu1 %v9348_v1 }
 0x3e1   : > { %v9876_v61 = vpop.eup %9875  ;;  %v12081_v32 = vmul.f32 %v9874_v19, %v11936_v37  ;;  %9895 = vpow2.f32 %v9070_v49  ;;  %v12087_v8 = vpop.f32.mrb[61].mxu1  ;;  %v12094_v37 = vadd.f32 %v11977_v12, %v11901_v51 }
 0x3e2   : > { %v9878_v54 = vpop.eup %9877  ;;  %9897 = vrcp.f32 %v4384_v60  ;;  %v4397_v48 = vadd.f32 1.0, %v9876_v61  ;;  %v12096_v10 = vpop.f32.mrb[62].mxu0  ;;  %v12106_v61 = vadd.f32 %v12015_v30, %v11901_v51 }
 0x3e3   : > { %14165 = vst [vmem:[#allocation93_spill] sm:$0xff] %v12081_v32  ;;  %v9880_v47 = vpop.eup %9879  ;;  %v9352_v53 = vpack.c.bf16 %v12081_v32, %v12078_v44  ;;  %9899 = vpow2.f32 %v9069_v29  ;;  %v12098_v60 = vpop.f32.mrb[62].mxu1  ;;  %v12101_v56 = vmul.f32 %v9878_v54, %v11932_v43  ;;  %v9086_v29 = vmul.f32 -1.442695, %v12085_v9 }
 0x3e4   : > { %v9882_v45 = vpop.eup %9881  ;;  %9901 = vrcp.f32 %v4397_v48  ;;  %v4399_v49 = vadd.f32 1.0, %v9880_v47  ;;  %v12108_v12 = vpop.f32.mrb[63].mxu0  ;;  %v9085_v54 = vmul.f32 -1.442695, %v12094_v37  ;;  %v12122_v43 = vadd.f32 %v12010_v11, %v11872_v63 }
 0x3e5   : > { %v9884_v19 = vpop.eup %9883  ;;  %9903 = vpow2.f32 %v9071_v52  ;;  %v12110_v1 = vpop.f32.mrb[63].mxu1  ;;  %v12113_v47 = vmul.f32 %v9882_v45, %v11941_v21  ;;  %v12117_v52 = vmul.f32 %v11983_v20, %v11898_v18  ;;  %v12127_v21 = vmul.f32 %v9870_v34, %v11928_v0 }
 0x3e6   : > { %v9886_v32 = vpop.eup %9885  ;;  %9905 = vrcp.f32 %v4399_v49  ;;  %v4398_v48 = vadd.f32 1.0, %v9884_v19  ;;  %14166 = vst [vmem:[#allocation94_spill] sm:$0xff] %v12122_v43  ;;  %v12124_v30 = vpop.f32.mrb[64].mxu0  ;;  %v9087_v18 = vmul.f32 -1.442695, %v12106_v61  ;;  %v12134_v20 = vadd.f32 %v12025_v46, %v11872_v63 }
 0x3e7   : > { %v9888_v33 = vpop.eup %9887  ;;  %9907 = vpow2.f32 %v9084_v4  ;;  %14167 = vst [vmem:[#allocation95_spill] sm:$0xff] %v12124_v30  ;;  %v12129_v49 = vpop.f32.mrb[64].mxu1  ;;  %v9342_v11 = vpack.c.bf16 %v12101_v56, %v12117_v52  ;;  %v9040_v46 = vmul.f32 -1.442695, %v12122_v43 }
 0x3e8   : > { %v9890_v55 = vpop.eup %9889  ;;  %9909 = vrcp.f32 %v4398_v48  ;;  %v4400_v45 = vadd.f32 1.0, %v9888_v33  ;;  %14168 = vst [vmem:[#allocation96_spill] sm:$0xff] %v12129_v49  ;;  %v12138_v4 = vpop.f32.mrb[65].mxu0  ;;  %v12144_v33 = vadd.f32 %v12017_v23, %v11872_v63  ;;  %v12151_v49 = vadd.f32 %v12036_v50, %v11872_v63 }
 0x3e9   : > { %v9892_v19 = vpop.eup %9891  ;;  %9911 = vpow2.f32 %v9086_v29  ;;  %14169 = vst [vmem:[#allocation97_spill] sm:$0xff] %v12138_v4  ;;  %v12140_v30 = vpop.f32.mrb[65].mxu1  ;;  %v9350_v29 = vpack.c.bf16 %v12113_v47, %v12127_v21  ;;  %9343 = vmatprep.subr.bf16.mxu0 %v9342_v11  ;;  %v14174_v23 = vpack.c.bf16 %v12001_v62, %v11998_v6  ;;  %v12175_v4 = vadd.f32 %v12045_v40, %v11877_v24 }
 0x3ea   : > { %14170 = vst [vmem:[#allocation98_spill] sm:$0xff] %v12140_v30  ;;  %v9894_v34 = vpop.eup %9893  ;;  %9913 = vrcp.f32 %v4400_v45  ;;  %v4413_v0 = vadd.f32 1.0, %v9892_v19  ;;  %14171 = vst [vmem:[#allocation99_spill] sm:$0xff] %v12144_v33  ;;  %v12153_v30 = vpop.f32.mrb[66].mxu0  ;;  %v12190_v40 = vadd.f32 %v12053_v36, %v11877_v24 }
 0x3eb   : > { %v9896_v48 = vpop.eup %9895  ;;  %9915 = vpow2.f32 %v9085_v54  ;;  %14172 = vst [vmem:[#allocation100_spill] sm:$0xff] %v12151_v49  ;;  %14173 = vst [vmem:[#allocation101_spill] sm:$0xff] %v12153_v30  ;;  %9351 = vmatprep.subr.bf16.mxu1 %v9350_v29  ;;  %9345 = vmatpush1.bf16.msra.mxu0 %v14174_v23  ;;  %v12163_v54 = vld [vmem:[%s14175_s25] sm:$0xff]  ;;  %v12165_v50 = vpop.f32.mrb[66].mxu1  ;;  %v9041_v30 = vmul.f32 -1.442695, %v12144_v33 }
 0x3ec   : > { %v12155_v45 = vpop.eup %9897  ;;  %9917 = vrcp.f32 %v4413_v0  ;;  %v4415_v19 = vadd.f32 1.0, %v9896_v48  ;;  %14176 = vst [vmem:[#allocation102_spill] sm:$0xff] %v12165_v50  ;;  %v12167_v11 = vpop.f32.mrb[67].mxu0  ;;  %v9042_v0 = vmul.f32 -1.442695, %v12134_v20  ;;  %9353 = vmatpush1.bf16.msra.mxu1 %v9352_v53  ;;  %v12178_v50 = vmul.f32 %v9886_v32, %v11946_v17 }
 0x3ed   : > { %v9900_v43 = vpop.eup %9899  ;;  %9919 = vpow2.f32 %v9087_v18  ;;  %v12170_v29 = vpop.f32.mrb[67].mxu1  ;;  %v9043_v53 = vmul.f32 -1.442695, %v12151_v49  ;;  %v12194_v17 = vadd.f32 %v12055_v2, %v11877_v24  ;;  %v12225_v49 = vmul.f32 %v9894_v34, %v11955_v31  ;;  %v12243_v31 = vld [vmem:[%s14175_s25 + $0x10] sm:$0xff] }
 0x3ee   : > { %14177 = vst [vmem:[#allocation103_spill] sm:$0xff] %v12170_v29  ;;  %v9902_v48 = vpop.eup %9901  ;;  %9921 = vrcp.f32 %v4415_v19  ;;  %v4414_v23 = vadd.f32 1.0, %v9900_v43  ;;  %9096 = vmatmul.mubr.msk.f32.vlgmr.msra.gmra.mrb[72].mxu0 %vm4661_vm8, %v12163_v54  ;;  %v12186_v43 = vpop.f32.mrb[68].mxu0 }
 0x3ef   : > { %v9904_v63 = vpop.eup %9903  ;;  %v12181_v18 = vmul.f32 %v9902_v48, %v11975_v15  ;;  %9923 = vpow2.f32 %v9040_v46  ;;  %14178 = vst [vmem:[#allocation104_spill] sm:$0xff] %v12186_v43  ;;  %9100 = vmatmul.mubr.msk.f32.vlgmr.msra.gmra.mrb[72].mxu1 %vm4661_vm8, %v12163_v54  ;;  %4744 = vmatprep.mubr.f32.mxu0 %v14143_v57  ;;  %v12202_v15 = vld [vmem:[%s14175_s25 + $0x8] sm:$0xff]  ;;  %v12204_v32 = vpop.f32.mrb[68].mxu1  ;;  %v12209_v46 = vmul.f32 %v9890_v55, %v11950_v39 }
 0x3f0   : > { %v9906_v19 = vpop.eup %9905  ;;  %9925 = vrcp.f32 %v4414_v23  ;;  %v4416_v29 = vadd.f32 1.0, %v9904_v63  ;;  %14179 = vst [vmem:[#allocation105_spill] sm:$0xff] %v12204_v32  ;;  %v12206_v63 = vpop.f32.mrb[69].mxu0  ;;  %4833 = vmatprep.mubr.f32.mxu1 %v14143_v57  ;;  %v12222_v55 = vadd.f32 %v12058_v38, %v11877_v24 }
 0x3f1   : > { %14180 = vst [vmem:[#allocation106_spill] sm:$0xff] %v12206_v63  ;;  %v9908_v36 = vpop.eup %9907  ;;  %v9356_v2 = vpack.c.bf16 %v12181_v18, %v12178_v50  ;;  %v12214_v48 = vmul.f32 %v9906_v19, %v11990_v58  ;;  %9927 = vpow2.f32 %v9042_v0  ;;  %v12217_v23 = vpop.f32.mrb[69].mxu1  ;;  %v9056_v63 = vmul.f32 -1.442695, %v12175_v4 }
 0x3f2   : > { %14181 = vst [vmem:[#allocation107_spill] sm:$0xff] %v12217_v23  ;;  %v9910_v43 = vpop.eup %9909  ;;  %9929 = vrcp.f32 %v4416_v29  ;;  %v4429_v32 = vadd.f32 1.0, %v9908_v36  ;;  %9097 = vmatmul.mubr.msk.f32.gmra.mrb[74].mxu0 %vm4661_vm8, %v12202_v15  ;;  %v12234_v29 = vpop.f32.mrb[70].mxu0  ;;  %v9058_v36 = vmul.f32 -1.442695, %v12190_v40 }
 0x3f3   : > { %v9912_v39 = vpop.eup %9911  ;;  %v9364_v58 = vpack.c.bf16 %v12214_v48, %v12209_v46  ;;  %v12230_v0 = vmul.f32 %v9910_v43, %v11995_v41  ;;  %9931 = vpow2.f32 %v9041_v30  ;;  %14182 = vst [vmem:[#allocation108_spill] sm:$0xff] %v12234_v29  ;;  %9101 = vmatmul.mubr.msk.f32.gmra.mrb[74].mxu1 %vm4661_vm8, %v12202_v15  ;;  %4750 = vmatprep.mubr.f32.mxu0 %v14143_v57  ;;  %v12245_v41 = vpop.f32.mrb[70].mxu1  ;;  %v9059_v33 = vmul.f32 -1.442695, %v12222_v55 }
 0x3f4   : > { %v9914_v19 = vpop.eup %9913  ;;  %9933 = vrcp.f32 %v4429_v32  ;;  %v4431_v38 = vadd.f32 1.0, %v9912_v39  ;;  %14183 = vst [vmem:[#allocation109_spill] sm:$0xff] %v12245_v41  ;;  %v12247_v30 = vpop.f32.mrb[71].mxu0  ;;  %v12251_v43 = vmul.f32 %v12155_v45, %v11970_v16  ;;  %4839 = vmatprep.mubr.f32.mxu1 %v14143_v57  ;;  %v12269_v45 = vadd.f32 %v12073_v5, %v11891_v7  ;;  %v12288_v5 = vld [vmem:[%s14175_s25 + $0x18] sm:$0xff] }
 0x3f5   : > { %14184 = vst [vmem:[#allocation110_spill] sm:$0xff] %v12247_v30  ;;  %v9916_v34 = vpop.eup %9915  ;;  %v12254_v32 = vmul.f32 %v9914_v19, %v12006_v14  ;;  %9935 = vpow2.f32 %v9043_v53  ;;  %v9354_v39 = vpack.c.bf16 %v12230_v0, %v12225_v49  ;;  %v12259_v29 = vpop.f32.mrb[71].mxu1  ;;  %v9057_v30 = vmul.f32 -1.442695, %v12194_v17  ;;  %14189 = vst [vmem:[#allocation115_spill] sm:$0xff] %v12288_v5 }
 0x3f6   : > { %14185 = vst [vmem:[#allocation111_spill] sm:$0xff] %v12259_v29  ;;  %v9918_v23 = vpop.eup %9917  ;;  %9937 = vrcp.f32 %v4431_v38  ;;  %v4430_v41 = vadd.f32 1.0, %v9916_v34  ;;  %v12265_v14 = vadd.f32 %v12068_v26, %v11891_v7  ;;  %14186 = vst [vmem:[#allocation112_spill] sm:$0xff] %v12269_v45  ;;  %9098 = vmatmul.mubr.msk.f32.gmra.mrb[72].mxu0 %vm4661_vm8, %v12243_v31  ;;  %v12281_v26 = vadd.f32 %v12087_v8, %v11891_v7 }
 0x3f7   : > { %v9920_v16 = vpop.eup %9919  ;;  %9939 = vpow2.f32 %v9056_v63  ;;  %9355 = vmatprep.subr.bf16.mxu0 %v9354_v39  ;;  %v9362_v53 = vpack.c.bf16 %v12254_v32, %v12251_v43  ;;  %v12277_v63 = vadd.f32 %v12075_v3, %v11891_v7  ;;  %9102 = vmatmul.mubr.msk.f32.gmra.mrb[72].mxu1 %vm4661_vm8, %v12243_v31  ;;  %v12296_v3 = vadd.f32 %v12098_v60, %v11901_v51 }
 0x3f8   : > { %v9922_v19 = vpop.eup %9921  ;;  %9941 = vrcp.f32 %v4430_v41  ;;  %v4432_v38 = vadd.f32 1.0, %v9920_v16  ;;  %14188 = vst [vmem:[#allocation114_spill] sm:$0xff] %v12281_v26  ;;  %9357 = vmatpush1.bf16.msra.mxu0 %v9356_v2  ;;  %v12292_v41 = vadd.f32 %v12096_v10, %v11901_v51  ;;  %v12300_v8 = vadd.f32 %v12108_v12, %v11901_v51  ;;  %4756 = vmatprep.mubr.f32.mxu0 %v14143_v57 }
 0x3f9   : > { %14187 = vst [vmem:[#allocation113_spill] sm:$0xff] %v12277_v63  ;;  %v9924_v34 = vpop.eup %9923  ;;  %9943 = vpow2.f32 %v9058_v36  ;;  %14191 = vst [vmem:[#allocation117_spill] sm:$0xff] %v12296_v3  ;;  %9363 = vmatprep.subr.bf16.mxu1 %v9362_v53  ;;  %v12305_v36 = vadd.f32 %v12110_v1, %v11901_v51  ;;  %4845 = vmatprep.mubr.f32.mxu1 %v14143_v57  ;;  %v9072_v60 = vmul.f32 -1.442695, %v12265_v14  ;;  %v9074_v12 = vmul.f32 -1.442695, %v12269_v45 }
 0x3fa   : > { %14190 = vst [vmem:[#allocation116_spill] sm:$0xff] %v12292_v41  ;;  %14192 = vst [vmem:[#allocation118_spill] sm:$0xff] %v12300_v8  ;;  %v9926_v2 = vpop.eup %9925  ;;  %9945 = vrcp.f32 %v4432_v38  ;;  %v4385_v39 = vadd.f32 1.0, %v9924_v34  ;;  %9365 = vmatpush1.bf16.msra.mxu1 %v9364_v58  ;;  %9099 = vmatmul.mubr.msk.f32.gmra.mrb[74].mxu0 %vm4661_vm8, %v12288_v5  ;;  %v9073_v38 = vmul.f32 -1.442695, %v12277_v63 }
 0x3fb   : > { %v9928_v10 = vpop.eup %9927  ;;  %9947 = vpow2.f32 %v9057_v30  ;;  %v9075_v1 = vmul.f32 -1.442695, %v12281_v26  ;;  %9103 = vmatmul.mubr.msk.f32.gmra.mrb[74].mxu1 %vm4661_vm8, %v12288_v5  ;;  %4916 = vmatprep.mubr.f32.mxu0 %v14143_v57  ;;  %v9088_v30 = vmul.f32 -1.442695, %v12292_v41  ;;  %v9090_v34 = vmul.f32 -1.442695, %v12296_v3 }
 0x3fc   : > { %v9930_v16 = vpop.eup %9929  ;;  %9949 = vrcp.f32 %v4385_v39  ;;  %v4387_v53 = vadd.f32 1.0, %v9928_v10  ;;  %v12320_v29 = vmul.f32 -1.442695, %v12300_v8  ;;  %5005 = vmatprep.mubr.f32.mxu1 %v14143_v57  ;;  %v4605_v10 = vmul.f32 %v9918_v23, %v12022_v35 }
 0x3fd   : > { %v9932_v58 = vpop.eup %9931  ;;  %9951 = vpow2.f32 %v9059_v33  ;;  %v12325_v26 = vmul.f32 -1.442695, %v12305_v36  ;;  %v4607_v33 = vmul.f32 %v9922_v19, %v12034_v22  ;;  %v4606_v41 = vmul.f32 %v9926_v2, %v12043_v13  ;;  %v14196_v2 = vld [vmem:[#allocation93_spill] sm:$0xff] }
 0x3fe   : > { %v9934_v39 = vpop.eup %9933  ;;  %9953 = vrcp.f32 %v4387_v53  ;;  %v4386_v51 = vadd.f32 1.0, %v9932_v58  ;;  %v4608_v45 = vmul.f32 %v9930_v16, %v12051_v27  ;;  %v12333_v35 = vadd.f32 %v11998_v6, %v11960_v59  ;;  %v14193_v27 = vld [vmem:[#allocation92_spill] sm:$0xff]  ;;  %v14198_v16 = vld [vmem:[#allocation91_spill] sm:$0xff] }
 0x3ff   : > { %v9936_v63 = vpop.eup %9935  ;;  %v4621_v3 = vmul.f32 %v9934_v39, %v12066_v42  ;;  %9955 = vpow2.f32 %v9072_v60  ;;  %v12338_v22 = vadd.f32 %v12078_v44, %v12028_v28  ;;  %v12346_v59 = vadd.f32 %v12127_v21, %v14193_v27  ;;  %v14200_v27 = vld [vmem:[#allocation95_spill] sm:$0xff] }
 0x400   : > { %v9938_v8 = vpop.eup %9937  ;;  %9957 = vrcp.f32 %v4386_v51  ;;  %v4388_v5 = vadd.f32 1.0, %v9936_v63  ;;  %v12342_v51 = vadd.f32 %v12117_v52, %v11986_v25  ;;  %v14194_v63 = vld [vmem:[#allocation88_spill] sm:$0xff]  ;;  %v14197_v52 = vld [vmem:[#allocation89_spill] sm:$0xff] }
 0x401   : > { %v9940_v23 = vpop.eup %9939  ;;  %v9360_v53 = vpack.c.bf16 %v4621_v3, %v4605_v10  ;;  %v4623_v58 = vmul.f32 %v9938_v8, %v12085_v9  ;;  %9959 = vpow2.f32 %v9074_v12  ;;  %v12351_v28 = vadd.f32 %v12001_v62, %v14194_v63  ;;  %v14195_v8 = vld [vmem:[#allocation90_spill] sm:$0xff] }
 0x402   : > { %v9942_v13 = vpop.eup %9941  ;;  %9961 = vrcp.f32 %v4388_v5  ;;  %v4401_v42 = vadd.f32 1.0, %v9940_v23  ;;  %v12355_v25 = vadd.f32 %v14196_v2, %v14195_v8  ;;  %v12359_v21 = vadd.f32 %v12101_v56, %v14197_v52  ;;  %v14204_v8 = vld [vmem:[#allocation101_spill] sm:$0xff] }
 0x403   : > { %v9944_v6 = vpop.eup %9943  ;;  %v9368_v19 = vpack.c.bf16 %v4623_v58, %v4607_v33  ;;  %v4622_v9 = vmul.f32 %v9942_v13, %v12094_v37  ;;  %9963 = vpow2.f32 %v9073_v38  ;;  %v12364_v62 = vadd.f32 %v12113_v47, %v14198_v16 }
 0x404   : > { %v9946_v44 = vpop.eup %9945  ;;  %9965 = vrcp.f32 %v4401_v42  ;;  %v4403_v5 = vadd.f32 1.0, %v9944_v6  ;;  %v12367_v23 = vadd.f32 %v4605_v10, %v12178_v50  ;;  %v12370_v13 = vadd.f32 %v4607_v33, %v12209_v46  ;;  %v14199_v42 = vld [vmem:[#allocation86_spill] sm:$0xff]  ;;  %v14201_v10 = vld [vmem:[#allocation96_spill] sm:$0xff] }
 0x405   : > { %v9948_v60 = vpop.eup %9947  ;;  %v4624_v12 = vmul.f32 %v9946_v44, %v12106_v61  ;;  %9967 = vpow2.f32 %v9075_v1  ;;  %v9358_v37 = vpack.c.bf16 %v4622_v9, %v4606_v41  ;;  %v12374_v61 = vadd.f32 %v14200_v27, %v14199_v42 }
 0x406   : > { %v9950_v38 = vpop.eup %9949  ;;  %9969 = vrcp.f32 %v4403_v5  ;;  %v4402_v39 = vadd.f32 1.0, %v9948_v60  ;;  %v12377_v47 = vadd.f32 %v4606_v41, %v12225_v49  ;;  %v12380_v50 = vadd.f32 %v4608_v45, %v12251_v43  ;;  %v14205_v60 = vld [vmem:[#allocation94_spill] sm:$0xff] }
 0x407   : > { %v9952_v56 = vpop.eup %9951  ;;  %9971 = vpow2.f32 %v9088_v30  ;;  %9359 = vmatprep.subr.bf16.mxu0 %v9358_v37  ;;  %v9366_v1 = vpack.c.bf16 %v4624_v12, %v4608_v45  ;;  %v12383_v46 = vadd.f32 %v4621_v3, %v12181_v18  ;;  %v12387_v33 = vadd.f32 %v14201_v10, %v14199_v42 }
 0x408   : > { %v9954_v6 = vpop.eup %9953  ;;  %9973 = vrcp.f32 %v4402_v39  ;;  %v4404_v63 = vadd.f32 1.0, %v9952_v56  ;;  %9361 = vmatpush1.bf16.msra.mxu0 %v9360_v53  ;;  %v12390_v49 = vadd.f32 %v4623_v58, %v12214_v48  ;;  %v12393_v41 = vadd.f32 %v4622_v9, %v12230_v0  ;;  %v14203_v58 = vld [vmem:[#allocation98_spill] sm:$0xff] }
 0x409   : > { %v9956_v30 = vpop.eup %9955  ;;  %9975 = vpow2.f32 %v9090_v34  ;;  %9367 = vmatprep.subr.bf16.mxu1 %v9366_v1  ;;  %v12396_v18 = vadd.f32 %v4624_v12, %v12254_v32  ;;  %v9044_v3 = vmul.f32 -1.442695, %v12374_v61  ;;  %v14202_v34 = vld [vmem:[#allocation97_spill] sm:$0xff]  ;;  %v12417_v2 = vadd.f32 %v14204_v8, %v11877_v24 }
 0x40a   : > { %v9958_v53 = vpop.eup %9957  ;;  %9977 = vrcp.f32 %v4404_v63  ;;  %v4417_v43 = vadd.f32 1.0, %v9956_v30  ;;  %9369 = vmatpush1.bf16.msra.mxu1 %v9368_v19  ;;  %v12402_v44 = vadd.f32 %v14202_v34, %v14199_v42  ;;  %v12408_v19 = vadd.f32 %v14203_v58, %v14199_v42  ;;  %v14206_v42 = vld [vmem:[#allocation102_spill] sm:$0xff] }
 0x40b   : > { %v9960_v45 = vpop.eup %9959  ;;  %9979 = vpow2.f32 %v12320_v29  ;;  %9104 = vmatmul.mubr.msk.f32.vlgmr.msra.gmra.mrb[76].mxu0 %vm4661_vm8, %v12163_v54  ;;  %v9046_v29 = vmul.f32 -1.442695, %v12387_v33  ;;  %v12421_v12 = vmul.f32 %v9950_v38, %v14205_v60  ;;  %v12432_v27 = vadd.f32 %v14206_v42, %v11877_v24 }
 0x40c   : > { %v9962_v48 = vpop.eup %9961  ;;  %9981 = vrcp.f32 %v4417_v43  ;;  %v4419_v0 = vadd.f32 1.0, %v9960_v45  ;;  %4922 = vmatprep.mubr.f32.mxu0 %v14143_v57  ;;  %v9045_v37 = vmul.f32 -1.442695, %v12402_v44  ;;  %v9047_v56 = vmul.f32 -1.442695, %v12408_v19 }
 0x40d   : > { %v9964_v32 = vpop.eup %9963  ;;  %9983 = vpow2.f32 %v12325_v26  ;;  %9108 = vmatmul.mubr.msk.f32.vlgmr.msra.gmra.mrb[76].mxu1 %vm4661_vm8, %v12163_v54  ;;  %v9060_v43 = vmul.f32 -1.442695, %v12417_v2  ;;  %v12448_v45 = vadd.f32 %v12167_v11, %v11877_v24  ;;  %v9062_v11 = vmul.f32 -1.442695, %v12432_v27 }
 0x40e   : > { %v9966_v9 = vpop.eup %9965  ;;  %9985 = vrcp.f32 %v4419_v0  ;;  %v4418_v5 = vadd.f32 1.0, %v9964_v32  ;;  %5011 = vmatprep.mubr.f32.mxu1 %v14143_v57  ;;  %v14208_v32 = vld [vmem:[#allocation103_spill] sm:$0xff] }
 0x40f   : > { %v9968_v52 = vpop.eup %9967  ;;  %v12424_v26 = vmul.f32 %v9966_v9, %v12175_v4  ;;  %9987 = vpow2.f32 %v9044_v3  ;;  %9105 = vmatmul.mubr.msk.f32.gmra.mrb[78].mxu0 %vm4661_vm8, %v12202_v15  ;;  %v12436_v4 = vmul.f32 %v9954_v6, %v12134_v20  ;;  %v14207_v6 = vld [vmem:[#allocation99_spill] sm:$0xff]  ;;  %v14209_v9 = vld [vmem:[#allocation100_spill] sm:$0xff] }
 0x410   : > { %v9970_v16 = vpop.eup %9969  ;;  %9989 = vrcp.f32 %v4418_v5  ;;  %v4420_v39 = vadd.f32 1.0, %v9968_v52  ;;  %4928 = vmatprep.mubr.f32.mxu0 %v14143_v57  ;;  %v4578_v3 = vmul.f32 %v9958_v53, %v14207_v6  ;;  %v4580_v5 = vmul.f32 %v9962_v48, %v14209_v9  ;;  %v14216_v9 = vld [vmem:[#allocation113_spill] sm:$0xff] }
 0x411   : > { %v9972_v38 = vpop.eup %9971  ;;  %v9372_v1 = vpack.c.bf16 %v12424_v26, %v12421_v12  ;;  %v12441_v63 = vmul.f32 %v9970_v16, %v12190_v40  ;;  %9991 = vpow2.f32 %v9046_v29  ;;  %9109 = vmatmul.mubr.msk.f32.gmra.mrb[78].mxu1 %vm4661_vm8, %v12202_v15  ;;  %v12462_v29 = vadd.f32 %v14208_v32, %v11877_v24  ;;  %v14215_v32 = vld [vmem:[#allocation106_spill] sm:$0xff] }
 0x412   : > { %v9974_v30 = vpop.eup %9973  ;;  %9993 = vrcp.f32 %v4420_v39  ;;  %v4433_v10 = vadd.f32 1.0, %v9972_v38  ;;  %5017 = vmatprep.mubr.f32.mxu1 %v14143_v57  ;;  %v9061_v24 = vmul.f32 -1.442695, %v12448_v45 }
 0x413   : > { %v9976_v20 = vpop.eup %9975  ;;  %v9380_v40 = vpack.c.bf16 %v12441_v63, %v12436_v4  ;;  %v12455_v34 = vmul.f32 %v9974_v30, %v12194_v17  ;;  %9995 = vpow2.f32 %v9045_v37  ;;  %9106 = vmatmul.mubr.msk.f32.gmra.mrb[76].mxu0 %vm4661_vm8, %v12243_v31  ;;  %v9063_v30 = vmul.f32 -1.442695, %v12462_v29 }
 0x414   : > { %v9978_v0 = vpop.eup %9977  ;;  %9997 = vrcp.f32 %v4433_v10  ;;  %v4435_v58 = vadd.f32 1.0, %v9976_v20  ;;  %4934 = vmatprep.mubr.f32.mxu0 %v14143_v57  ;;  %v14212_v10 = vld [vmem:[#allocation112_spill] sm:$0xff]  ;;  %v14213_v20 = vld [vmem:[#allocation105_spill] sm:$0xff] }
 0x415   : > { %v9980_v53 = vpop.eup %9979  ;;  %v12467_v17 = vmul.f32 %v9978_v0, %v12222_v55  ;;  %9999 = vpow2.f32 %v9047_v56  ;;  %v9370_v8 = vpack.c.bf16 %v12455_v34, %v4578_v3  ;;  %9110 = vmatmul.mubr.msk.f32.gmra.mrb[76].mxu1 %vm4661_vm8, %v12243_v31  ;;  %v14210_v55 = vld [vmem:[#allocation104_spill] sm:$0xff]  ;;  %v14211_v56 = vld [vmem:[#allocation115_spill] sm:$0xff]  ;;  %v12491_v6 = vadd.f32 %v14213_v20, %v11891_v7 }
 0x416   : > { %v9982_v52 = vpop.eup %9981  ;;  %10001 = vrcp.f32 %v4435_v58  ;;  %v4434_v60 = vadd.f32 1.0, %v9980_v53  ;;  %5023 = vmatprep.mubr.f32.mxu1 %v14143_v57  ;;  %v12479_v48 = vadd.f32 %v14210_v55, %v11891_v7  ;;  %v12501_v53 = vadd.f32 %v14215_v32, %v11891_v7  ;;  %v14218_v55 = vld [vmem:[#allocation107_spill] sm:$0xff] }
 0x417   : > { %v9984_v37 = vpop.eup %9983  ;;  %v12475_v16 = vmul.f32 %v9982_v52, %v12265_v14  ;;  %10003 = vpow2.f32 %v9060_v43  ;;  %9371 = vmatprep.subr.bf16.mxu0 %v9370_v8  ;;  %v9378_v39 = vpack.c.bf16 %v12467_v17, %v4580_v5  ;;  %9107 = vmatmul.mubr.msk.f32.gmra.mrb[78].mxu0 %vm4661_vm8, %v14211_v56 }
 0x418   : > { %v9986_v42 = vpop.eup %9985  ;;  %10005 = vrcp.f32 %v4434_v60  ;;  %v4436_v38 = vadd.f32 1.0, %v9984_v37  ;;  %9373 = vmatpush1.bf16.msra.mxu0 %v9372_v1  ;;  %5094 = vmatprep.mubr.f32.mxu0 %v14143_v57  ;;  %v9076_v52 = vmul.f32 -1.442695, %v12479_v48 }
 0x419   : > { %v9988_v14 = vpop.eup %9987  ;;  %v12487_v43 = vmul.f32 %v9986_v42, %v14212_v10  ;;  %10007 = vpow2.f32 %v9062_v11  ;;  %9379 = vmatprep.subr.bf16.mxu1 %v9378_v39  ;;  %9111 = vmatmul.mubr.msk.f32.gmra.mrb[78].mxu1 %vm4661_vm8, %v14211_v56  ;;  %v12497_v0 = vadd.f32 %v12475_v16, %v12421_v12  ;;  %v12512_v39 = vadd.f32 %v14218_v55, %v11891_v7  ;;  %v14219_v42 = vld [vmem:[#allocation114_spill] sm:$0xff] }
 0x41a   : > { %v9990_v1 = vpop.eup %9989  ;;  %10009 = vrcp.f32 %v4436_v38  ;;  %v4389_v58 = vadd.f32 1.0, %v9988_v14  ;;  %9381 = vmatpush1.bf16.msra.mxu1 %v9380_v40  ;;  %5183 = vmatprep.mubr.f32.mxu1 %v14143_v57  ;;  %v9078_v14 = vmul.f32 -1.442695, %v12491_v6  ;;  %v9077_v7 = vmul.f32 -1.442695, %v12501_v53 }
 0x41b   : > { %14214 = vst [vmem:[#allocation92_spill] sm:$0xff] %v12497_v0  ;;  %v9992_v11 = vpop.eup %9991  ;;  %v4610_v8 = vmul.f32 %v9990_v1, %v14216_v9  ;;  %10011 = vpow2.f32 %v9061_v24  ;;  %v12508_v12 = vadd.f32 %v12487_v43, %v12436_v4  ;;  %v14221_v4 = vld [vmem:[#allocation87_spill] sm:$0xff]  ;;  %v14222_v1 = vld [vmem:[#allocation108_spill] sm:$0xff]  ;;  %v14228_v0 = vld [vmem:[#allocation118_spill] sm:$0xff] }
 0x41c   : > { %v9994_v60 = vpop.eup %9993  ;;  %10013 = vrcp.f32 %v4389_v58  ;;  %v4391_v37 = vadd.f32 1.0, %v9992_v11  ;;  %v12520_v32 = vadd.f32 %v14222_v1, %v14221_v4  ;;  %v14223_v11 = vld [vmem:[#allocation116_spill] sm:$0xff] }
 0x41d   : > { %14217 = vst [vmem:[#allocation88_spill] sm:$0xff] %v12508_v12  ;;  %v9996_v40 = vpop.eup %9995  ;;  %v4612_v38 = vmul.f32 %v9994_v60, %v14219_v42  ;;  %10015 = vpow2.f32 %v9063_v30  ;;  %v12516_v24 = vadd.f32 %v4610_v8, %v4578_v3  ;;  %v9079_v3 = vmul.f32 -1.442695, %v12512_v39  ;;  %v14226_v12 = vld [vmem:[#allocation117_spill] sm:$0xff] }
 0x41e   : > { %v9998_v10 = vpop.eup %9997  ;;  %10017 = vrcp.f32 %v4391_v37  ;;  %v4390_v20 = vadd.f32 1.0, %v9996_v40  ;;  %v14225_v37 = vld [vmem:[#allocation109_spill] sm:$0xff] }
 0x41f   : > { %14220 = vst [vmem:[#allocation90_spill] sm:$0xff] %v12516_v24  ;;  %v10000_v58 = vpop.eup %9999  ;;  %v4625_v9 = vmul.f32 %v9998_v10, %v14223_v11  ;;  %10019 = vpow2.f32 %v9076_v52  ;;  %v12524_v55 = vadd.f32 %v4612_v38, %v4580_v5  ;;  %v12529_v40 = vadd.f32 %v14225_v37, %v14221_v4 }
 0x420   : > { %v10002_v30 = vpop.eup %10001  ;;  %10021 = vrcp.f32 %v4390_v20  ;;  %v4392_v60 = vadd.f32 1.0, %v10000_v58  ;;  %v9092_v20 = vmul.f32 -1.442695, %v12520_v32  ;;  %v14227_v58 = vld [vmem:[#allocation110_spill] sm:$0xff] }
 0x421   : > { %14224 = vst [vmem:[#allocation93_spill] sm:$0xff] %v12524_v55  ;;  %v10004_v42 = vpop.eup %10003  ;;  %v9376_v1 = vpack.c.bf16 %v4625_v9, %v12475_v16  ;;  %v4627_v24 = vmul.f32 %v10002_v30, %v14226_v12  ;;  %10023 = vpow2.f32 %v9078_v14  ;;  %v12534_v52 = vadd.f32 %v4625_v9, %v12424_v26  ;;  %v14229_v30 = vld [vmem:[#allocation111_spill] sm:$0xff] }
 0x422   : > { %v10006_v5 = vpop.eup %10005  ;;  %10025 = vrcp.f32 %v4392_v60  ;;  %v4405_v10 = vadd.f32 1.0, %v10004_v42  ;;  %v12539_v11 = vadd.f32 %v14227_v58, %v14221_v4  ;;  %v9094_v9 = vmul.f32 -1.442695, %v12529_v40 }
 0x423   : > { %v10008_v37 = vpop.eup %10007  ;;  %v9384_v55 = vpack.c.bf16 %v4627_v24, %v12487_v43  ;;  %v4626_v16 = vmul.f32 %v10006_v5, %v14228_v0  ;;  %10027 = vpow2.f32 %v9077_v7  ;;  %v12544_v12 = vadd.f32 %v4627_v24, %v12441_v63 }
 0x424   : > { %v10010_v26 = vpop.eup %10009  ;;  %10029 = vrcp.f32 %v4405_v10  ;;  %v4407_v14 = vadd.f32 1.0, %v10008_v37  ;;  %v12549_v60 = vadd.f32 %v14229_v30, %v14221_v4  ;;  %v9093_v5 = vmul.f32 -1.442695, %v12539_v11 }
 0x425   : > { %v10012_v42 = vpop.eup %10011  ;;  %v4628_v58 = vmul.f32 %v10010_v26, %v12305_v36  ;;  %10031 = vpow2.f32 %v9079_v3  ;;  %v9374_v43 = vpack.c.bf16 %v4626_v16, %v4610_v8  ;;  %v12553_v0 = vadd.f32 %v4626_v16, %v12455_v34 }
 0x426   : > { %v10014_v7 = vpop.eup %10013  ;;  %10033 = vrcp.f32 %v4407_v14  ;;  %v4406_v63 = vadd.f32 1.0, %v10012_v42  ;;  %v9095_v34 = vmul.f32 -1.442695, %v12549_v60 }
 0x427   : > { %v10016_v24 = vpop.eup %10015  ;;  %10035 = vpow2.f32 %v9092_v20  ;;  %9375 = vmatprep.subr.bf16.mxu0 %v9374_v43  ;;  %v9382_v10 = vpack.c.bf16 %v4628_v58, %v4612_v38  ;;  %v12557_v4 = vadd.f32 %v4628_v58, %v12467_v17 }
 0x428   : > { %v10018_v37 = vpop.eup %10017  ;;  %10037 = vrcp.f32 %v4406_v63  ;;  %v4408_v36 = vadd.f32 1.0, %v10016_v24  ;;  %9377 = vmatpush1.bf16.msra.mxu0 %v9376_v1 }
 0x429   : > { %v10020_v8 = vpop.eup %10019  ;;  %10039 = vpow2.f32 %v9094_v9  ;;  %9383 = vmatprep.subr.bf16.mxu1 %v9382_v10  ;;  %v4581_v9 = vmul.f32 %v10014_v7, %v12374_v61  ;;  %v4583_v63 = vmul.f32 %v10018_v37, %v12387_v33 }
 0x42a   : > { %v10022_v3 = vpop.eup %10021  ;;  %10041 = vrcp.f32 %v4408_v36  ;;  %v4421_v16 = vadd.f32 1.0, %v10020_v8  ;;  %9385 = vmatpush1.bf16.msra.mxu1 %v9384_v55 }
 0x42b   : > { %v10024_v20 = vpop.eup %10023  ;;  %10043 = vpow2.f32 %v9093_v5  ;;  %9112 = vmatmul.mubr.msk.f32.vlgmr.msra.gmra.mrb[80].mxu0 %vm4661_vm8, %v12163_v54  ;;  %v4582_v10 = vmul.f32 %v10022_v3, %v12402_v44 }
 0x42c   : > { %v10026_v17 = vpop.eup %10025  ;;  %10045 = vrcp.f32 %v4421_v16  ;;  %v4423_v38 = vadd.f32 1.0, %v10024_v20  ;;  %5100 = vmatprep.mubr.f32.mxu0 %v14143_v57 }
 0x42d   : > { %v10028_v1 = vpop.eup %10027  ;;  %10047 = vpow2.f32 %v9095_v34  ;;  %9116 = vmatmul.mubr.msk.f32.vlgmr.msra.gmra.mrb[80].mxu1 %vm4661_vm8, %v12163_v54  ;;  %v4584_v34 = vmul.f32 %v10026_v17, %v12408_v19 }
 0x42e   : > { %v10030_v26 = vpop.eup %10029  ;;  %10049 = vrcp.f32 %v4423_v38  ;;  %v4422_v14 = vadd.f32 1.0, %v10028_v1  ;;  %5189 = vmatprep.mubr.f32.mxu1 %v14143_v57 }
 0x42f   : > { %v10032_v55 = vpop.eup %10031  ;;  %v12568_v30 = vmul.f32 %v10030_v26, %v12417_v2  ;;  %9113 = vmatmul.mubr.msk.f32.gmra.mrb[82].mxu0 %vm4661_vm8, %v12202_v15 }
 0x430   : > { %v10034_v42 = vpop.eup %10033  ;;  %10051 = vrcp.f32 %v4422_v14  ;;  %v4424_v58 = vadd.f32 1.0, %v10032_v55  ;;  %5106 = vmatprep.mubr.f32.mxu0 %v14143_v57 }
 0x431   : > { %v10036_v43 = vpop.eup %10035  ;;  %v9388_v24 = vpack.c.bf16 %v12568_v30, %v4581_v9  ;;  %v12576_v5 = vmul.f32 %v10034_v42, %v12432_v27  ;;  %9117 = vmatmul.mubr.msk.f32.gmra.mrb[82].mxu1 %vm4661_vm8, %v12202_v15 }
 0x432   : > { %v10038_v61 = vpop.eup %10037  ;;  %10053 = vrcp.f32 %v4424_v58  ;;  %v4437_v2 = vadd.f32 1.0, %v10036_v43  ;;  %5195 = vmatprep.mubr.f32.mxu1 %v14143_v57 }
 0x433   : > { %v10040_v7 = vpop.eup %10039  ;;  %v9396_v36 = vpack.c.bf16 %v12576_v5, %v4583_v63  ;;  %v4598_v33 = vmul.f32 %v10038_v61, %v12448_v45  ;;  %9114 = vmatmul.mubr.msk.f32.gmra.mrb[80].mxu0 %vm4661_vm8, %v12243_v31 }
 0x434   : > { %v10042_v27 = vpop.eup %10041  ;;  %10055 = vrcp.f32 %v4437_v2  ;;  %v4439_v37 = vadd.f32 1.0, %v10040_v7  ;;  %5112 = vmatprep.mubr.f32.mxu0 %v14143_v57  ;;  %v5469_v7 = vld [vmem:[%s12626_s13] sm:$0xff] }
 0x435   : > { %v10044_v8 = vpop.eup %10043  ;;  %v4600_v16 = vmul.f32 %v10042_v27, %v12462_v29  ;;  %v9386_v44 = vpack.c.bf16 %v4598_v33, %v4582_v10  ;;  %9118 = vmatmul.mubr.msk.f32.gmra.mrb[80].mxu1 %vm4661_vm8, %v12243_v31 }
 0x436   : > { %v10046_v45 = vpop.eup %10045  ;;  %10057 = vrcp.f32 %v4439_v37  ;;  %v4438_v3 = vadd.f32 1.0, %v10044_v8  ;;  %5201 = vmatprep.mubr.f32.mxu1 %v14143_v57  ;;  %v5470_v37 = vld [vmem:[%s12626_s13 + $0x8] sm:$0xff] }
 0x437   : > { %v10048_v20 = vpop.eup %10047  ;;  %v4613_v38 = vmul.f32 %v10046_v45, %v12479_v48  ;;  %9387 = vmatprep.subr.bf16.mxu0 %v9386_v44  ;;  %v9394_v19 = vpack.c.bf16 %v4600_v16, %v4584_v34  ;;  %9115 = vmatmul.mubr.msk.f32.gmra.mrb[82].mxu0 %vm4661_vm8, %v14211_v56  ;;  %v5501_v44 = vcombine.high %v5469_v7, %v5469_v7 }
 0x438   : > { %v10050_v29 = vpop.eup %10049  ;;  %10059 = vrcp.f32 %v4438_v3  ;;  %v4440_v17 = vadd.f32 1.0, %v10048_v20  ;;  %9389 = vmatpush1.bf16.msra.mxu0 %v9388_v24  ;;  %5272 = vmatprep.mubr.f32.mxu0 %v14143_v57  ;;  %v5502_v3 = vcombine.high %v5470_v37, %v5470_v37 }
 0x439   : > { %v4615_v1 = vmul.f32 %v10050_v29, %v12491_v6  ;;  %9395 = vmatprep.subr.bf16.mxu1 %v9394_v19  ;;  %9119 = vmatmul.mubr.msk.f32.gmra.mrb[82].mxu1 %vm4661_vm8, %v14211_v56  ;;  %v12606_v48 = vadd.f32 %v4613_v38, %v4581_v9  ;;  %v5476_v19 = vld [vmem:[%s12626_s13 + $0x38] sm:$0xff] }
 0x43a   : > { %v10052_v26 = vpop.eup %10051  ;;  %10061 = vrcp.f32 %v4440_v17  ;;  %9397 = vmatpush1.bf16.msra.mxu1 %v9396_v36  ;;  %5361 = vmatprep.mubr.f32.mxu1 %v14143_v57  ;;  %v12710_v17 = vpop.permute.xlu1 %1615 }
 0x43b   : > { %v4614_v14 = vmul.f32 %v10052_v26, %v12501_v53  ;;  %v12616_v55 = vadd.f32 %v4615_v1, %v4583_v63 }
 0x43c   : > { %v10054_v6 = vpop.eup %10053 }
 0x43d   : > { %v4616_v42 = vmul.f32 %v10054_v6, %v12512_v39  ;;  %v12620_v9 = vadd.f32 %v4614_v14, %v4582_v10 }
 0x43e   : > { %v10056_v58 = vpop.eup %10055  ;;  %v12714_v26 = vpop.permute.xlu1 %6248 }
 0x43f   : > { %v4629_v43 = vmul.f32 %v10056_v58, %v12520_v32  ;;  %v12628_v24 = vadd.f32 %v4616_v42, %v4584_v34  ;;  %14233 = vst [vmem:[#allocation89_spill] sm:$0xff] %v12714_v26 }
 0x440   : > { %v10058_v53 = vpop.eup %10057 }
 0x441   : > { %v9392_v63 = vpack.c.bf16 %v4629_v43, %v4613_v38  ;;  %v4631_v61 = vmul.f32 %v10058_v53, %v12529_v40  ;;  %v12632_v39 = vadd.f32 %v4629_v43, %v12568_v30  ;;  %v5471_v40 = vld [vmem:[%s12626_s13 + $0x10] sm:$0xff] }
 0x442   : > { %v10060_v2 = vpop.eup %10059  ;;  %v4644_v6 = vpop.permute.xlu1 %4643 }
 0x443   : > { %v9400_v32 = vpack.c.bf16 %v4631_v61, %v4615_v1  ;;  %v4630_v10 = vmul.f32 %v10060_v2, %v12539_v11  ;;  %v12637_v36 = vadd.f32 %v4631_v61, %v12576_v5  ;;  %v5472_v11 = vld [vmem:[%s12626_s13 + $0x18] sm:$0xff]  ;;  %v5503_v5 = vcombine.high %v5471_v40, %v5471_v40  ;;  %v12712_v1 = vpop.permute.xlu0 %1620 }
 0x444   : > { %v10062_v27 = vpop.eup %10061 }
 0x445   : > { %v4632_v8 = vmul.f32 %v10062_v27, %v12549_v60  ;;  %v9390_v34 = vpack.c.bf16 %v4630_v10, %v4614_v14  ;;  %v12641_v45 = vadd.f32 %v4630_v10, %v4598_v33  ;;  %v5504_v60 = vcombine.high %v5472_v11, %v5472_v11  ;;  %v5474_v33 = vld [vmem:[%s12626_s13 + $0x28] sm:$0xff] }
 0x446   : > { %v5506_v38 = vcombine.high %v5474_v33, %v5474_v33  ;;  %v4654_v58 = vpop.permute.xlu1 %4653 }
 0x447   : > { %9391 = vmatprep.subr.bf16.mxu0 %v9390_v34  ;;  %v9398_v30 = vpack.c.bf16 %v4632_v8, %v4616_v42  ;;  %v12644_v20 = vadd.f32 %v4632_v8, %v4600_v16  ;;  %v12716_v14 = vpop.permute.xlu0 %6253  ;;  %v12718_v43 = vadd.f32 %v4654_v58, %v4644_v6 }
 0x448   : > { %9393 = vmatpush1.bf16.msra.mxu0 %v9392_v63  ;;  %14234 = vst [vmem:[#allocation91_spill] sm:$0xff] %v12716_v14 }
 0x449   : > { %9399 = vmatprep.subr.bf16.mxu1 %v9398_v30  ;;  %9128 = vmatprep.subr.msk.mxu0 %vm5513_vm9, %v5501_v44 }
 0x44a   : > { %9401 = vmatpush1.bf16.msra.mxu1 %v9400_v32 }
 0x44b   : > { %9120 = vmatmul.mubr.msk.f32.vlgmr.msra.gmra.mrb[84].mxu0 %vm4661_vm8, %v12163_v54  ;;  %9131 = vmatprep.subr.msk.mxu1 %vm5513_vm9, %v5502_v3  ;;  %v4649_v42 = vpop.permute.xlu0 %4648 }
 0x44c   : > { %5278 = vmatprep.mubr.f32.mxu0 %v14143_v57  ;;  %9129 = vmatpush1.msk.msra.mxu0 %vm5513_vm9, %v5469_v7 }
 0x44d   : > { %9124 = vmatmul.mubr.msk.f32.vlgmr.msra.gmra.mrb[84].mxu1 %vm4661_vm8, %v12163_v54  ;;  %9134 = vmatprep.subr.msk.mxu0 %vm5513_vm9, %v5503_v5  ;;  %v5473_v54 = vld [vmem:[%s12626_s13 + $0x20] sm:$0xff] }
 0x44e   : > { %5367 = vmatprep.mubr.f32.mxu1 %v14143_v57  ;;  %9132 = vmatpush1.msk.msra.mxu1 %vm5513_vm9, %v5470_v37  ;;  %v5505_v16 = vcombine.high %v5473_v54, %v5473_v54 }
 0x44f   : > { %9121 = vmatmul.mubr.msk.f32.gmra.mrb[86].mxu0 %vm4661_vm8, %v12202_v15  ;;  %9137 = vmatprep.subr.msk.mxu1 %vm5513_vm9, %v5504_v60  ;;  %v4659_v7 = vpop.permute.xlu0 %4658 }
 0x450   : > { %5284 = vmatprep.mubr.f32.mxu0 %v14143_v57  ;;  %v12723_v37 = vadd.f32 %v4659_v7, %v4649_v42 }
 0x451   : > { %9125 = vmatmul.mubr.msk.f32.gmra.mrb[86].mxu1 %vm4661_vm8, %v12202_v15  ;;  %v5468_v15 = vld [vmem:[%s14232_s26] sm:$0xff]  ;;  %s14415_s26 = sld [smem:[#allocation134_spill]] }
 0x452   : > { %5373 = vmatprep.mubr.f32.mxu1 %v14143_v57 }
 0x453   : > { %9122 = vmatmul.mubr.msk.f32.gmra.mrb[84].mxu0 %vm4661_vm8, %v12243_v31 }
 0x454   : > { %5290 = vmatprep.mubr.f32.mxu0 %v14143_v57 }
 0x455   : > { %9126 = vmatmul.mubr.msk.f32.gmra.mrb[84].mxu1 %vm4661_vm8, %v12243_v31  ;;  %v5475_v31 = vld [vmem:[%s12626_s13 + $0x30] sm:$0xff]  ;;  %s14371_s13 = sld [smem:[#allocation132_spill]] }
 0x456   : > { %5379 = vmatprep.mubr.f32.mxu1 %v14143_v57  ;;  %v5507_v29 = vcombine.high %v5475_v31, %v5475_v31 }
 0x457   : > { %9123 = vmatmul.mubr.msk.f32.gmra.mrb[86].mxu0 %vm4661_vm8, %v14211_v56 }
 0x458   : > { %5610 = vmatprep.mubr.f32.mxu0 %v14143_v57 }
 0x459   : > { %9127 = vmatmul.mubr.msk.f32.gmra.mrb[86].mxu1 %vm4661_vm8, %v14211_v56  ;;  %v5508_v56 = vcombine.high %v5476_v19, %v5476_v19 }
 0x45a   : > { %5681 = vmatprep.mubr.f32.mxu1 %v14143_v57 }
 0x45b   : > { %9130 = vmatmul.mubr.msk.f32.vlgmr.msra.gmra.mrb[88].mxu0 %vm5509_vm10, %v5468_v15 }
 0x45c   : > { %9135 = vmatpush1.msk.msra.mxu0 %vm5513_vm9, %v5471_v40  ;;  %5752 = vmatprep.mubr.f32.mxu0 %v14143_v57 }
 0x45d   : > { %9133 = vmatmul.mubr.msk.f32.vlgmr.msra.gmra.mrb[88].mxu1 %vm5509_vm10, %v5468_v15  ;;  %9140 = vmatprep.subr.msk.mxu0 %vm5513_vm9, %v5505_v16 }
 0x45e   : > { %9138 = vmatpush1.msk.msra.mxu1 %vm5513_vm9, %v5472_v11  ;;  %5823 = vmatprep.mubr.f32.mxu1 %v14143_v57 }
 0x45f   : > { %9136 = vmatmul.mubr.msk.f32.vlgmr.msra.gmra.mrb[90].mxu0 %vm5509_vm10, %v5468_v15  ;;  %9143 = vmatprep.subr.msk.mxu1 %vm5513_vm9, %v5506_v38 }
 0x460   : > { %9141 = vmatpush1.msk.msra.mxu0 %vm5513_vm9, %v5473_v54  ;;  %5894 = vmatprep.mubr.f32.mxu0 %v14143_v57 }
 0x461   : > { %9139 = vmatmul.mubr.msk.f32.vlgmr.msra.gmra.mrb[90].mxu1 %vm5509_vm10, %v5468_v15  ;;  %9146 = vmatprep.subr.msk.mxu0 %vm5513_vm9, %v5507_v29 }
 0x462   : > { %9144 = vmatpush1.msk.msra.mxu1 %vm5513_vm9, %v5474_v33  ;;  %5965 = vmatprep.mubr.f32.mxu1 %v14143_v57 }
 0x463   : > { %9142 = vmatmul.mubr.msk.f32.vlgmr.msra.gmra.mrb[92].mxu0 %vm5509_vm10, %v5468_v15  ;;  %9149 = vmatprep.subr.msk.mxu1 %vm5513_vm9, %v5508_v56 }
 0x464   : > { %9147 = vmatpush1.msk.msra.mxu0 %vm5513_vm9, %v5475_v31  ;;  %6036 = vmatprep.mubr.f32.mxu0 %v14143_v57 }
 0x465   : > { %9145 = vmatmul.mubr.msk.f32.vlgmr.msra.gmra.mrb[92].mxu1 %vm5509_vm10, %v5468_v15 }
 0x466   : > { %9150 = vmatpush1.msk.msra.mxu1 %vm5513_vm9, %v5476_v19  ;;  %6107 = vmatprep.mubr.f32.mxu1 %v14143_v57 }
 0x467   : > { %9148 = vmatmul.mubr.msk.f32.vlgmr.msra.gmra.mrb[94].mxu0 %vm5509_vm10, %v5468_v15 }
 0x468   : > { %6326 = vmatprep.mubr.f32.mxu0 %v14143_v57 }
 0x469   : > { %9151 = vmatmul.mubr.msk.f32.vlgmr.msra.gmra.mrb[94].mxu1 %vm5509_vm10, %v5468_v15 }
 0x46a   : > { %6403 = vmatprep.mubr.f32.mxu1 %v14143_v57 }
 0x4c9   : > { %v4752_v53 = vpop.f32.mrb[72].mxu0 }
 0x4ca   : > { %v9435_v63 = vadd.f32 %v12718_v43, %v4752_v53  ;;  %v4841_v61 = vpop.f32.mrb[72].mxu1  ;;  %v4754_v2 = vpop.f32.mrb[73].mxu0 }
 0x4cb   : > { %v9443_v32 = vadd.f32 %v12718_v43, %v4841_v61  ;;  %v9437_v10 = vadd.f32 %v12718_v43, %v4754_v2  ;;  %v4843_v27 = vpop.f32.mrb[73].mxu1 }
 0x4cc   : > { %v12726_v8 = vadd.f32 %v9435_v63, %v12333_v35  ;;  %v9445_v34 = vadd.f32 %v12718_v43, %v4843_v27 }
 0x4cd   : > { %v12730_v44 = vadd.f32 %v9443_v32, %v12338_v22  ;;  %v12733_v40 = vadd.f32 %v9437_v10, %v12342_v51  ;;  %v4758_v30 = vpop.f32.mrb[74].mxu0 }
 0x4ce   : > { %14235 = vst [vmem:[#allocation86_spill] sm:$0xff] %v12726_v8  ;;  %v12736_v3 = vadd.f32 %v9445_v34, %v12346_v59  ;;  %v9439_v11 = vadd.f32 %v12723_v37, %v4758_v30  ;;  %v4847_v5 = vpop.f32.mrb[74].mxu1  ;;  %v4760_v60 = vpop.f32.mrb[75].mxu0 }
 0x4cf   : > { %14236 = vst [vmem:[#allocation95_spill] sm:$0xff] %v12730_v44  ;;  %14237 = vst [vmem:[#allocation96_spill] sm:$0xff] %v12733_v40  ;;  %v9447_v54 = vadd.f32 %v12723_v37, %v4847_v5  ;;  %v9441_v35 = vadd.f32 %v12723_v37, %v4760_v60  ;;  %v4849_v15 = vpop.f32.mrb[75].mxu1  ;;  %v14251_v60 = vld [vmem:[#allocation92_spill] sm:$0xff] }
 0x4d0   : > { %14238 = vst [vmem:[#allocation97_spill] sm:$0xff] %v12736_v3  ;;  %v12742_v33 = vadd.f32 %v9439_v11, %v12351_v28  ;;  %v9449_v22 = vadd.f32 %v12723_v37, %v4849_v15  ;;  %v14253_v15 = vld [vmem:[#allocation90_spill] sm:$0xff] }
 0x4d1   : > { %v12746_v51 = vadd.f32 %v9447_v54, %v12355_v25  ;;  %v12749_v59 = vadd.f32 %v9441_v35, %v12359_v21 }
 0x4d2   : > { %14239 = vst [vmem:[#allocation98_spill] sm:$0xff] %v12742_v33  ;;  %v12752_v16 = vadd.f32 %v9449_v22, %v12364_v62 }
 0x4d3   : > { %14240 = vst [vmem:[#allocation101_spill] sm:$0xff] %v12746_v51  ;;  %14241 = vst [vmem:[#allocation94_spill] sm:$0xff] %v12749_v59 }
 0x4d4   : > { %14242 = vst [vmem:[#allocation102_spill] sm:$0xff] %v12752_v16 }
 0x4e6   : > { %v4930_v31 = vpop.f32.mrb[76].mxu0 }
 0x4e7   : > { %v9451_v38 = vadd.f32 %v12718_v43, %v4930_v31  ;;  %v4932_v19 = vpop.f32.mrb[77].mxu0  ;;  %v14255_v31 = vld [vmem:[#allocation88_spill] sm:$0xff] }
 0x4e8   : > { %v5019_v29 = vpop.f32.mrb[76].mxu1  ;;  %v9453_v56 = vadd.f32 %v12718_v43, %v4932_v19 }
 0x4e9   : > { %v12757_v28 = vadd.f32 %v9451_v38, %v12367_v23  ;;  %v9459_v6 = vadd.f32 %v12718_v43, %v5019_v29  ;;  %v5021_v25 = vpop.f32.mrb[77].mxu1 }
 0x4ea   : > { %v12761_v42 = vadd.f32 %v9453_v56, %v12377_v47  ;;  %v9461_v21 = vadd.f32 %v12718_v43, %v5021_v25  ;;  %v4936_v62 = vpop.f32.mrb[78].mxu0  ;;  %v14257_v56 = vld [vmem:[#allocation93_spill] sm:$0xff] }
 0x4eb   : > { %14243 = vst [vmem:[#allocation99_spill] sm:$0xff] %v12757_v28  ;;  %v12765_v58 = vadd.f32 %v9459_v6, %v12370_v13  ;;  %v9455_v53 = vadd.f32 %v12723_v37, %v4936_v62  ;;  %v4938_v63 = vpop.f32.mrb[79].mxu0 }
 0x4ec   : > { %14244 = vst [vmem:[#allocation103_spill] sm:$0xff] %v12761_v42  ;;  %v12769_v61 = vadd.f32 %v9461_v21, %v12380_v50  ;;  %v5025_v23 = vpop.f32.mrb[78].mxu1  ;;  %v9457_v2 = vadd.f32 %v12723_v37, %v4938_v63 }
 0x4ed   : > { %14245 = vst [vmem:[#allocation100_spill] sm:$0xff] %v12765_v58  ;;  %v12773_v7 = vadd.f32 %v9455_v53, %v12383_v46  ;;  %v9463_v47 = vadd.f32 %v12723_v37, %v5025_v23  ;;  %v5027_v32 = vpop.f32.mrb[79].mxu1 }
 0x4ee   : > { %14246 = vst [vmem:[#allocation104_spill] sm:$0xff] %v12769_v61  ;;  %v12777_v10 = vadd.f32 %v9457_v2, %v12393_v41  ;;  %v9465_v13 = vadd.f32 %v12723_v37, %v5027_v32 }
 0x4ef   : > { %14247 = vst [vmem:[#allocation115_spill] sm:$0xff] %v12773_v7  ;;  %v12781_v27 = vadd.f32 %v9463_v47, %v12390_v49 }
 0x4f0   : > { %14248 = vst [vmem:[#allocation112_spill] sm:$0xff] %v12777_v10  ;;  %v12784_v50 = vadd.f32 %v9465_v13, %v12396_v18 }
 0x4f1   : > { %14249 = vst [vmem:[#allocation105_spill] sm:$0xff] %v12781_v27 }
 0x4f2   : > { %14250 = vst [vmem:[#allocation106_spill] sm:$0xff] %v12784_v50 }
 0x506   : > { %v5108_v34 = vpop.f32.mrb[80].mxu0 }
 0x507   : > { %v9467_v30 = vadd.f32 %v12718_v43, %v5108_v34  ;;  %v5110_v11 = vpop.f32.mrb[81].mxu0 }
 0x508   : > { %v5197_v46 = vpop.f32.mrb[80].mxu1  ;;  %v9469_v5 = vadd.f32 %v12718_v43, %v5110_v11 }
 0x509   : > { %v12789_v54 = vadd.f32 %v9467_v30, %v14251_v60  ;;  %v9475_v41 = vadd.f32 %v12718_v43, %v5197_v46  ;;  %v5199_v35 = vpop.f32.mrb[81].mxu1 }
 0x50a   : > { %v12793_v22 = vadd.f32 %v9469_v5, %v14253_v15  ;;  %v9477_v49 = vadd.f32 %v12718_v43, %v5199_v35  ;;  %v5114_v18 = vpop.f32.mrb[82].mxu0 }
 0x50b   : > { %14252 = vst [vmem:[#allocation113_spill] sm:$0xff] %v12789_v54  ;;  %v12797_v38 = vadd.f32 %v9475_v41, %v14255_v31  ;;  %v9471_v19 = vadd.f32 %v12723_v37, %v5114_v18  ;;  %v5116_v29 = vpop.f32.mrb[83].mxu0  ;;  %v5477_v31 = vld [vmem:[%s10995_s5] sm:$0xff] }
 0x50c   : > { %14254 = vst [vmem:[#allocation107_spill] sm:$0xff] %v12793_v22  ;;  %v12801_v6 = vadd.f32 %v9477_v49, %v14257_v56  ;;  %v5203_v25 = vpop.f32.mrb[82].mxu1  ;;  %v9473_v21 = vadd.f32 %v12723_v37, %v5116_v29 }
 0x50d   : > { %14256 = vst [vmem:[#allocation114_spill] sm:$0xff] %v12797_v38  ;;  %v12805_v62 = vadd.f32 %v9471_v19, %v12534_v52  ;;  %v9479_v53 = vadd.f32 %v12723_v37, %v5203_v25  ;;  %v5205_v63 = vpop.f32.mrb[83].mxu1  ;;  %v5479_v25 = vld [vmem:[%s10995_s5 + $0x10] sm:$0xff] }
 0x50e   : > { %14258 = vst [vmem:[#allocation87_spill] sm:$0xff] %v12801_v6  ;;  %v12809_v23 = vadd.f32 %v9473_v21, %v12553_v0  ;;  %v9481_v2 = vadd.f32 %v12723_v37, %v5205_v63  ;;  %v14312_v6 = vld [vmem:[#allocation62_spill] sm:$0xff] }
 0x50f   : > { %14259 = vst [vmem:[#allocation108_spill] sm:$0xff] %v12805_v62  ;;  %v12813_v47 = vadd.f32 %v9479_v53, %v12544_v12  ;;  %v13137_v38 = vadd.f32 %v14312_v6, %v12710_v17 }
 0x510   : > { %14260 = vst [vmem:[#allocation116_spill] sm:$0xff] %v12809_v23  ;;  %v12816_v32 = vadd.f32 %v9481_v2, %v12557_v4  ;;  %v14284_v23 = vld [vmem:[#allocation37_spill] sm:$0xff] }
 0x511   : > { %14261 = vst [vmem:[#allocation109_spill] sm:$0xff] %v12813_v47  ;;  %v14311_v47 = vld [vmem:[#allocation61_spill] sm:$0xff]  ;;  %v8916_v27 = vmul.f32 -1.442695, %v13137_v38 }
 0x512   : > { %14262 = vst [vmem:[#allocation117_spill] sm:$0xff] %v12816_v32  ;;  %v13130_v62 = vadd.f32 %v14311_v47, %v12712_v1 }
 0x514   : > { %v8931_v50 = vmul.f32 -1.442695, %v13130_v62 }
 0x526   : > { %v5286_v13 = vpop.f32.mrb[84].mxu0 }
 0x527   : > { %v9483_v34 = vadd.f32 %v12718_v43, %v5286_v13  ;;  %v5288_v52 = vpop.f32.mrb[85].mxu0 }
 0x528   : > { %v5375_v30 = vpop.f32.mrb[84].mxu1  ;;  %v9485_v11 = vadd.f32 %v12718_v43, %v5288_v52  ;;  %v5481_v52 = vld [vmem:[%s10995_s5 + $0x20] sm:$0xff] }
 0x529   : > { %v12821_v46 = vadd.f32 %v9483_v34, %v12606_v48  ;;  %v9491_v0 = vadd.f32 %v12718_v43, %v5375_v30  ;;  %v5377_v5 = vpop.f32.mrb[85].mxu1 }
 0x52a   : > { %v12825_v12 = vadd.f32 %v9485_v11, %v12620_v9  ;;  %v9493_v4 = vadd.f32 %v12718_v43, %v5377_v5  ;;  %v5292_v60 = vpop.f32.mrb[86].mxu0  ;;  %v14272_v5 = vld [vmem:[#allocation22_spill] sm:$0xff] }
 0x52b   : > { %14263 = vst [vmem:[#allocation110_spill] sm:$0xff] %v12821_v46  ;;  %v12829_v41 = vadd.f32 %v9491_v0, %v12616_v55  ;;  %v9487_v35 = vadd.f32 %v12723_v37, %v5292_v60  ;;  %v5294_v15 = vpop.f32.mrb[87].mxu0  ;;  %v5478_v55 = vld [vmem:[%s10995_s5 + $0x8] sm:$0xff] }
 0x52c   : > { %14264 = vst [vmem:[#allocation118_spill] sm:$0xff] %v12825_v12  ;;  %v12833_v48 = vadd.f32 %v9493_v4, %v12628_v24  ;;  %v5381_v49 = vpop.f32.mrb[86].mxu1  ;;  %v9489_v18 = vadd.f32 %v12723_v37, %v5294_v15  ;;  %v5482_v0 = vld [vmem:[%s10995_s5 + $0x28] sm:$0xff]  ;;  %v14273_v15 = vld [vmem:[#allocation25_spill] sm:$0xff] }
 0x52d   : > { %14265 = vst [vmem:[#allocation111_spill] sm:$0xff] %v12829_v41  ;;  %v12838_v9 = vadd.f32 %v9487_v35, %v12632_v39  ;;  %v9495_v43 = vadd.f32 %v12723_v37, %v5381_v49  ;;  %v5383_v19 = vpop.f32.mrb[87].mxu1  ;;  %v5480_v39 = vld [vmem:[%s10995_s5 + $0x18] sm:$0xff]  ;;  %v5483_v35 = vld [vmem:[%s10995_s5 + $0x30] sm:$0xff] }
 0x52e   : > { %14266 = vst [vmem:[#allocation92_spill] sm:$0xff] %v12833_v48  ;;  %v12843_v29 = vadd.f32 %v9489_v18, %v12641_v45  ;;  %v9497_v56 = vadd.f32 %v12723_v37, %v5383_v19  ;;  %v5612_v24 = vpop.f32.mrb[88].mxu0  ;;  %v14271_v45 = vld [vmem:[#allocation23_spill] sm:$0xff] }
 0x52f   : > { %14267 = vst [vmem:[#allocation90_spill] sm:$0xff] %v12838_v9  ;;  %v12848_v21 = vadd.f32 %v9495_v43, %v12637_v36  ;;  %v5613_v53 = vadd.f32 %v5612_v24, %v5477_v31  ;;  %v5614_v63 = vpop.f32.mrb[89].mxu0  ;;  %v5484_v43 = vld [vmem:[%s10995_s5 + $0x38] sm:$0xff]  ;;  %v14283_v9 = vld [vmem:[#allocation35_spill] sm:$0xff] }
 0x530   : > { %14268 = vst [vmem:[#allocation88_spill] sm:$0xff] %v12843_v29  ;;  %v12852_v2 = vadd.f32 %v9497_v56, %v12644_v20  ;;  %v5683_v13 = vpop.f32.mrb[88].mxu1  ;;  %v5615_v34 = vadd.f32 %v5614_v63, %v5478_v55  ;;  %v14274_v55 = vld [vmem:[#allocation24_spill] sm:$0xff] }
 0x531   : > { %14269 = vst [vmem:[#allocation93_spill] sm:$0xff] %v12848_v21  ;;  %v12856_v30 = vadd.f32 %v5613_v53, %v14271_v45  ;;  %v5684_v37 = vadd.f32 %v5683_v13, %v5479_v25  ;;  %v5685_v11 = vpop.f32.mrb[89].mxu1  ;;  %v5485_v53 = vld [vmem:[%s10995_s5 + $0x40] sm:$0xff]  ;;  %v5486_v45 = vld [vmem:[%s10995_s5 + $0x48] sm:$0xff] }
 0x532   : > { %14270 = vst [vmem:[#allocation119_spill] sm:$0xff] %v12852_v2  ;;  %v12860_v36 = vadd.f32 %v5615_v34, %v14272_v5  ;;  %v5686_v4 = vadd.f32 %v5685_v11, %v5480_v39  ;;  %v5754_v60 = vpop.f32.mrb[90].mxu0  ;;  %v14275_v39 = vld [vmem:[#allocation27_spill] sm:$0xff]  ;;  %v14276_v11 = vld [vmem:[#allocation26_spill] sm:$0xff] }
 0x533   : > { %v9152_v20 = vmul.f32 -1.442695, %v12856_v30  ;;  %v12865_v49 = vadd.f32 %v5684_v37, %v14273_v15  ;;  %v5755_v18 = vadd.f32 %v5754_v60, %v5481_v52  ;;  %v5756_v31 = vpop.f32.mrb[91].mxu0  ;;  %v14277_v15 = vld [vmem:[#allocation29_spill] sm:$0xff] }
 0x534   : > { %v9153_v19 = vmul.f32 -1.442695, %v12860_v36  ;;  %v12870_v56 = vadd.f32 %v5686_v4, %v14274_v55  ;;  %v5825_v24 = vpop.f32.mrb[90].mxu1  ;;  %v5757_v25 = vadd.f32 %v5756_v31, %v5482_v0  ;;  %v5487_v0 = vld [vmem:[%s10995_s5 + $0x50] sm:$0xff] }
 0x535   : > { %10063 = vpow2.f32 %v9152_v20  ;;  %v9154_v63 = vmul.f32 -1.442695, %v12865_v49  ;;  %v12875_v13 = vadd.f32 %v5755_v18, %v14275_v39  ;;  %v5826_v34 = vadd.f32 %v5825_v24, %v5483_v35  ;;  %v5827_v52 = vpop.f32.mrb[91].mxu1  ;;  %v5488_v35 = vld [vmem:[%s10995_s5 + $0x58] sm:$0xff]  ;;  %v14278_v24 = vld [vmem:[#allocation28_spill] sm:$0xff] }
 0x536   : > { %10065 = vpow2.f32 %v9153_v19  ;;  %v9155_v37 = vmul.f32 -1.442695, %v12870_v56  ;;  %v12880_v5 = vadd.f32 %v5757_v25, %v14276_v11  ;;  %v5828_v4 = vadd.f32 %v5827_v52, %v5484_v43  ;;  %v5896_v60 = vpop.f32.mrb[92].mxu0  ;;  %v14279_v52 = vld [vmem:[#allocation32_spill] sm:$0xff] }
 0x537   : > { %10067 = vpow2.f32 %v9154_v63  ;;  %v9156_v20 = vmul.f32 -1.442695, %v12875_v13  ;;  %v12885_v31 = vadd.f32 %v5826_v34, %v14277_v15  ;;  %v5897_v18 = vadd.f32 %v5896_v60, %v5485_v53  ;;  %v5898_v55 = vpop.f32.mrb[93].mxu0 }
 0x538   : > { %10069 = vpow2.f32 %v9155_v37  ;;  %v9157_v19 = vmul.f32 -1.442695, %v12880_v5  ;;  %v12890_v39 = vadd.f32 %v5828_v4, %v14278_v24  ;;  %v5967_v25 = vpop.f32.mrb[92].mxu1  ;;  %v5899_v43 = vadd.f32 %v5898_v55, %v5486_v45  ;;  %v14280_v37 = vld [vmem:[#allocation30_spill] sm:$0xff]  ;;  %v14281_v45 = vld [vmem:[#allocation33_spill] sm:$0xff] }
 0x539   : > { %10071 = vpow2.f32 %v9156_v20  ;;  %v9158_v63 = vmul.f32 -1.442695, %v12885_v31  ;;  %v12894_v11 = vadd.f32 %v5897_v18, %v14279_v52  ;;  %v5968_v34 = vadd.f32 %v5967_v25, %v5487_v0  ;;  %v5969_v15 = vpop.f32.mrb[93].mxu1  ;;  %v5489_v55 = vld [vmem:[%s10995_s5 + $0x60] sm:$0xff]  ;;  %v14282_v18 = vld [vmem:[#allocation31_spill] sm:$0xff] }
 0x53a   : > { %10073 = vpow2.f32 %v9157_v19  ;;  %v9159_v53 = vmul.f32 -1.442695, %v12890_v39  ;;  %v12898_v60 = vadd.f32 %v5899_v43, %v14280_v37  ;;  %v5970_v2 = vadd.f32 %v5969_v15, %v5488_v35  ;;  %v6038_v4 = vpop.f32.mrb[94].mxu0  ;;  %v5491_v37 = vld [vmem:[%s10995_s5 + $0x70] sm:$0xff] }
 0x53b   : > { %10075 = vpow2.f32 %v9158_v63  ;;  %v9160_v24 = vmul.f32 -1.442695, %v12894_v11  ;;  %v12902_v20 = vadd.f32 %v5968_v34, %v14281_v45  ;;  %v6040_v29 = vpop.f32.mrb[95].mxu0  ;;  %v6039_v52 = vadd.f32 %v6038_v4, %v5489_v55 }
 0x53c   : > { %10077 = vpow2.f32 %v9159_v53  ;;  %v9161_v0 = vmul.f32 -1.442695, %v12898_v60  ;;  %v12907_v19 = vadd.f32 %v5970_v2, %v14282_v18  ;;  %v6109_v25 = vpop.f32.mrb[94].mxu1  ;;  %v5490_v18 = vld [vmem:[%s10995_s5 + $0x68] sm:$0xff] }
 0x53d   : > { %10079 = vpow2.f32 %v9160_v24  ;;  %v9162_v35 = vmul.f32 -1.442695, %v12902_v20  ;;  %v6111_v43 = vpop.f32.mrb[95].mxu1  ;;  %v12914_v48 = vadd.f32 %v6039_v52, %v14283_v9  ;;  %v6110_v4 = vadd.f32 %v6109_v25, %v5491_v37  ;;  %v14286_v37 = vld [vmem:[#allocation36_spill] sm:$0xff] }
 0x53e   : > { %10081 = vpow2.f32 %v9161_v0  ;;  %v9163_v63 = vmul.f32 -1.442695, %v12907_v19  ;;  %v5492_v0 = vld [vmem:[%s10995_s5 + $0x78] sm:$0xff]  ;;  %s13861_s5 = scalar_lea.vmem [#allocation10], %s8840_s29  ;;  %s14429_s29 = sld [smem:[#allocation20_spill]] }
 0x53f   : > { %v10064_v34 = vpop.eup %10063  ;;  %10083 = vpow2.f32 %v9162_v35  ;;  %s8667_s3 = sshll.u32 %s13861_s5, 4  ;;  %s13876_s3 = int_to_ptr.vmem [resolvable:$true] %s8667_s3 }
 0x540   : > { %v10066_v15 = vpop.eup %10065  ;;  %v6178_v53 = vadd.f32 1.0, %v10064_v34  ;;  %10085 = vpow2.f32 %v9163_v63  ;;  %v6041_v34 = vadd.f32 %v6040_v29, %v5490_v18  ;;  %s10567_s6 = scalar_lea.vmem %s13876_s3, 1024  ;;  %p10574_p13 = scmp.lt.s32.totalorder %s13876_s3, %s10572_s10 }
 0x541   : > { %v10068_v45 = vpop.eup %10067  ;;  %v6179_v2 = vadd.f32 1.0, %v10066_v15  ;;  %v6112_v15 = vadd.f32 %v6111_v43, %v5492_v0  ;;  %p10568_p9 = scmp.ne.s32.totalorder %s13876_s3, %s10567_s6 }
 0x542   : > { %v10070_v21 = vpop.eup %10069  ;;  %10087 = vrcp.f32 %v6178_v53  ;;  %v6180_v24 = vadd.f32 1.0, %v10068_v45  ;;  %v9164_v45 = vmul.f32 -1.442695, %v12914_v48 }
 0x543   : > { %v10072_v12 = vpop.eup %10071  ;;  %10089 = vrcp.f32 %v6179_v2  ;;  %v6181_v41 = vadd.f32 1.0, %v10070_v21  ;;  %v12919_v2 = vadd.f32 %v6110_v4, %v14284_v23  ;;  %v12925_v18 = vadd.f32 %v6112_v15, %v14286_v37 }
 0x544   : > { %v10074_v55 = vpop.eup %10073  ;;  %10091 = vrcp.f32 %v6180_v24  ;;  %v6182_v35 = vadd.f32 1.0, %v10072_v12  ;;  %v14285_v12 = vld [vmem:[#allocation34_spill] sm:$0xff]  ;;  %p14431_p12 = scmp.ne.s32.totalorder %s14429_s29, 0 }
 0x545   : > { %v10076_v63 = vpop.eup %10075  ;;  %10093 = vrcp.f32 %v6181_v41  ;;  %v6183_v46 = vadd.f32 1.0, %v10074_v55  ;;  %v12922_v29 = vadd.f32 %v6041_v34, %v14285_v12  ;;  %v9166_v23 = vmul.f32 -1.442695, %v12919_v2 }
 0x546   : > { %v10078_v32 = vpop.eup %10077  ;;  %10095 = vrcp.f32 %v6182_v35  ;;  %v6184_v53 = vadd.f32 1.0, %v10076_v63  ;;  %v9167_v35 = vmul.f32 -1.442695, %v12925_v18  ;;  %p10569_p3 = pnand %p10568_p9, %p14431_p12 }
 0x547   : > { %v10080_v9 = vpop.eup %10079  ;;  %10097 = vrcp.f32 %v6183_v46  ;;  %v6185_v52 = vadd.f32 1.0, %v10078_v32  ;;  %v9165_v4 = vmul.f32 -1.442695, %v12922_v29 }
 0x548   : > { %v10082_v21 = vpop.eup %10081  ;;  %10099 = vrcp.f32 %v6184_v53  ;;  %v6186_v25 = vadd.f32 1.0, %v10080_v9  ;;  %p10570_p8 = pneg %p10569_p3 }
 0x549   : > { %v10084_v41 = vpop.eup %10083  ;;  %10101 = vrcp.f32 %v6185_v52  ;;  %v6187_v43 = vadd.f32 1.0, %v10082_v21 }
 0x54a   : > { %v10086_v24 = vpop.eup %10085  ;;  %v6188_v0 = vadd.f32 1.0, %v10084_v41  ;;  %10103 = vpow2.f32 %v9164_v45  ;;  %v12935_v45 = vld [vmem:[%s14287_s2] sm:$0xff] }
 0x54b   : > { %10105 = vrcp.f32 %v6187_v43  ;;  %v6189_v32 = vadd.f32 1.0, %v10086_v24 }
 0x54c   : > { %v10088_v46 = vpop.eup %10087  ;;  %10107 = vrcp.f32 %v6186_v25 }
 0x54d   : > { %v10090_v55 = vpop.eup %10089  ;;  %10109 = vrcp.f32 %v6189_v32  ;;  %v6226_v53 = vmul.f32 %v10088_v46, %v12856_v30 }
 0x54e   : > { %v10092_v34 = vpop.eup %10091  ;;  %10111 = vrcp.f32 %v6188_v0  ;;  %v6227_v63 = vmul.f32 %v10090_v55, %v12860_v36 }
 0x54f   : > { %v10094_v15 = vpop.eup %10093  ;;  %10113 = vpow2.f32 %v9166_v23  ;;  %v6228_v25 = vmul.f32 %v10092_v34, %v12865_v49 }
 0x550   : > { %v10096_v9 = vpop.eup %10095  ;;  %10115 = vpow2.f32 %v9165_v4  ;;  %6262 = vmatprep.subr.mxu0 %v6227_v63  ;;  %v6229_v52 = vmul.f32 %v10094_v15, %v12870_v56  ;;  %v12947_v56 = vld [vmem:[%s14287_s2 + $0x8] sm:$0xff] }
 0x551   : > { %v10098_v21 = vpop.eup %10097  ;;  %10117 = vpow2.f32 %v9167_v35  ;;  %6263 = vmatpush1.msra.mxu0 %v6226_v53  ;;  %v6230_v41 = vmul.f32 %v10096_v9, %v12875_v13 }
 0x552   : > { %v10100_v36 = vpop.eup %10099  ;;  %6339 = vmatprep.subr.mxu1 %v6229_v52  ;;  %9168 = vmatmul.mubr.msk.f32.vlgmr.msra.gmra.mrb[96].mxu0 %vm1623_vm2, %v12935_v45  ;;  %v6231_v30 = vmul.f32 %v10098_v21, %v12880_v5 }
 0x553   : > { %v10102_v12 = vpop.eup %10101  ;;  %6340 = vmatpush1.msra.mxu1 %v6228_v25  ;;  %6332 = vmatprep.mubr.f32.mxu0 %v14143_v57  ;;  %v6232_v5 = vmul.f32 %v10100_v36, %v12885_v31  ;;  %v14291_v36 = vld [vmem:[#allocation41_spill] sm:$0xff] }
 0x554   : > { %v10104_v49 = vpop.eup %10103  ;;  %9170 = vmatmul.mubr.msk.f32.vlgmr.msra.gmra.mrb[96].mxu1 %vm1623_vm2, %v12935_v45  ;;  %6416 = vmatprep.subr.mxu0 %v6231_v30  ;;  %v6233_v43 = vmul.f32 %v10102_v12, %v12890_v39  ;;  %v13018_v30 = vadd.f32 %v14291_v36, %v12710_v17 }
 0x555   : > { %v10106_v37 = vpop.eup %10105  ;;  %6409 = vmatprep.mubr.f32.mxu1 %v14143_v57  ;;  %6417 = vmatpush1.msra.mxu0 %v6230_v41  ;;  %v6190_v32 = vadd.f32 1.0, %v10104_v49  ;;  %v14292_v41 = vld [vmem:[#allocation42_spill] sm:$0xff] }
 0x556   : > { %v10108_v13 = vpop.eup %10107  ;;  %6493 = vmatprep.subr.mxu1 %v6233_v43  ;;  %9169 = vmatmul.mubr.msk.f32.gmra.mrb[98].mxu0 %vm1623_vm2, %v12947_v56  ;;  %v6235_v24 = vmul.f32 %v10106_v37, %v12898_v60  ;;  %v14293_v43 = vld [vmem:[#allocation43_spill] sm:$0xff] }
 0x557   : > { %v10110_v0 = vpop.eup %10109  ;;  %6494 = vmatpush1.msra.mxu1 %v6232_v5  ;;  %6480 = vmatprep.mubr.f32.mxu0 %v14143_v57  ;;  %v6234_v46 = vmul.f32 %v10108_v13, %v12894_v11  ;;  %10119 = vrcp.f32 %v6190_v32  ;;  %v13028_v37 = vadd.f32 %v14293_v43, %v12712_v1  ;;  %v14294_v13 = vld [vmem:[#allocation44_spill] sm:$0xff]  ;;  %v14295_v32 = vld [vmem:[#allocation45_spill] sm:$0xff] }
 0x558   : > { %v10112_v23 = vpop.eup %10111  ;;  %9171 = vmatmul.mubr.msk.f32.gmra.mrb[98].mxu1 %vm1623_vm2, %v12947_v56  ;;  %6570 = vmatprep.subr.mxu0 %v6235_v24  ;;  %v6237_v31 = vmul.f32 %v10110_v0, %v12907_v19  ;;  %v13033_v24 = vadd.f32 %v14294_v13, %v12712_v1  ;;  %v8907_v0 = vmul.f32 -1.442695, %v13018_v30 }
 0x559   : > { %v10114_v39 = vpop.eup %10113  ;;  %6557 = vmatprep.mubr.f32.mxu1 %v14143_v57  ;;  %v6236_v35 = vmul.f32 %v10112_v23, %v12902_v20  ;;  %v13038_v23 = vadd.f32 %v14295_v32, %v12712_v1 }
 0x55a   : > { %v10116_v4 = vpop.eup %10115  ;;  %v6192_v55 = vadd.f32 1.0, %v10114_v39  ;;  %6647 = vmatprep.subr.mxu1 %v6237_v31  ;;  %9172 = vmatmul.mubr.msk.f32.vlgmr.msra.gmra.mrb[100].mxu0 %vm1623_vm2, %v12935_v45  ;;  %v14296_v39 = vld [vmem:[#allocation46_spill] sm:$0xff] }
 0x55b   : > { %v10118_v60 = vpop.eup %10117  ;;  %v6191_v34 = vadd.f32 1.0, %v10116_v4  ;;  %6571 = vmatpush1.msra.mxu0 %v6234_v46  ;;  %6486 = vmatprep.mubr.f32.mxu0 %v14143_v57  ;;  %v13043_v46 = vadd.f32 %v14296_v39, %v12710_v17  ;;  %v8922_v4 = vmul.f32 -1.442695, %v13028_v37 }
 0x55c   : > { %10121 = vrcp.f32 %v6192_v55  ;;  %v6193_v19 = vadd.f32 1.0, %v10118_v60  ;;  %9174 = vmatmul.mubr.msk.f32.vlgmr.msra.gmra.mrb[100].mxu1 %vm1623_vm2, %v12935_v45  ;;  %v8921_v55 = vmul.f32 -1.442695, %v13033_v24  ;;  %v8923_v60 = vmul.f32 -1.442695, %v13038_v23 }
 0x55d   : > { %10123 = vrcp.f32 %v6191_v34  ;;  %6648 = vmatpush1.msra.mxu1 %v6236_v35  ;;  %6563 = vmatprep.mubr.f32.mxu1 %v14143_v57  ;;  %v14297_v35 = vld [vmem:[#allocation47_spill] sm:$0xff] }
 0x55e   : > { %10125 = vrcp.f32 %v6193_v19  ;;  %9173 = vmatmul.mubr.msk.f32.gmra.mrb[102].mxu0 %vm1623_vm2, %v12947_v56  ;;  %v13050_v34 = vadd.f32 %v14297_v35, %v12710_v17  ;;  %v8908_v19 = vmul.f32 -1.442695, %v13043_v46  ;;  %v14301_v35 = vld [vmem:[#allocation51_spill] sm:$0xff] }
 0x55f   : > { %6634 = vmatprep.mubr.f32.mxu0 %v14143_v57 }
 0x560   : > { %9175 = vmatmul.mubr.msk.f32.gmra.mrb[102].mxu1 %vm1623_vm2, %v12947_v56 }
 0x561   : > { %6711 = vmatprep.mubr.f32.mxu1 %v14143_v57  ;;  %v10120_v11 = vpop.eup %10119 }
 0x562   : > { %9176 = vmatmul.mubr.msk.f32.vlgmr.msra.gmra.mrb[104].mxu0 %vm1623_vm2, %v12935_v45  ;;  %v6238_v9 = vmul.f32 %v10120_v11, %v12914_v48  ;;  %v14288_v48 = vld [vmem:[#allocation38_spill] sm:$0xff]  ;;  %v14298_v11 = vld [vmem:[#allocation48_spill] sm:$0xff] }
 0x563   : > { %6640 = vmatprep.mubr.f32.mxu0 %v14143_v57 }
 0x564   : > { %9178 = vmatmul.mubr.msk.f32.vlgmr.msra.gmra.mrb[104].mxu1 %vm1623_vm2, %v12935_v45 }
 0x565   : > { %6717 = vmatprep.mubr.f32.mxu1 %v14143_v57 }
 0x566   : > { %v10122_v20 = vpop.eup %10121  ;;  %9177 = vmatmul.mubr.msk.f32.gmra.mrb[106].mxu0 %vm1623_vm2, %v12947_v56 }
 0x567   : > { %v10124_v63 = vpop.eup %10123  ;;  %6788 = vmatprep.mubr.f32.mxu0 %v14143_v57  ;;  %v6240_v21 = vmul.f32 %v10122_v20, %v12919_v2  ;;  %v13006_v2 = vadd.f32 %v14288_v48, %v12710_v17  ;;  %v13055_v20 = vadd.f32 %v14298_v11, %v12710_v17 }
 0x568   : > { %v10126_v15 = vpop.eup %10125  ;;  %v6239_v53 = vmul.f32 %v10124_v63, %v12922_v29  ;;  %9179 = vmatmul.mubr.msk.f32.gmra.mrb[106].mxu1 %vm1623_vm2, %v12947_v56  ;;  %v14289_v29 = vld [vmem:[#allocation39_spill] sm:$0xff]  ;;  %v14299_v63 = vld [vmem:[#allocation49_spill] sm:$0xff] }
 0x569   : > { %v6241_v52 = vmul.f32 %v10126_v15, %v12925_v18  ;;  %6865 = vmatprep.mubr.f32.mxu1 %v14143_v57  ;;  %v13010_v18 = vadd.f32 %v14289_v29, %v12710_v17  ;;  %v8904_v12 = vmul.f32 -1.442695, %v13006_v2  ;;  %v13059_v15 = vadd.f32 %v14299_v63, %v12710_v17  ;;  %v14302_v63 = vld [vmem:[#allocation52_spill] sm:$0xff] }
 0x56a   : > { %6724 = vmatprep.subr.mxu0 %v6239_v53  ;;  %v14300_v53 = vld [vmem:[#allocation50_spill] sm:$0xff] }
 0x56b   : > { %6801 = vmatprep.subr.mxu1 %v6241_v52  ;;  %6725 = vmatpush1.msra.mxu0 %v6238_v9  ;;  %v8906_v49 = vmul.f32 -1.442695, %v13010_v18  ;;  %10127 = vpow2.f32 %v8904_v12  ;;  %v13063_v9 = vadd.f32 %v14300_v53, %v12712_v1  ;;  %v8910_v52 = vmul.f32 -1.442695, %v13050_v34 }
 0x56c   : > { %6802 = vmatpush1.msra.mxu1 %v6240_v21  ;;  %9180 = vmatmul.mubr.msk.f32.vlgmr.msra.gmra.mrb[108].mxu0 %vm1623_vm2, %v12935_v45  ;;  %v8909_v21 = vmul.f32 -1.442695, %v13055_v20  ;;  %v8911_v48 = vmul.f32 -1.442695, %v13059_v15  ;;  %v13075_v53 = vadd.f32 %v14302_v63, %v12712_v1 }
 0x56d   : > { %9182 = vmatmul.mubr.msk.f32.vlgmr.msra.gmra.mrb[108].mxu1 %vm1623_vm2, %v12935_v45  ;;  %6794 = vmatprep.mubr.f32.mxu0 %v14143_v57  ;;  %v14290_v45 = vld [vmem:[#allocation40_spill] sm:$0xff]  ;;  %10129 = vpow2.f32 %v8906_v49 }
 0x56e   : > { %6871 = vmatprep.mubr.f32.mxu1 %v14143_v57  ;;  %v13014_v25 = vadd.f32 %v14290_v45, %v12710_v17  ;;  %v8924_v45 = vmul.f32 -1.442695, %v13063_v9 }
 0x570   : > { %9181 = vmatmul.mubr.msk.f32.gmra.mrb[110].mxu0 %vm1623_vm2, %v12947_v56  ;;  %v8905_v5 = vmul.f32 -1.442695, %v13014_v25 }
 0x571   : > { %9183 = vmatmul.mubr.msk.f32.gmra.mrb[110].mxu1 %vm1623_vm2, %v12947_v56  ;;  %7386 = vmatprep.mubr.f32.mxu0 %v14143_v57  ;;  %v13023_v56 = vadd.f32 %v14292_v41, %v12712_v1 }
 0x572   : > { %7457 = vmatprep.mubr.f32.mxu1 %v14143_v57  ;;  %10131 = vpow2.f32 %v8905_v5  ;;  %v14313_v57 = vld [vmem:[#allocation63_spill] sm:$0xff] }
 0x573   : > { %v8920_v31 = vmul.f32 -1.442695, %v13023_v56  ;;  %10133 = vpow2.f32 %v8907_v0  ;;  %v13144_v22 = vadd.f32 %v14313_v57, %v12710_v17 }
 0x575   : > { %10135 = vpow2.f32 %v8920_v31  ;;  %v10128_v29 = vpop.eup %10127  ;;  %v8918_v57 = vmul.f32 -1.442695, %v13144_v22 }
 0x576   : > { %10137 = vpow2.f32 %v8922_v4  ;;  %v2342_v49 = vadd.f32 1.0, %v10128_v29 }
 0x577   : > { %10139 = vpow2.f32 %v8921_v55  ;;  %v10130_v36 = vpop.eup %10129 }
 0x578   : > { %10141 = vpow2.f32 %v8923_v60  ;;  %v2344_v5 = vadd.f32 1.0, %v10130_v36 }
 0x579   : > { %10143 = vpow2.f32 %v8908_v19  ;;  %v13071_v19 = vadd.f32 %v14301_v35, %v12712_v1  ;;  %v14306_v35 = vld [vmem:[#allocation56_spill] sm:$0xff] }
 0x57a   : > { %10145 = vpow2.f32 %v8910_v52 }
 0x57b   : > { %10147 = vpow2.f32 %v8909_v21 }
 0x57c   : > { %v10132_v12 = vpop.eup %10131  ;;  %10149 = vpow2.f32 %v8911_v48 }
 0x57d   : > { %v10134_v41 = vpop.eup %10133  ;;  %10151 = vpow2.f32 %v8924_v45  ;;  %v2343_v0 = vadd.f32 1.0, %v10132_v12  ;;  %v8926_v45 = vmul.f32 -1.442695, %v13071_v19  ;;  %v8925_v12 = vmul.f32 -1.442695, %v13075_v53 }
 0x57e   : > { %v2345_v31 = vadd.f32 1.0, %v10134_v41  ;;  %10153 = vrcp.f32 %v2342_v49 }
 0x57f   : > { %v10136_v43 = vpop.eup %10135  ;;  %10155 = vrcp.f32 %v2344_v5 }
 0x580   : > { %v10138_v13 = vpop.eup %10137  ;;  %v2358_v4 = vadd.f32 1.0, %v10136_v43  ;;  %10157 = vrcp.f32 %v2343_v0  ;;  %v14303_v43 = vld [vmem:[#allocation53_spill] sm:$0xff]  ;;  %v14304_v0 = vld [vmem:[#allocation54_spill] sm:$0xff] }
 0x581   : > { %v10140_v32 = vpop.eup %10139  ;;  %v2360_v60 = vadd.f32 1.0, %v10138_v13  ;;  %10159 = vrcp.f32 %v2345_v31  ;;  %v13081_v5 = vadd.f32 %v14303_v43, %v12712_v1  ;;  %v14309_v43 = vld [vmem:[#allocation59_spill] sm:$0xff] }
 0x582   : > { %v10142_v39 = vpop.eup %10141  ;;  %v2359_v11 = vadd.f32 1.0, %v10140_v32  ;;  %10161 = vrcp.f32 %v2358_v4  ;;  %v13085_v32 = vadd.f32 %v14304_v0, %v12710_v17  ;;  %v13116_v0 = vadd.f32 %v14309_v43, %v12712_v1 }
 0x583   : > { %v10144_v55 = vpop.eup %10143  ;;  %v2361_v52 = vadd.f32 1.0, %v10142_v39  ;;  %10163 = vrcp.f32 %v2360_v60  ;;  %v14305_v39 = vld [vmem:[#allocation55_spill] sm:$0xff] }
 0x584   : > { %v10146_v21 = vpop.eup %10145  ;;  %v2346_v48 = vadd.f32 1.0, %v10144_v55  ;;  %10165 = vrcp.f32 %v2359_v11  ;;  %v13089_v4 = vadd.f32 %v14305_v39, %v12710_v17  ;;  %v13095_v11 = vadd.f32 %v14306_v35, %v12710_v17  ;;  %v14310_v35 = vld [vmem:[#allocation60_spill] sm:$0xff] }
 0x585   : > { %v10148_v29 = vpop.eup %10147  ;;  %10167 = vrcp.f32 %v2361_v52  ;;  %v2348_v49 = vadd.f32 1.0, %v10146_v21  ;;  %v8927_v52 = vmul.f32 -1.442695, %v13081_v5  ;;  %v14307_v21 = vld [vmem:[#allocation57_spill] sm:$0xff] }
 0x586   : > { %v10150_v36 = vpop.eup %10149  ;;  %10169 = vrcp.f32 %v2346_v48  ;;  %v2347_v13 = vadd.f32 1.0, %v10148_v29  ;;  %v13102_v48 = vadd.f32 %v14307_v21, %v12710_v17  ;;  %v13123_v21 = vadd.f32 %v14310_v35, %v12712_v1 }
 0x587   : > { %v10152_v41 = vpop.eup %10151  ;;  %v2349_v31 = vadd.f32 1.0, %v10150_v36  ;;  %10171 = vpow2.f32 %v8926_v45  ;;  %v8912_v45 = vmul.f32 -1.442695, %v13085_v32  ;;  %v14308_v36 = vld [vmem:[#allocation58_spill] sm:$0xff] }
 0x588   : > { %v13091_v55 = vpop.eup %10153  ;;  %v2362_v60 = vadd.f32 1.0, %v10152_v41  ;;  %10173 = vpow2.f32 %v8925_v12  ;;  %v13109_v12 = vadd.f32 %v14308_v36, %v12712_v1 }
 0x589   : > { %v13097_v63 = vpop.eup %10155  ;;  %10175 = vrcp.f32 %v2348_v49  ;;  %v8914_v49 = vmul.f32 -1.442695, %v13089_v4 }
 0x58a   : > { %v13104_v29 = vpop.eup %10157  ;;  %10177 = vrcp.f32 %v2347_v13  ;;  %v8913_v13 = vmul.f32 -1.442695, %v13095_v11 }
 0x58b   : > { %v13111_v41 = vpop.eup %10159  ;;  %10179 = vrcp.f32 %v2349_v31  ;;  %v8915_v31 = vmul.f32 -1.442695, %v13102_v48 }
 0x58c   : > { %v13118_v39 = vpop.eup %10161  ;;  %10181 = vrcp.f32 %v2362_v60  ;;  %v8928_v60 = vmul.f32 -1.442695, %v13109_v12 }
 0x58d   : > { %v13125_v36 = vpop.eup %10163  ;;  %10183 = vpow2.f32 %v8927_v52  ;;  %v8930_v52 = vmul.f32 -1.442695, %v13116_v0 }
 0x58e   : > { %v13132_v43 = vpop.eup %10165  ;;  %10185 = vpow2.f32 %v8912_v45  ;;  %v8929_v45 = vmul.f32 -1.442695, %v13123_v21 }
 0x58f   : > { %v13139_v35 = vpop.eup %10167  ;;  %10187 = vpow2.f32 %v8914_v49  ;;  %v14314_v49 = vld [vmem:[#allocation64_spill] sm:$0xff] }
 0x590   : > { %v13146_v47 = vpop.eup %10169  ;;  %10189 = vpow2.f32 %v8913_v13  ;;  %v13153_v10 = vadd.f32 %v14314_v49, %v12710_v17  ;;  %v14315_v13 = vld [vmem:[#allocation65_spill] sm:$0xff] }
 0x591   : > { %v10172_v54 = vpop.eup %10171  ;;  %10191 = vpow2.f32 %v8915_v31  ;;  %v13160_v7 = vadd.f32 %v14315_v13, %v12710_v17 }
 0x592   : > { %v10174_v6 = vpop.eup %10173  ;;  %10193 = vpow2.f32 %v8928_v60  ;;  %v2364_v58 = vadd.f32 1.0, %v10172_v54  ;;  %v14316_v60 = vld [vmem:[#allocation66_spill] sm:$0xff]  ;;  %v8917_v17 = vmul.f32 -1.442695, %v13153_v10  ;;  %v14320_v54 = vld [vmem:[#allocation68_spill] sm:$0xff] }
 0x593   : > { %v13155_v61 = vpop.eup %10175  ;;  %10195 = vpow2.f32 %v8930_v52  ;;  %v13166_v42 = vadd.f32 %v14316_v60, %v12712_v1  ;;  %v2363_v49 = vadd.f32 1.0, %v10174_v6  ;;  %v14318_v52 = vld [vmem:[#allocation67_spill] sm:$0xff]  ;;  %v8919_v60 = vmul.f32 -1.442695, %v13160_v7  ;;  %v14322_v6 = vld [vmem:[#allocation69_spill] sm:$0xff] }
 0x594   : > { %v13162_v31 = vpop.eup %10177  ;;  %10197 = vpow2.f32 %v8929_v45  ;;  %v13172_v16 = vadd.f32 %v14318_v52, %v12712_v1  ;;  %v13179_v45 = vadd.f32 %v14320_v54, %v12712_v1 }
 0x595   : > { %14317 = vst [vmem:[#allocation23_spill] sm:$0xff] %v13166_v42  ;;  %v13168_v28 = vpop.eup %10179  ;;  %10199 = vpow2.f32 %v8931_v50  ;;  %v13184_v50 = vadd.f32 %v14322_v6, %v12712_v1  ;;  %v8932_v52 = vmul.f32 -1.442695, %v13166_v42 }
 0x596   : > { %14319 = vst [vmem:[#allocation22_spill] sm:$0xff] %v13172_v16  ;;  %v13174_v59 = vpop.eup %10181  ;;  %10201 = vpow2.f32 %v8916_v27  ;;  %14321 = vst [vmem:[#allocation25_spill] sm:$0xff] %v13179_v45  ;;  %v8934_v27 = vmul.f32 -1.442695, %v13172_v16  ;;  %v8933_v54 = vmul.f32 -1.442695, %v13179_v45 }
 0x597   : > { %v10184_v13 = vpop.eup %10183  ;;  %10203 = vpow2.f32 %v8918_v57  ;;  %14323 = vst [vmem:[#allocation24_spill] sm:$0xff] %v13184_v50  ;;  %v8935_v57 = vmul.f32 -1.442695, %v13184_v50 }
 0x598   : > { %v10186_v14 = vpop.eup %10185  ;;  %10205 = vrcp.f32 %v2364_v58  ;;  %v2365_v44 = vadd.f32 1.0, %v10184_v13 }
 0x599   : > { %v10188_v51 = vpop.eup %10187  ;;  %10207 = vrcp.f32 %v2363_v49  ;;  %v2350_v6 = vadd.f32 1.0, %v10186_v14 }
 0x59a   : > { %v10190_v33 = vpop.eup %10189  ;;  %10209 = vpow2.f32 %v8917_v17  ;;  %v2352_v8 = vadd.f32 1.0, %v10188_v51 }
 0x59b   : > { %v10192_v3 = vpop.eup %10191  ;;  %10211 = vpow2.f32 %v8919_v60  ;;  %v2351_v26 = vadd.f32 1.0, %v10190_v33 }
 0x59c   : > { %v10194_v40 = vpop.eup %10193  ;;  %10213 = vpow2.f32 %v8932_v52  ;;  %v2353_v17 = vadd.f32 1.0, %v10192_v3 }
 0x59d   : > { %v10196_v1 = vpop.eup %10195  ;;  %10215 = vpow2.f32 %v8934_v27  ;;  %v2366_v60 = vadd.f32 1.0, %v10194_v40 }
 0x59e   : > { %v10198_v58 = vpop.eup %10197  ;;  %10217 = vpow2.f32 %v8933_v54  ;;  %v2368_v50 = vadd.f32 1.0, %v10196_v1 }
 0x59f   : > { %v10200_v49 = vpop.eup %10199  ;;  %10219 = vpow2.f32 %v8935_v57  ;;  %v2367_v52 = vadd.f32 1.0, %v10198_v58 }
 0x5a0   : > { %v10202_v16 = vpop.eup %10201  ;;  %10221 = vrcp.f32 %v2365_v44  ;;  %v2369_v27 = vadd.f32 1.0, %v10200_v49 }
 0x5a1   : > { %v10204_v45 = vpop.eup %10203  ;;  %10223 = vrcp.f32 %v2350_v6  ;;  %v2354_v54 = vadd.f32 1.0, %v10202_v16 }
 0x5a2   : > { %v10206_v42 = vpop.eup %10205  ;;  %10225 = vrcp.f32 %v2352_v8  ;;  %v2356_v57 = vadd.f32 1.0, %v10204_v45  ;;  %v7168_v45 = vlaneseq }
 0x5a3   : > { %v10208_v13 = vpop.eup %10207  ;;  %10227 = vrcp.f32 %v2351_v26 }
 0x5a4   : > { %v10210_v14 = vpop.eup %10209  ;;  %10229 = vrcp.f32 %v2353_v17 }
 0x5a5   : > { %v10212_v51 = vpop.eup %10211  ;;  %10231 = vrcp.f32 %v2366_v60  ;;  %v2355_v3 = vadd.f32 1.0, %v10210_v14 }
 0x5a6   : > { %v10214_v33 = vpop.eup %10213  ;;  %10233 = vrcp.f32 %v2368_v50  ;;  %v2357_v40 = vadd.f32 1.0, %v10212_v51  ;;  %v13192_v51 = vmul.f32 %v13091_v55, %v13006_v2  ;;  %v13212_v2 = vmul.f32 %v13125_v36, %v13028_v37 }
 0x5a7   : > { %v10216_v44 = vpop.eup %10215  ;;  %10235 = vrcp.f32 %v2367_v52  ;;  %v2370_v1 = vadd.f32 1.0, %v10214_v33  ;;  %v13200_v33 = vmul.f32 %v13104_v29, %v13014_v25  ;;  %v13218_v25 = vmul.f32 %v13132_v43, %v13033_v24 }
 0x5a8   : > { %v10218_v6 = vpop.eup %10217  ;;  %10237 = vrcp.f32 %v2369_v27  ;;  %v2372_v58 = vadd.f32 1.0, %v10216_v44  ;;  %v13204_v44 = vmul.f32 %v13111_v41, %v13018_v30  ;;  %v13226_v30 = vmul.f32 %v13146_v47, %v13043_v46 }
 0x5a9   : > { %v10220_v8 = vpop.eup %10219  ;;  %10239 = vrcp.f32 %v2354_v54  ;;  %v2371_v49 = vadd.f32 1.0, %v10218_v6  ;;  %v13196_v54 = vmul.f32 %v13097_v63, %v13010_v18  ;;  %v13214_v18 = vshrl.u32 %v7168_v45, 7 }
 0x5aa   : > { %v10222_v26 = vpop.eup %10221  ;;  %10241 = vrcp.f32 %v2356_v57  ;;  %v2373_v16 = vadd.f32 1.0, %v10220_v8  ;;  %v13222_v63 = vmul.f32 %v13139_v35, %v13038_v23  ;;  %v13234_v29 = vmul.f32 %v13162_v31, %v13055_v20 }
 0x5ab   : > { %v10224_v17 = vpop.eup %10223  ;;  %10243 = vrcp.f32 %v2355_v3  ;;  %v13208_v3 = vmul.f32 %v13118_v39, %v13023_v56  ;;  %14324 = vst [vmem:[#allocation27_spill] sm:$0xff] %v13214_v18  ;;  %v13230_v56 = vmul.f32 %v13155_v61, %v13050_v34  ;;  %v13238_v24 = vmul.f32 %v13168_v28, %v13059_v15  ;;  %v5466_v39 = vld [vmem:[%s858_s23] sm:$0xff] }
 0x5ac   : > { %v10226_v60 = vpop.eup %10225  ;;  %10245 = vrcp.f32 %v2357_v40  ;;  %v13242_v23 = vmul.f32 %v13174_v59, %v13063_v9  ;;  %v13245_v46 = vmul.f32 %v10206_v42, %v13071_v19  ;;  %v13252_v34 = vmul.f32 %v10208_v13, %v13075_v53 }
 0x5ad   : > { %v10228_v50 = vpop.eup %10227  ;;  %10247 = vrcp.f32 %v2370_v1  ;;  %v13255_v20 = vmul.f32 %v10222_v26, %v13081_v5  ;;  %v13258_v28 = vmul.f32 %v10224_v17, %v13085_v32  ;;  %v13261_v59 = vmul.f32 %v10226_v60, %v13089_v4 }
 0x5ae   : > { %v10230_v52 = vpop.eup %10229  ;;  %10249 = vrcp.f32 %v2372_v58  ;;  %v7170_v42 = vsub.s32 0, %v13214_v18  ;;  %v7178_v9 = vsub.s32 2, %v13214_v18  ;;  %v7174_v19 = vsub.s32 1, %v13214_v18 }
 0x5af   : > { %v10232_v14 = vpop.eup %10231  ;;  %10251 = vrcp.f32 %v2371_v49  ;;  %v14020_v41 = vsub.s32 3, %v13214_v18  ;;  %v14019_v5 = vsub.s32 4, %v13214_v18  ;;  %v14018_v36 = vsub.s32 6, %v13214_v18 }
 0x5b0   : > { %v10234_v27 = vpop.eup %10233  ;;  %10253 = vrcp.f32 %v2373_v16  ;;  %v14017_v32 = vsub.s32 5, %v13214_v18  ;;  %v14016_v4 = vsub.s32 7, %v13214_v18  ;;  %v13272_v35 = vmul.f32 %v10228_v50, %v13095_v11 }
 0x5b1   : > { %v10236_v57 = vpop.eup %10235  ;;  %v13275_v47 = vmul.f32 %v10230_v52, %v13102_v48  ;;  %v13278_v31 = vmul.f32 %v10232_v14, %v13109_v12  ;;  %v13281_v13 = vmul.f32 %v10234_v27, %v13116_v0  ;;  %v13295_v48 = vld [vmem:[%s858_s23 + $0x8] sm:$0xff]  ;;  %v13297_v26 = vrot.slane %v5466_v39, %v7170_v42  ;;  %s8653_s23 = scalar_lea.sflag [#allocation4], %s10974_s16 }
 0x5b2   : > { %v10238_v55 = vpop.eup %10237  ;;  %v13284_v40 = vmul.f32 %v10236_v57, %v13123_v21  ;;  %14326 = vst [vmem:[#allocation26_spill] sm:$0xff] %v13295_v48  ;;  %v13299_v0 = vrot.slane %v5466_v39, %v7178_v9  ;;  %v13301_v58 = vrot.slane %v5466_v39, %v7174_v19  ;;  %v13305_v21 = vrot.slane %v5466_v39, %v14020_v41  ;;  %v14338_v27 = vld [vmem:[#allocation23_spill] sm:$0xff] }
 0x5b3   : > { %v10240_v37 = vpop.eup %10239  ;;  %v13287_v8 = vmul.f32 %v10238_v55, %v13130_v62  ;;  %14327 = vst [vmem:[#allocation29_spill] sm:$0xff] %v13297_v26  ;;  %v13317_v17 = vrot.slane %v5466_v39, %v14017_v32  ;;  %v13321_v49 = vrot.slane %v5466_v39, %v14016_v4  ;;  %v13327_v16 = vrot.slane %v13295_v48, %v7170_v42  ;;  %v14339_v55 = vld [vmem:[#allocation22_spill] sm:$0xff]  ;;  %v14341_v42 = vld [vmem:[#allocation25_spill] sm:$0xff] }
 0x5b4   : > { %v10242_v61 = vpop.eup %10241  ;;  %v13290_v1 = vmul.f32 %v10240_v37, %v13137_v38  ;;  %14328 = vst [vmem:[#allocation28_spill] sm:$0xff] %v13299_v0  ;;  %14329 = vst [vmem:[#allocation32_spill] sm:$0xff] %v13301_v58  ;;  %v13309_v38 = vrot.slane %v5466_v39, %v14019_v5  ;;  %v13330_v50 = vrot.slane %v13295_v48, %v7178_v9  ;;  %v14342_v9 = vld [vmem:[#allocation24_spill] sm:$0xff]  ;;  %v14349_v5 = vld [vmem:[#allocation101_spill] sm:$0xff] }
 0x5b5   : > { %v10244_v15 = vpop.eup %10243  ;;  %v13293_v11 = vmul.f32 %v10242_v61, %v13144_v22  ;;  %14330 = vst [vmem:[#allocation30_spill] sm:$0xff] %v13305_v21  ;;  %v13313_v22 = vrot.slane %v5466_v39, %v14018_v36  ;;  %14333 = vst [vmem:[#allocation35_spill] sm:$0xff] %v13317_v17  ;;  %v13333_v45 = vrot.slane %v13295_v48, %v7174_v19  ;;  %v14343_v19 = vld [vmem:[#allocation86_spill] sm:$0xff]  ;;  %v14357_v48 = vld [vmem:[#allocation99_spill] sm:$0xff] }
 0x5b6   : > { %v10246_v53 = vpop.eup %10245  ;;  %14331 = vst [vmem:[#allocation33_spill] sm:$0xff] %v13309_v38  ;;  %14334 = vst [vmem:[#allocation37_spill] sm:$0xff] %v13321_v49  ;;  %v13324_v60 = vmul.f32 %v10244_v15, %v13153_v10  ;;  %v14340_v10 = vld [vmem:[#allocation89_spill] sm:$0xff]  ;;  %v13353_v32 = vmul.f32 %v13297_v26, %v14343_v19  ;;  %v14348_v19 = vld [vmem:[#allocation98_spill] sm:$0xff]  ;;  %v13462_v18 = vmul.f32 %v13309_v38, %v14357_v48 }
 0x5b7   : > { %v10248_v43 = vpop.eup %10247  ;;  %14332 = vst [vmem:[#allocation31_spill] sm:$0xff] %v13313_v22  ;;  %14335 = vst [vmem:[#allocation34_spill] sm:$0xff] %v13327_v16  ;;  %v13336_v14 = vmul.f32 %v10246_v53, %v13160_v7 }
 0x5b8   : > { %v10250_v6 = vpop.eup %10249  ;;  %14336 = vst [vmem:[#allocation36_spill] sm:$0xff] %v13330_v50  ;;  %14337 = vst [vmem:[#allocation38_spill] sm:$0xff] %v13333_v45  ;;  %v13339_v57 = vmul.f32 %v10248_v43, %v14338_v27  ;;  %v14344_v43 = vld [vmem:[#allocation95_spill] sm:$0xff]  ;;  %v14345_v27 = vld [vmem:[#allocation96_spill] sm:$0xff] }
 0x5b9   : > { %v10252_v12 = vpop.eup %10251  ;;  %v13342_v37 = vmul.f32 %v10250_v6, %v14339_v55  ;;  %v13358_v6 = vmul.f32 %v13299_v0, %v14344_v43 }
 0x5ba   : > { %v10254_v62 = vpop.eup %10253  ;;  %v13346_v39 = vmul.f32 %v10252_v12, %v14341_v42  ;;  %v14346_v42 = vld [vmem:[#allocation97_spill] sm:$0xff] }
 0x5bb   : > { %v13349_v4 = vmul.f32 %v10254_v62, %v14342_v9  ;;  %v13370_v9 = vmul.f32 %v13305_v21, %v14346_v42  ;;  %v14350_v42 = vld [vmem:[#allocation91_spill] sm:$0xff] }
 0x5bd   : > { %14347 = vst [vmem:[#allocation39_spill] sm:$0xff] %v13370_v9 }
 0x625   : > { %v6328_v52 = vpop.f32.mrb[96].mxu0 }
 0x626   : > { %v6329_v61 = vadd.f32 %v6328_v52, %v14340_v10  ;;  %v6330_v15 = vpop.f32.mrb[97].mxu0  ;;  %v13362_v52 = vmul.f32 %v13301_v58, %v14345_v27 }
 0x627   : > { %v6405_v7 = vpop.f32.mrb[96].mxu1  ;;  %v6331_v53 = vadd.f32 %v6330_v15, %v14340_v10  ;;  %v13374_v15 = vmul.f32 %v13297_v26, %v14348_v19  ;;  %v14351_v19 = vld [vmem:[#allocation94_spill] sm:$0xff] }
 0x628   : > { %v13365_v12 = vadd.f32 %v6329_v61, %v13192_v51  ;;  %v6406_v62 = vadd.f32 %v6405_v7, %v14340_v10  ;;  %v6407_v55 = vpop.f32.mrb[97].mxu1  ;;  %v13382_v51 = vmul.f32 %v13299_v0, %v14349_v5  ;;  %v13391_v26 = vmul.f32 %v13301_v58, %v14351_v19 }
 0x629   : > { %v13377_v43 = vadd.f32 %v6331_v53, %v13200_v33  ;;  %v6408_v27 = vadd.f32 %v6407_v55, %v14340_v10  ;;  %v6334_v36 = vpop.f32.mrb[98].mxu0 }
 0x62a   : > { %v9184_v61 = vmul.f32 -1.442695, %v13365_v12  ;;  %v13386_v7 = vadd.f32 %v6406_v62, %v13196_v54  ;;  %v6335_v41 = vadd.f32 %v6334_v36, %v14350_v42  ;;  %v6336_v50 = vpop.f32.mrb[99].mxu0 }
 0x62b   : > { %v9185_v33 = vmul.f32 -1.442695, %v13377_v43  ;;  %v13395_v53 = vadd.f32 %v6408_v27, %v13204_v44  ;;  %v6411_v55 = vpop.f32.mrb[98].mxu1  ;;  %v6337_v5 = vadd.f32 %v6336_v50, %v14350_v42 }
 0x62c   : > { %10255 = vpow2.f32 %v9184_v61  ;;  %v9186_v0 = vmul.f32 -1.442695, %v13386_v7  ;;  %v13400_v54 = vadd.f32 %v6335_v41, %v13208_v3  ;;  %v6412_v36 = vadd.f32 %v6411_v55, %v14350_v42  ;;  %v6413_v62 = vpop.f32.mrb[99].mxu1 }
 0x62d   : > { %10257 = vpow2.f32 %v9185_v33  ;;  %v9187_v19 = vmul.f32 -1.442695, %v13395_v53  ;;  %v13405_v58 = vadd.f32 %v6337_v5, %v13218_v25  ;;  %v6414_v44 = vadd.f32 %v6413_v62, %v14350_v42  ;;  %v6482_v27 = vpop.f32.mrb[100].mxu0 }
 0x62e   : > { %10259 = vpow2.f32 %v9186_v0  ;;  %v9200_v50 = vmul.f32 -1.442695, %v13400_v54  ;;  %v13410_v61 = vadd.f32 %v6412_v36, %v13212_v2  ;;  %v6483_v3 = vadd.f32 %v6482_v27, %v14340_v10  ;;  %v6484_v41 = vpop.f32.mrb[101].mxu0 }
 0x62f   : > { %10261 = vpow2.f32 %v9187_v19  ;;  %v9201_v33 = vmul.f32 -1.442695, %v13405_v58  ;;  %v13415_v55 = vadd.f32 %v6414_v44, %v13222_v63  ;;  %v6559_v25 = vpop.f32.mrb[100].mxu1  ;;  %v6485_v5 = vadd.f32 %v6484_v41, %v14340_v10 }
 0x630   : > { %10263 = vpow2.f32 %v9200_v50  ;;  %v9202_v0 = vmul.f32 -1.442695, %v13410_v61  ;;  %v13420_v62 = vadd.f32 %v6483_v3, %v13226_v30  ;;  %v6560_v2 = vadd.f32 %v6559_v25, %v14340_v10  ;;  %v6561_v36 = vpop.f32.mrb[101].mxu1 }
 0x631   : > { %10265 = vpow2.f32 %v9201_v33  ;;  %v9203_v19 = vmul.f32 -1.442695, %v13415_v55  ;;  %v13425_v27 = vadd.f32 %v6485_v5, %v13234_v29  ;;  %v6562_v63 = vadd.f32 %v6561_v36, %v14340_v10  ;;  %v6488_v44 = vpop.f32.mrb[102].mxu0 }
 0x632   : > { %10267 = vpow2.f32 %v9202_v0  ;;  %v9188_v50 = vmul.f32 -1.442695, %v13420_v62  ;;  %v13430_v41 = vadd.f32 %v6560_v2, %v13230_v56  ;;  %v6489_v30 = vadd.f32 %v6488_v44, %v14350_v42  ;;  %v6490_v3 = vpop.f32.mrb[103].mxu0 }
 0x633   : > { %10269 = vpow2.f32 %v9203_v19  ;;  %v9189_v33 = vmul.f32 -1.442695, %v13425_v27  ;;  %v13435_v25 = vadd.f32 %v6562_v63, %v13238_v24  ;;  %v6565_v29 = vpop.f32.mrb[102].mxu1  ;;  %v6491_v5 = vadd.f32 %v6490_v3, %v14350_v42 }
 0x634   : > { %10271 = vpow2.f32 %v9188_v50  ;;  %v9190_v0 = vmul.f32 -1.442695, %v13430_v41  ;;  %v13440_v36 = vadd.f32 %v6489_v30, %v13242_v23  ;;  %v6566_v56 = vadd.f32 %v6565_v29, %v14350_v42  ;;  %v6567_v2 = vpop.f32.mrb[103].mxu1 }
 0x635   : > { %10273 = vpow2.f32 %v9189_v33  ;;  %v9191_v19 = vmul.f32 -1.442695, %v13435_v25  ;;  %v13445_v44 = vadd.f32 %v6491_v5, %v13252_v34  ;;  %v6568_v24 = vadd.f32 %v6567_v2, %v14350_v42  ;;  %v6636_v63 = vpop.f32.mrb[104].mxu0  ;;  %v14354_v33 = vld [vmem:[#allocation102_spill] sm:$0xff] }
 0x636   : > { %v10256_v45 = vpop.eup %10255  ;;  %10275 = vpow2.f32 %v9190_v0  ;;  %v9204_v50 = vmul.f32 -1.442695, %v13440_v36  ;;  %v13450_v3 = vadd.f32 %v6566_v56, %v13245_v46  ;;  %v6637_v23 = vadd.f32 %v6636_v63, %v14340_v10  ;;  %v6638_v30 = vpop.f32.mrb[105].mxu0 }
 0x637   : > { %14352 = vst [vmem:[#allocation40_spill] sm:$0xff] %v13445_v44  ;;  %v10258_v29 = vpop.eup %10257  ;;  %v13455_v16 = vmul.f32 %v13305_v21, %v14354_v33  ;;  %v7006_v34 = vadd.f32 1.0, %v10256_v45  ;;  %10277 = vpow2.f32 %v9191_v19  ;;  %v13458_v5 = vadd.f32 %v6568_v24, %v13255_v20  ;;  %v6713_v2 = vpop.f32.mrb[104].mxu1  ;;  %v14359_v33 = vld [vmem:[#allocation103_spill] sm:$0xff] }
 0x638   : > { %14353 = vst [vmem:[#allocation41_spill] sm:$0xff] %v13450_v3  ;;  %v10260_v0 = vpop.eup %10259  ;;  %v7007_v46 = vadd.f32 1.0, %v10258_v29  ;;  %10279 = vpow2.f32 %v9204_v50  ;;  %v13465_v56 = vadd.f32 %v6637_v23, %v13258_v28  ;;  %v6715_v63 = vpop.f32.mrb[105].mxu1  ;;  %v13469_v45 = vmul.f32 %v13317_v17, %v14359_v33 }
 0x639   : > { %14355 = vst [vmem:[#allocation42_spill] sm:$0xff] %v13455_v16  ;;  %14356 = vst [vmem:[#allocation43_spill] sm:$0xff] %v13458_v5  ;;  %v10262_v49 = vpop.eup %10261  ;;  %10281 = vrcp.f32 %v7006_v34  ;;  %v7008_v20 = vadd.f32 1.0, %v10260_v0  ;;  %v6714_v19 = vadd.f32 %v6713_v2, %v14340_v10  ;;  %v6642_v24 = vpop.f32.mrb[106].mxu0  ;;  %v14360_v16 = vld [vmem:[#allocation100_spill] sm:$0xff]  ;;  %v6639_v28 = vadd.f32 %v6638_v30, %v14340_v10 }
 0x63a   : > { %14358 = vst [vmem:[#allocation44_spill] sm:$0xff] %v13465_v56  ;;  %v10264_v21 = vpop.eup %10263  ;;  %v13474_v48 = vmul.f32 %v13313_v22, %v14360_v16  ;;  %10283 = vrcp.f32 %v7007_v46  ;;  %v7009_v50 = vadd.f32 1.0, %v10262_v49  ;;  %v6644_v23 = vpop.f32.mrb[107].mxu0  ;;  %v6716_v34 = vadd.f32 %v6715_v63, %v14340_v10  ;;  %v14362_v22 = vld [vmem:[#allocation115_spill] sm:$0xff] }
 0x63b   : > { %v10266_v29 = vpop.eup %10265  ;;  %10285 = vrcp.f32 %v7008_v20  ;;  %v7022_v9 = vadd.f32 1.0, %v10264_v21  ;;  %v13478_v33 = vadd.f32 %v6714_v19, %v13261_v59  ;;  %v6719_v2 = vpop.f32.mrb[106].mxu1  ;;  %v13482_v16 = vadd.f32 %v6639_v28, %v13272_v35 }
 0x63c   : > { %v10268_v0 = vpop.eup %10267  ;;  %10287 = vrcp.f32 %v7009_v50  ;;  %v7023_v17 = vadd.f32 1.0, %v10266_v29  ;;  %v6643_v49 = vadd.f32 %v6642_v24, %v14350_v42  ;;  %v6721_v46 = vpop.f32.mrb[107].mxu1  ;;  %v13487_v20 = vmul.f32 %v13309_v38, %v14362_v22 }
 0x63d   : > { %14361 = vst [vmem:[#allocation45_spill] sm:$0xff] %v13482_v16  ;;  %v10270_v30 = vpop.eup %10269  ;;  %10289 = vrcp.f32 %v7022_v9  ;;  %v7024_v59 = vadd.f32 1.0, %v10268_v0  ;;  %v13490_v21 = vadd.f32 %v6716_v34, %v13275_v47  ;;  %v9205_v50 = vmul.f32 -1.442695, %v13445_v44 }
 0x63e   : > { %v10272_v63 = vpop.eup %10271  ;;  %10291 = vrcp.f32 %v7023_v17  ;;  %v7025_v19 = vadd.f32 1.0, %v10270_v30  ;;  %v13494_v35 = vadd.f32 %v6643_v49, %v13278_v31  ;;  %v9206_v29 = vmul.f32 -1.442695, %v13450_v3 }
 0x63f   : > { %14363 = vst [vmem:[#allocation46_spill] sm:$0xff] %v13490_v21  ;;  %v10274_v24 = vpop.eup %10273  ;;  %10293 = vrcp.f32 %v7024_v59  ;;  %v7010_v28 = vadd.f32 1.0, %v10272_v63  ;;  %v6720_v22 = vadd.f32 %v6719_v2, %v14350_v42  ;;  %v6790_v9 = vpop.f32.mrb[108].mxu0  ;;  %v9207_v34 = vmul.f32 -1.442695, %v13458_v5 }
 0x640   : > { %v10276_v0 = vpop.eup %10275  ;;  %10295 = vrcp.f32 %v7025_v19  ;;  %v7011_v47 = vadd.f32 1.0, %v10274_v24  ;;  %v6645_v17 = vadd.f32 %v6644_v23, %v14350_v42  ;;  %v6867_v30 = vpop.f32.mrb[108].mxu1  ;;  %v6722_v59 = vadd.f32 %v6721_v46, %v14350_v42 }
 0x641   : > { %v6792_v38 = vpop.f32.mrb[109].mxu0  ;;  %v10278_v44 = vpop.eup %10277  ;;  %10297 = vrcp.f32 %v7010_v28  ;;  %v7012_v31 = vadd.f32 1.0, %v10276_v0  ;;  %v13501_v49 = vadd.f32 %v6720_v22, %v13281_v13  ;;  %v6791_v24 = vadd.f32 %v6790_v9, %v14340_v10 }
 0x642   : > { %v6869_v63 = vpop.f32.mrb[109].mxu1  ;;  %v10280_v2 = vpop.eup %10279  ;;  %10299 = vrcp.f32 %v7011_v47  ;;  %v7013_v3 = vadd.f32 1.0, %v10278_v44  ;;  %v13505_v19 = vadd.f32 %v6645_v17, %v13284_v40  ;;  %v9192_v28 = vmul.f32 -1.442695, %v13465_v56 }
 0x643   : > { %v10282_v23 = vpop.eup %10281  ;;  %10301 = vrcp.f32 %v7012_v31  ;;  %v7026_v5 = vadd.f32 1.0, %v10280_v2  ;;  %v13510_v0 = vadd.f32 %v6722_v59, %v13287_v8  ;;  %v6796_v13 = vpop.f32.mrb[110].mxu0  ;;  %v9194_v44 = vmul.f32 -1.442695, %v13478_v33 }
 0x644   : > { %v10284_v22 = vpop.eup %10283  ;;  %v7102_v46 = vmul.f32 %v10282_v23, %v13365_v12  ;;  %10303 = vrcp.f32 %v7013_v3  ;;  %v13515_v40 = vadd.f32 %v6791_v24, %v13290_v1  ;;  %v6873_v47 = vpop.f32.mrb[110].mxu1  ;;  %v9193_v31 = vmul.f32 -1.442695, %v13482_v16 }
 0x645   : > { %v6798_v9 = vpop.f32.mrb[111].mxu0  ;;  %v10286_v17 = vpop.eup %10285  ;;  %10305 = vrcp.f32 %v7026_v5  ;;  %v9195_v2 = vmul.f32 -1.442695, %v13490_v21  ;;  %v6868_v8 = vadd.f32 %v6867_v30, %v14340_v10  ;;  %v9208_v1 = vmul.f32 -1.442695, %v13494_v35 }
 0x646   : > { %v6875_v59 = vpop.f32.mrb[111].mxu1  ;;  %v10288_v56 = vpop.eup %10287  ;;  %v13521_v12 = vadd.f32 %v13353_v32, %v7102_v46  ;;  %v7104_v3 = vmul.f32 %v10286_v17, %v13386_v7  ;;  %10307 = vpow2.f32 %v9206_v29  ;;  %v9210_v5 = vmul.f32 -1.442695, %v13501_v49 }
 0x647   : > { %v10290_v24 = vpop.eup %10289  ;;  %10309 = vpow2.f32 %v9205_v50  ;;  %v13527_v23 = vadd.f32 %v6868_v8, %v13293_v11  ;;  %v6793_v21 = vadd.f32 %v6792_v38, %v14340_v10  ;;  %v6870_v7 = vadd.f32 %v6869_v63, %v14340_v10 }
 0x648   : > { %v10292_v30 = vpop.eup %10291  ;;  %v13531_v16 = vadd.f32 %v13358_v6, %v7104_v3  ;;  %v7118_v32 = vmul.f32 %v10290_v24, %v13400_v54  ;;  %10311 = vpow2.f32 %v9207_v34  ;;  %v7103_v46 = vmul.f32 %v10284_v22, %v13377_v43 }
 0x649   : > { %v10294_v29 = vpop.eup %10293  ;;  %10313 = vpow2.f32 %v9192_v28  ;;  %v9209_v50 = vmul.f32 -1.442695, %v13505_v19  ;;  %v13538_v11 = vadd.f32 %v6793_v21, %v13324_v60  ;;  %v13545_v54 = vadd.f32 %v6870_v7, %v13336_v14 }
 0x64a   : > { %v10296_v17 = vpop.eup %10295  ;;  %v13541_v38 = vadd.f32 %v13374_v15, %v7118_v32  ;;  %v7120_v6 = vmul.f32 %v10294_v29, %v13410_v61  ;;  %10315 = vpow2.f32 %v9194_v44  ;;  %v9211_v43 = vmul.f32 -1.442695, %v13510_v0  ;;  %v14366_v29 = vld [vmem:[#allocation37_spill] sm:$0xff] }
 0x64b   : > { %v10298_v10 = vpop.eup %10297  ;;  %10317 = vpow2.f32 %v9193_v31  ;;  %v9196_v34 = vmul.f32 -1.442695, %v13515_v40  ;;  %v6797_v63 = vadd.f32 %v6796_v13, %v14350_v42  ;;  %v7105_v21 = vmul.f32 %v10288_v56, %v13395_v53 }
 0x64c   : > { %v10300_v60 = vpop.eup %10299  ;;  %v13552_v15 = vadd.f32 %v13382_v51, %v7120_v6  ;;  %v7106_v61 = vmul.f32 %v10298_v10, %v13420_v62  ;;  %10319 = vpow2.f32 %v9195_v2  ;;  %v9198_v14 = vmul.f32 -1.442695, %v13527_v23  ;;  %v14367_v6 = vld [vmem:[#allocation42_spill] sm:$0xff] }
 0x64d   : > { %v10302_v28 = vpop.eup %10301  ;;  %10321 = vpow2.f32 %v9208_v1  ;;  %v13557_v22 = vadd.f32 %v6797_v63, %v13339_v57  ;;  %v6874_v44 = vadd.f32 %v6873_v47, %v14350_v42  ;;  %v6799_v51 = vadd.f32 %v6798_v9, %v14350_v42 }
 0x64e   : > { %v10304_v31 = vpop.eup %10303  ;;  %v13561_v13 = vadd.f32 %v13462_v18, %v7106_v61  ;;  %v7108_v53 = vmul.f32 %v10302_v28, %v13430_v41  ;;  %10323 = vpow2.f32 %v9210_v5  ;;  %v7119_v56 = vmul.f32 %v10292_v30, %v13405_v58 }
 0x64f   : > { %v10306_v62 = vpop.eup %10305  ;;  %v7121_v2 = vmul.f32 %v10296_v17, %v13415_v55  ;;  %10325 = vpow2.f32 %v9209_v50  ;;  %v13568_v57 = vadd.f32 %v6874_v44, %v13342_v37  ;;  %v13575_v41 = vadd.f32 %v6799_v51, %v13346_v39 }
 0x650   : > { %v10308_v8 = vpop.eup %10307  ;;  %v13571_v47 = vadd.f32 %v13474_v48, %v7108_v53  ;;  %v7122_v18 = vmul.f32 %v10306_v62, %v13440_v36  ;;  %10327 = vpow2.f32 %v9211_v43  ;;  %v7107_v3 = vmul.f32 %v10300_v60, %v13425_v27  ;;  %v14372_v62 = vld [vmem:[#allocation112_spill] sm:$0xff] }
 0x651   : > { %v10310_v9 = vpop.eup %10309  ;;  %v7028_v58 = vadd.f32 1.0, %v10308_v8  ;;  %10329 = vpow2.f32 %v9196_v34  ;;  %v6876_v55 = vadd.f32 %v6875_v59, %v14350_v42  ;;  %v7109_v37 = vmul.f32 %v10304_v31, %v13435_v25  ;;  %v14364_v59 = vld [vmem:[#allocation39_spill] sm:$0xff] }
 0x652   : > { %v10312_v1 = vpop.eup %10311  ;;  %v13581_v24 = vadd.f32 %v13487_v20, %v7122_v18  ;;  %v7027_v48 = vadd.f32 1.0, %v10310_v9  ;;  %10331 = vpow2.f32 %v9198_v14  ;;  %v7281_v27 = vadd.f32 %v13362_v52, %v7103_v46  ;;  %v14365_v20 = vld [vmem:[#allocation104_spill] sm:$0xff]  ;;  %v14368_v31 = vld [vmem:[#allocation27_spill] sm:$0xff] }
 0x653   : > { %v10314_v36 = vpop.eup %10313  ;;  %10333 = vrcp.f32 %v7028_v58  ;;  %v7029_v5 = vadd.f32 1.0, %v10312_v1  ;;  %v13584_v39 = vadd.f32 %v6876_v55, %v13349_v4  ;;  %v7297_v42 = vadd.f32 %v13391_v26, %v7119_v56  ;;  %v14373_v56 = vld [vmem:[#allocation35_spill] sm:$0xff]  ;;  %v14375_v58 = vld [vmem:[#allocation105_spill] sm:$0xff] }
 0x654   : > { %v10316_v30 = vpop.eup %10315  ;;  %10335 = vrcp.f32 %v7027_v48  ;;  %v7014_v32 = vadd.f32 1.0, %v10314_v36  ;;  %v7283_v25 = vadd.f32 %v14364_v59, %v7105_v21  ;;  %v7255_v50 = vmul.f32 %v14366_v29, %v14365_v20  ;;  %v14376_v55 = vld [vmem:[#allocation31_spill] sm:$0xff]  ;;  %v14381_v20 = vld [vmem:[#allocation38_spill] sm:$0xff] }
 0x655   : > { %v10318_v7 = vpop.eup %10317  ;;  %10337 = vrcp.f32 %v7029_v5  ;;  %v7016_v17 = vadd.f32 1.0, %v10316_v30  ;;  %v7299_v10 = vadd.f32 %v14367_v6, %v7121_v2  ;;  %v9402_v34 = vpack.c.bf16 %v7297_v42, %v7281_v27  ;;  %v14378_v27 = vld [vmem:[#allocation113_spill] sm:$0xff]  ;;  %v14379_v30 = vld [vmem:[#allocation34_spill] sm:$0xff] }
 0x656   : > { %v10320_v43 = vpop.eup %10319  ;;  %10339 = vrcp.f32 %v7014_v32  ;;  %v7015_v4 = vadd.f32 1.0, %v10318_v7  ;;  %v9404_v52 = vpack.c.bf16 %v13541_v38, %v13521_v12  ;;  %v9408_v60 = vpack.c.bf16 %v13552_v15, %v13531_v16  ;;  %v14370_v12 = vld [vmem:[#allocation26_spill] sm:$0xff]  ;;  %v14380_v7 = vld [vmem:[#allocation107_spill] sm:$0xff] }
 0x657   : > { %v10322_v46 = vpop.eup %10321  ;;  %10341 = vrcp.f32 %v7016_v17  ;;  %v7017_v26 = vadd.f32 1.0, %v10320_v43  ;;  %v9406_v63 = vpack.c.bf16 %v7299_v10, %v7283_v25  ;;  %9403 = vmatprep.subr.bf16.mxu0 %v9402_v34  ;;  %v13597_v28 = vadd.f32 %v13469_v45, %v7107_v3  ;;  %v13609_v16 = vld [vmem:[%s14371_s13] sm:$0xff]  ;;  %v14384_v34 = vld [vmem:[#allocation36_spill] sm:$0xff]  ;;  %s10573_s13 = scalar_lea.vmem %s10572_s10, 2048 }
 0x658   : > { %v10324_v21 = vpop.eup %10323  ;;  %10343 = vrcp.f32 %v7015_v4  ;;  %v7030_v61 = vadd.f32 1.0, %v10322_v46  ;;  %v13599_v14 = vadd.f32 %v7255_v50, %v7109_v37  ;;  %v14369_v53 = vsub.s32 3, %v14368_v31  ;;  %9405 = vmatpush1.bf16.msra.mxu0 %v9404_v52  ;;  %v14377_v37 = vld [vmem:[#allocation106_spill] sm:$0xff]  ;;  %v14385_v46 = vld [vmem:[#allocation41_spill] sm:$0xff]  ;;  %p10575_p11 = scmp.lt.s32.totalorder %s10573_s13, %s10567_s6 }
 0x659   : > { %v10326_v44 = vpop.eup %10325  ;;  %10345 = vrcp.f32 %v7017_v26  ;;  %v7032_v51 = vadd.f32 1.0, %v10324_v21  ;;  %9407 = vmatprep.subr.bf16.mxu1 %v9406_v63  ;;  %v9412_v45 = vpack.c.bf16 %v13581_v24, %v13561_v13  ;;  %v7269_v2 = vmul.f32 %v14373_v56, %v14372_v62  ;;  %v14383_v4 = vld [vmem:[#allocation114_spill] sm:$0xff]  ;;  %v14386_v21 = vld [vmem:[#allocation87_spill] sm:$0xff] }
 0x65a   : > { %v13604_v38 = vrot.slane %v14370_v12, %v14369_v53  ;;  %v10328_v15 = vpop.eup %10327  ;;  %v14374_v8 = vsub.s32 4, %v14368_v31  ;;  %10347 = vrcp.f32 %v7030_v61  ;;  %v7031_v9 = vadd.f32 1.0, %v10326_v44  ;;  %9409 = vmatpush1.bf16.msra.mxu1 %v9408_v60  ;;  %v14387_v44 = vld [vmem:[#allocation40_spill] sm:$0xff]  ;;  %v14397_v13 = vld [vmem:[#allocation110_spill] sm:$0xff]  ;;  %p10576_p0 = por %p10575_p11, %p10574_p13 }
 0x65b   : > { %v10330_v3 = vpop.eup %10329  ;;  %v7270_v1 = vmul.f32 %v14376_v55, %v14375_v58  ;;  %v7271_v48 = vmul.f32 %v14366_v29, %v14377_v37  ;;  %10349 = vrcp.f32 %v7032_v51  ;;  %v7033_v36 = vadd.f32 1.0, %v10328_v15  ;;  %9216 = vmatmul.mubr.msk.f32.vlgmr.msra.gmra.mrb[112].mxu0 %vm3460_vm7, %v13609_v16  ;;  %v14389_v37 = vld [vmem:[#allocation44_spill] sm:$0xff] }
 0x65c   : > { %v13618_v18 = vrot.slane %v14370_v12, %v14374_v8  ;;  %v10332_v5 = vpop.eup %10331  ;;  %v7256_v32 = vmul.f32 %v14379_v30, %v14378_v27  ;;  %10351 = vrcp.f32 %v7031_v9  ;;  %v7018_v42 = vadd.f32 1.0, %v10330_v3  ;;  %v14388_v8 = vld [vmem:[#allocation43_spill] sm:$0xff]  ;;  %p10577_p10 = pnand %p10576_p0, %p10570_p8 }
 0x65d   : > { %v9197_v59 = vmul.f32 -1.442695, %v13538_v11  ;;  %v10334_v25 = vpop.eup %10333  ;;  %v7257_v50 = vmul.f32 %v14381_v20, %v14380_v7  ;;  %10353 = vrcp.f32 %v7033_v36  ;;  %v7020_v17 = vadd.f32 1.0, %v10332_v5  ;;  %9217 = vmatmul.mubr.msk.f32.vlgmr.msra.gmra.mrb[112].mxu1 %vm3460_vm7, %v13609_v16 }
 0x65e   : > { %v9199_v6 = vmul.f32 -1.442695, %v13545_v54  ;;  %v14382_v10 = vmov 0.0   ;;  %v10336_v43 = vpop.eup %10335  ;;  %v7258_v52 = vmul.f32 %v14384_v34, %v14383_v4  ;;  %v7124_v26 = vmul.f32 %v10334_v25, %v14385_v46  ;;  %v14390_v4 = vld [vmem:[#allocation45_spill] sm:$0xff] }
 0x65f   : > { %7528 = vmatprep.mubr.f32.mxu0 %v14382_v10  ;;  %10355 = vrcp.f32 %v7018_v42  ;;  %v9212_v63 = vmul.f32 -1.442695, %v13557_v22  ;;  %7599 = vmatprep.mubr.f32.mxu1 %v14382_v10  ;;  %v10338_v60 = vpop.eup %10337  ;;  %v7259_v61 = vmul.f32 %v13604_v38, %v14386_v21  ;;  %v7123_v53 = vmul.f32 %v10336_v43, %v14387_v44 }
 0x660   : > { %10357 = vrcp.f32 %v7020_v17  ;;  %v9214_v51 = vmul.f32 -1.442695, %v13568_v57  ;;  %v10340_v15 = vpop.eup %10339  ;;  %v7302_v62 = vadd.f32 %v7270_v1, %v7124_v26  ;;  %v7125_v9 = vmul.f32 %v10338_v60, %v14388_v8 }
 0x661   : > { %10359 = vpow2.f32 %v9197_v59  ;;  %v9213_v3 = vmul.f32 -1.442695, %v13575_v41  ;;  %v10342_v58 = vpop.eup %10341  ;;  %v7110_v36 = vmul.f32 %v10340_v15, %v14389_v37  ;;  %v9215_v5 = vmul.f32 -1.442695, %v13584_v39  ;;  %v14394_v15 = vld [vmem:[#allocation116_spill] sm:$0xff] }
 0x662   : > { %10361 = vpow2.f32 %v9199_v6  ;;  %v7301_v27 = vadd.f32 %v7269_v2, %v7123_v53  ;;  %v10344_v42 = vpop.eup %10343  ;;  %v7112_v25 = vmul.f32 %v10342_v58, %v13478_v33  ;;  %v7303_v7 = vadd.f32 %v7271_v48, %v7125_v9  ;;  %v14391_v6 = vld [vmem:[#allocation46_spill] sm:$0xff]  ;;  %v14392_v33 = vld [vmem:[#allocation108_spill] sm:$0xff]  ;;  %v14393_v53 = vld [vmem:[#allocation109_spill] sm:$0xff] }
 0x663   : > { %10363 = vpow2.f32 %v9212_v63  ;;  %v9416_v17 = vpack.c.bf16 %v7302_v62, %v13571_v47  ;;  %v10346_v1 = vpop.eup %10345  ;;  %v7288_v43 = vadd.f32 %v7256_v32, %v7110_v36  ;;  %v7111_v59 = vmul.f32 %v10344_v42, %v14390_v4  ;;  %v14398_v36 = vld [vmem:[#allocation111_spill] sm:$0xff] }
 0x664   : > { %10365 = vpow2.f32 %v9214_v51  ;;  %v9410_v46 = vpack.c.bf16 %v7301_v27, %v13597_v28  ;;  %v10348_v26 = vpop.eup %10347  ;;  %v7290_v60 = vadd.f32 %v7258_v52, %v7112_v25  ;;  %v7113_v21 = vmul.f32 %v10346_v1, %v14391_v6 }
 0x665   : > { %10367 = vpow2.f32 %v9213_v3  ;;  %v9414_v2 = vpack.c.bf16 %v7303_v7, %v13599_v14  ;;  %v10350_v44 = vpop.eup %10349  ;;  %v7272_v48 = vmul.f32 %v14379_v30, %v14392_v33  ;;  %v7126_v47 = vmul.f32 %v10348_v26, %v13494_v35  ;;  %v14396_v3 = vld [vmem:[#allocation117_spill] sm:$0xff] }
 0x666   : > { %10369 = vpow2.f32 %v9215_v5  ;;  %9411 = vmatprep.subr.bf16.mxu0 %v9410_v46  ;;  %v7289_v32 = vadd.f32 %v7257_v50, %v7111_v59  ;;  %v10352_v63 = vpop.eup %10351  ;;  %v7274_v28 = vmul.f32 %v14384_v34, %v14393_v53  ;;  %v7128_v52 = vmul.f32 %v10350_v44, %v13501_v49 }
 0x667   : > { %9415 = vmatprep.subr.bf16.mxu1 %v9414_v2  ;;  %9413 = vmatpush1.bf16.msra.mxu0 %v9412_v45  ;;  %v7291_v14 = vadd.f32 %v7259_v61, %v7113_v21  ;;  %v10354_v51 = vpop.eup %10353  ;;  %v7273_v62 = vmul.f32 %v14381_v20, %v14394_v15  ;;  %v14395_v35 = vsub.s32 6, %v14368_v31  ;;  %v7304_v8 = vadd.f32 %v7272_v48, %v7126_v47 }
 0x668   : > { %v7127_v9 = vmul.f32 %v10352_v63, %v13505_v19  ;;  %9417 = vmatpush1.bf16.msra.mxu1 %v9416_v17  ;;  %v7275_v58 = vmul.f32 %v13604_v38, %v14396_v3  ;;  %v7260_v24 = vmul.f32 %v13618_v18, %v14397_v13  ;;  %v7306_v45 = vadd.f32 %v7274_v28, %v7128_v52  ;;  %v14403_v3 = vld [vmem:[#allocation90_spill] sm:$0xff] }
 0x669   : > { %v13668_v50 = vrot.slane %v14370_v12, %v14395_v35  ;;  %v10356_v49 = vpop.eup %10355  ;;  %v7129_v61 = vmul.f32 %v10354_v51, %v13510_v0  ;;  %v9420_v42 = vpack.c.bf16 %v7304_v8, %v7288_v43  ;;  %v14399_v47 = vsub.s32 5, %v14368_v31  ;;  %v14402_v35 = vld [vmem:[#allocation92_spill] sm:$0xff] }
 0x66a   : > { %v10358_v37 = vpop.eup %10357  ;;  %v7114_v27 = vmul.f32 %v10356_v49, %v13515_v40  ;;  %9218 = vmatmul.mubr.msk.f32.vlgmr.msra.gmra.mrb[114].mxu0 %vm3460_vm7, %v13609_v16  ;;  %v7305_v19 = vadd.f32 %v7273_v62, %v7127_v9  ;;  %v9424_v1 = vpack.c.bf16 %v7306_v45, %v7290_v60  ;;  %v14400_v53 = vsub.s32 7, %v14368_v31 }
 0x66b   : > { %v7262_v5 = vmul.f32 %v13668_v50, %v14398_v36  ;;  %v10360_v25 = vpop.eup %10359  ;;  %v7116_v7 = vmul.f32 %v10358_v37, %v13527_v23  ;;  %9219 = vmatmul.mubr.msk.f32.vlgmr.msra.gmra.mrb[114].mxu1 %vm3460_vm7, %v13609_v16  ;;  %v7307_v17 = vadd.f32 %v7275_v58, %v7129_v61  ;;  %7670 = vmatprep.mubr.f32.mxu0 %v14382_v10  ;;  %v14405_v36 = vld [vmem:[#allocation88_spill] sm:$0xff] }
 0x66c   : > { %v10362_v0 = vpop.eup %10361  ;;  %v7292_v4 = vadd.f32 %v7260_v24, %v7114_v27  ;;  %v7019_v59 = vadd.f32 1.0, %v10360_v25  ;;  %v9418_v46 = vpack.c.bf16 %v7305_v19, %v7289_v32  ;;  %7741 = vmatprep.mubr.f32.mxu1 %v14382_v10  ;;  %v13695_v32 = vrot.slane %v14370_v12, %v14399_v47  ;;  %v14404_v24 = vld [vmem:[#allocation93_spill] sm:$0xff]  ;;  %v14406_v19 = vld [vmem:[#allocation119_spill] sm:$0xff] }
 0x66d   : > { %v10364_v40 = vpop.eup %10363  ;;  %v7294_v26 = vadd.f32 %v7262_v5, %v7116_v7  ;;  %v7021_v6 = vadd.f32 1.0, %v10362_v0  ;;  %v9422_v43 = vpack.c.bf16 %v7307_v17, %v7291_v14  ;;  %v13700_v28 = vrot.slane %v14370_v12, %v14400_v53  ;;  %v14401_v14 = vld [vmem:[#allocation118_spill] sm:$0xff] }
 0x66e   : > { %v10366_v21 = vpop.eup %10365  ;;  %10371 = vrcp.f32 %v7019_v59  ;;  %v7034_v23 = vadd.f32 1.0, %v10364_v40  ;;  %9419 = vmatprep.subr.bf16.mxu0 %v9418_v46  ;;  %v7261_v51 = vmul.f32 %v13695_v32, %v14401_v14  ;;  %v7276_v58 = vmul.f32 %v13618_v18, %v14403_v3 }
 0x66f   : > { %v10368_v2 = vpop.eup %10367  ;;  %10373 = vrcp.f32 %v7021_v6  ;;  %v7036_v44 = vadd.f32 1.0, %v10366_v21  ;;  %9423 = vmatprep.subr.bf16.mxu1 %v9422_v43  ;;  %9421 = vmatpush1.bf16.msra.mxu0 %v9420_v42  ;;  %v7263_v8 = vmul.f32 %v13700_v28, %v14402_v35  ;;  %v7278_v45 = vmul.f32 %v13668_v50, %v14404_v24 }
 0x670   : > { %v10370_v60 = vpop.eup %10369  ;;  %10375 = vrcp.f32 %v7034_v23  ;;  %v7035_v33 = vadd.f32 1.0, %v10368_v2  ;;  %9425 = vmatpush1.bf16.msra.mxu1 %v9424_v1  ;;  %v7277_v5 = vmul.f32 %v13695_v32, %v14405_v36  ;;  %v7279_v42 = vmul.f32 %v13700_v28, %v14406_v19 }
 0x671   : > { %10377 = vrcp.f32 %v7036_v44  ;;  %v7037_v48 = vadd.f32 1.0, %v10370_v60 }
 0x672   : > { %10379 = vrcp.f32 %v7035_v33  ;;  %9220 = vmatmul.mubr.msk.f32.vlgmr.msra.gmra.mrb[116].mxu0 %vm3460_vm7, %v13609_v16 }
 0x673   : > { %10381 = vrcp.f32 %v7037_v48  ;;  %9221 = vmatmul.mubr.msk.f32.vlgmr.msra.gmra.mrb[116].mxu1 %vm3460_vm7, %v13609_v16  ;;  %7812 = vmatprep.mubr.f32.mxu0 %v14382_v10 }
 0x674   : > { %7883 = vmatprep.mubr.f32.mxu1 %v14382_v10 }
 0x678   : > { %v10372_v63 = vpop.eup %10371 }
 0x679   : > { %v10374_v52 = vpop.eup %10373  ;;  %v7115_v15 = vmul.f32 %v10372_v63, %v13538_v11 }
 0x67a   : > { %v10376_v62 = vpop.eup %10375  ;;  %v7117_v9 = vmul.f32 %v10374_v52, %v13545_v54 }
 0x67b   : > { %v10378_v49 = vpop.eup %10377  ;;  %v7130_v31 = vmul.f32 %v10376_v62, %v13557_v22  ;;  %v7293_v12 = vadd.f32 %v7261_v51, %v7115_v15 }
 0x67c   : > { %v10380_v13 = vpop.eup %10379  ;;  %v7132_v61 = vmul.f32 %v10378_v49, %v13568_v57  ;;  %v7295_v11 = vadd.f32 %v7263_v8, %v7117_v9 }
 0x67d   : > { %v10382_v37 = vpop.eup %10381  ;;  %v7308_v27 = vadd.f32 %v7276_v58, %v7130_v31  ;;  %v7131_v54 = vmul.f32 %v10380_v13, %v13575_v41  ;;  %v13726_v41 = vpop.permute.xlu1 %7316 }
 0x67e   : > { %v7310_v25 = vadd.f32 %v7278_v45, %v7132_v61  ;;  %v7133_v22 = vmul.f32 %v10382_v37, %v13584_v39 }
 0x67f   : > { %v7309_v7 = vadd.f32 %v7277_v5, %v7131_v54  ;;  %v9428_v17 = vpack.c.bf16 %v7308_v27, %v7292_v4 }
 0x680   : > { %v7311_v1 = vadd.f32 %v7279_v42, %v7133_v22  ;;  %v9432_v0 = vpack.c.bf16 %v7310_v25, %v7294_v26 }
 0x681   : > { %v9426_v59 = vpack.c.bf16 %v7309_v7, %v7293_v12 }
 0x682   : > { %v9430_v57 = vpack.c.bf16 %v7311_v1, %v7295_v11  ;;  %v14407_v1 = vld [vmem:[#allocation70_spill] sm:$0xff] }
 0x683   : > { %9427 = vmatprep.subr.bf16.mxu0 %v9426_v59 }
 0x684   : > { %9431 = vmatprep.subr.bf16.mxu1 %v9430_v57  ;;  %9429 = vmatpush1.bf16.msra.mxu0 %v9428_v17 }
 0x685   : > { %9433 = vmatpush1.bf16.msra.mxu1 %v9432_v0  ;;  %v14408_v0 = vld [vmem:[#allocation29_spill] sm:$0xff] }
 0x686   : > { %v8002_v59 = vmul.f32 %v14408_v0, %v14407_v1 }
 0x687   : > { %9222 = vmatmul.mubr.msk.f32.vlgmr.msra.gmra.mrb[118].mxu0 %vm3460_vm7, %v13609_v16 }
 0x688   : > { %9223 = vmatmul.mubr.msk.f32.vlgmr.msra.gmra.mrb[118].mxu1 %vm3460_vm7, %v13609_v16  ;;  %8108 = vmatprep.mubr.f32.mxu0 %v14382_v10 }
 0x689   : > { %8179 = vmatprep.mubr.f32.mxu1 %v14382_v10 }
 0x72e   : > { %v7388_v39 = vpop.f32.mrb[112].mxu0 }
 0x72f   : > { %v7389_v4 = vadd.f32 %v7388_v39, %v13726_v41  ;;  %v7390_v40 = vpop.f32.mrb[113].mxu0 }
 0x730   : > { %v7459_v46 = vpop.f32.mrb[112].mxu1  ;;  %v13731_v6 = vadd.f32 %v7390_v40, %v13726_v41  ;;  %v14410_v40 = vld [vmem:[#allocation28_spill] sm:$0xff] }
 0x731   : > { %v7460_v26 = vadd.f32 %v7459_v46, %v13726_v41  ;;  %v7461_v43 = vpop.f32.mrb[113].mxu1  ;;  %v9224_v21 = vmul.f32 -1.442695, %v7389_v4  ;;  %v14409_v46 = vld [vmem:[#allocation71_spill] sm:$0xff] }
 0x732   : > { %v13734_v16 = vadd.f32 %v7461_v43, %v13726_v41  ;;  %v9225_v2 = vmul.f32 -1.442695, %v13731_v6  ;;  %v8004_v43 = vmul.f32 %v14410_v40, %v14409_v46 }
 0x733   : > { %v9226_v23 = vmul.f32 -1.442695, %v7460_v26  ;;  %10383 = vpow2.f32 %v9224_v21 }
 0x734   : > { %v9227_v44 = vmul.f32 -1.442695, %v13734_v16 }
 0x735   : > { %10385 = vpow2.f32 %v9226_v23 }
 0x736   : > { %10387 = vpow2.f32 %v9225_v2 }
 0x737   : > { %10389 = vpow2.f32 %v9227_v44  ;;  %v14411_v44 = vld [vmem:[#allocation72_spill] sm:$0xff] }
 0x73d   : > { %v7530_v60 = vpop.f32.mrb[114].mxu0  ;;  %v10384_v63 = vpop.eup %10383 }
 0x73e   : > { %v13739_v33 = vadd.f32 %v7530_v60, %v13726_v41  ;;  %v7601_v48 = vpop.f32.mrb[114].mxu1  ;;  %v7532_v47 = vpop.f32.mrb[115].mxu0  ;;  %v7938_v51 = vadd.f32 1.0, %v10384_v63  ;;  %v14412_v60 = vld [vmem:[#allocation32_spill] sm:$0xff] }
 0x73f   : > { %v13742_v53 = vadd.f32 %v7601_v48, %v13726_v41  ;;  %v7603_v52 = vpop.f32.mrb[115].mxu1  ;;  %v10386_v14 = vpop.eup %10385  ;;  %v13745_v15 = vadd.f32 %v7532_v47, %v13726_v41  ;;  %v8003_v48 = vmul.f32 %v14412_v60, %v14411_v44 }
 0x740   : > { %v10388_v62 = vpop.eup %10387  ;;  %v7940_v35 = vadd.f32 1.0, %v10386_v14  ;;  %v13748_v8 = vadd.f32 %v7603_v52, %v13726_v41  ;;  %10391 = vrcp.f32 %v7938_v51  ;;  %v9228_v3 = vmul.f32 -1.442695, %v13739_v33  ;;  %v14413_v52 = vld [vmem:[#allocation73_spill] sm:$0xff]  ;;  %v14414_v14 = vld [vmem:[#allocation30_spill] sm:$0xff] }
 0x741   : > { %v10390_v9 = vpop.eup %10389  ;;  %v7939_v49 = vadd.f32 1.0, %v10388_v62  ;;  %v9230_v31 = vmul.f32 -1.442695, %v13742_v53  ;;  %v9229_v12 = vmul.f32 -1.442695, %v13745_v15  ;;  %v8005_v51 = vmul.f32 %v14414_v14, %v14413_v52  ;;  %v14419_v14 = vld [vmem:[#allocation76_spill] sm:$0xff] }
 0x742   : > { %10393 = vrcp.f32 %v7940_v35  ;;  %v7941_v58 = vadd.f32 1.0, %v10390_v9  ;;  %v9231_v13 = vmul.f32 -1.442695, %v13748_v8 }
 0x743   : > { %10395 = vrcp.f32 %v7939_v49 }
 0x744   : > { %10397 = vrcp.f32 %v7941_v58 }
 0x745   : > { %v7672_v24 = vpop.f32.mrb[116].mxu0  ;;  %10399 = vpow2.f32 %v9228_v3 }
 0x746   : > { %v13755_v45 = vadd.f32 %v7672_v24, %v13726_v41  ;;  %v7743_v61 = vpop.f32.mrb[116].mxu1  ;;  %v7674_v11 = vpop.f32.mrb[117].mxu0  ;;  %10401 = vpow2.f32 %v9230_v31 }
 0x747   : > { %v13758_v37 = vadd.f32 %v7743_v61, %v13726_v41  ;;  %v13761_v36 = vadd.f32 %v7674_v11, %v13726_v41  ;;  %v7745_v5 = vpop.f32.mrb[117].mxu1  ;;  %10403 = vpow2.f32 %v9229_v12 }
 0x748   : > { %v9232_v27 = vmul.f32 -1.442695, %v13755_v45  ;;  %v13765_v54 = vadd.f32 %v7745_v5, %v13726_v41  ;;  %10405 = vpow2.f32 %v9231_v13 }
 0x749   : > { %v9234_v19 = vmul.f32 -1.442695, %v13758_v37  ;;  %v9233_v42 = vmul.f32 -1.442695, %v13761_v36 }
 0x74a   : > { %10407 = vpow2.f32 %v9232_v27  ;;  %v9235_v25 = vmul.f32 -1.442695, %v13765_v54  ;;  %v10392_v22 = vpop.eup %10391 }
 0x74b   : > { %10409 = vpow2.f32 %v9234_v19  ;;  %v7986_v17 = vmul.f32 %v10392_v22, %v7389_v4 }
 0x74c   : > { %10411 = vpow2.f32 %v9233_v42  ;;  %v10394_v7 = vpop.eup %10393 }
 0x74d   : > { %10413 = vpow2.f32 %v9235_v25  ;;  %v10396_v57 = vpop.eup %10395  ;;  %v7988_v39 = vmul.f32 %v10394_v7, %v7460_v26  ;;  %v8018_v23 = vadd.f32 %v8002_v59, %v7986_v17 }
 0x74e   : > { %v10398_v21 = vpop.eup %10397  ;;  %v7987_v2 = vmul.f32 %v10396_v57, %v13731_v6  ;;  %v13783_v6 = vld [vmem:[%s14415_s26] sm:$0xf] }
 0x74f   : > { %v10400_v47 = vpop.eup %10399  ;;  %v8020_v63 = vadd.f32 %v8004_v43, %v7988_v39  ;;  %v7989_v4 = vmul.f32 %v10398_v21, %v13734_v16  ;;  %v14416_v43 = vld [vmem:[#allocation74_spill] sm:$0xff]  ;;  %v14417_v21 = vld [vmem:[#allocation33_spill] sm:$0xff] }
 0x750   : > { %v10402_v62 = vpop.eup %10401  ;;  %v7942_v35 = vadd.f32 1.0, %v10400_v47  ;;  %v8019_v26 = vadd.f32 %v8003_v48, %v7987_v2  ;;  %v14418_v47 = vld [vmem:[#allocation75_spill] sm:$0xff] }
 0x751   : > { %v10404_v9 = vpop.eup %10403  ;;  %v7944_v49 = vadd.f32 1.0, %v10402_v62  ;;  %v8021_v3 = vadd.f32 %v8005_v51, %v7989_v4  ;;  %v8007_v51 = vmul.f32 %v14373_v56, %v14419_v14  ;;  %v14422_v56 = vld [vmem:[#allocation79_spill] sm:$0xff] }
 0x752   : > { %v10406_v58 = vpop.eup %10405  ;;  %10415 = vrcp.f32 %v7942_v35  ;;  %v7943_v31 = vadd.f32 1.0, %v10404_v9  ;;  %8044 = vmatprep.subr.mxu0 %v8019_v26 }
 0x753   : > { %10417 = vrcp.f32 %v7944_v49  ;;  %v7945_v16 = vadd.f32 1.0, %v10406_v58  ;;  %8115 = vmatprep.subr.mxu1 %v8021_v3  ;;  %8045 = vmatpush1.msra.mxu0 %v8018_v23  ;;  %v8006_v23 = vmul.f32 %v14417_v21, %v14416_v43  ;;  %v14421_v3 = vld [vmem:[#allocation78_spill] sm:$0xff] }
 0x754   : > { %v10408_v12 = vpop.eup %10407  ;;  %10419 = vrcp.f32 %v7943_v31  ;;  %8116 = vmatpush1.msra.mxu1 %v8020_v63  ;;  %9240 = vmatmul.mubr.msk.f32.vlgmr.msra.gmra.mrb[120].mxu0 %vm1623_vm2, %v13783_v6  ;;  %v8008_v63 = vmul.f32 %v14376_v55, %v14418_v47  ;;  %v8010_v58 = vmul.f32 %v14379_v30, %v14421_v3 }
 0x755   : > { %v10410_v13 = vpop.eup %10409  ;;  %v7946_v24 = vadd.f32 1.0, %v10408_v12  ;;  %10421 = vrcp.f32 %v7945_v16  ;;  %9241 = vmatmul.mubr.msk.f32.vlgmr.msra.gmra.mrb[120].mxu1 %vm1623_vm2, %v13783_v6  ;;  %8250 = vmatprep.mubr.f32.mxu0 %v14382_v10  ;;  %v8012_v16 = vmul.f32 %v14384_v34, %v14422_v56 }
 0x756   : > { %v10412_v61 = vpop.eup %10411  ;;  %v7948_v11 = vadd.f32 1.0, %v10410_v13  ;;  %8321 = vmatprep.mubr.f32.mxu1 %v14382_v10 }
 0x757   : > { %v10414_v5 = vpop.eup %10413  ;;  %10423 = vrcp.f32 %v7946_v24  ;;  %v7947_v27 = vadd.f32 1.0, %v10412_v61 }
 0x758   : > { %10425 = vrcp.f32 %v7948_v11  ;;  %v7949_v19 = vadd.f32 1.0, %v10414_v5  ;;  %v14424_v5 = vld [vmem:[#allocation81_spill] sm:$0xff] }
 0x759   : > { %10427 = vrcp.f32 %v7947_v27 }
 0x75a   : > { %10429 = vrcp.f32 %v7949_v19  ;;  %v7814_v42 = vpop.f32.mrb[118].mxu0 }
 0x75b   : > { %v13792_v25 = vadd.f32 %v7814_v42, %v13726_v41  ;;  %v7885_v22 = vpop.f32.mrb[118].mxu1  ;;  %v7816_v7 = vpop.f32.mrb[119].mxu0 }
 0x75c   : > { %v13795_v17 = vadd.f32 %v7885_v22, %v13726_v41  ;;  %v13798_v1 = vadd.f32 %v7816_v7, %v13726_v41  ;;  %v7887_v0 = vpop.f32.mrb[119].mxu1  ;;  %v10416_v59 = vpop.eup %10415 }
 0x75d   : > { %v9236_v57 = vmul.f32 -1.442695, %v13792_v25  ;;  %v13802_v39 = vadd.f32 %v7887_v0, %v13726_v41  ;;  %v10418_v46 = vpop.eup %10417  ;;  %v7990_v40 = vmul.f32 %v10416_v59, %v13739_v33 }
 0x75e   : > { %v9238_v2 = vmul.f32 -1.442695, %v13795_v17  ;;  %v9237_v44 = vmul.f32 -1.442695, %v13798_v1  ;;  %v10420_v60 = vpop.eup %10419  ;;  %v7992_v48 = vmul.f32 %v10418_v46, %v13742_v53  ;;  %v14420_v53 = vld [vmem:[#allocation77_spill] sm:$0xff]  ;;  %v14425_v46 = vld [vmem:[#allocation82_spill] sm:$0xff] }
 0x75f   : > { %10431 = vpow2.f32 %v9236_v57  ;;  %v9239_v41 = vmul.f32 -1.442695, %v13802_v39  ;;  %v10422_v4 = vpop.eup %10421  ;;  %v8022_v52 = vadd.f32 %v8006_v23, %v7990_v40  ;;  %v7991_v33 = vmul.f32 %v10420_v60, %v13745_v15  ;;  %v14426_v23 = vld [vmem:[#allocation83_spill] sm:$0xff] }
 0x760   : > { %10433 = vpow2.f32 %v9238_v2  ;;  %v8024_v35 = vadd.f32 %v8008_v63, %v7992_v48  ;;  %v7993_v26 = vmul.f32 %v10422_v4, %v13748_v8  ;;  %v8009_v9 = vmul.f32 %v14366_v29, %v14420_v53  ;;  %v14423_v29 = vld [vmem:[#allocation80_spill] sm:$0xff] }
 0x761   : > { %v10424_v62 = vpop.eup %10423  ;;  %10435 = vpow2.f32 %v9237_v44  ;;  %v8023_v15 = vadd.f32 %v8007_v51, %v7991_v33  ;;  %v8014_v40 = vmul.f32 %v13618_v18, %v14425_v46  ;;  %v8016_v2 = vmul.f32 %v13668_v50, %v14426_v23  ;;  %v14427_v48 = vld [vmem:[#allocation84_spill] sm:$0xff]  ;;  %v8039_v50 = vpop.permute.xlu0 %8038 }
 0x762   : > { %v10426_v55 = vpop.eup %10425  ;;  %v7994_v49 = vmul.f32 %v10424_v62, %v13755_v45  ;;  %10437 = vpow2.f32 %v9239_v41  ;;  %v8025_v13 = vadd.f32 %v8009_v9, %v7993_v26  ;;  %v8011_v45 = vmul.f32 %v14381_v20, %v14423_v29 }
 0x763   : > { %v10428_v31 = vpop.eup %10427  ;;  %v7996_v12 = vmul.f32 %v10426_v55, %v13758_v37  ;;  %8186 = vmatprep.subr.mxu0 %v8023_v15  ;;  %v8013_v37 = vmul.f32 %v13604_v38, %v14424_v5  ;;  %v8015_v47 = vmul.f32 %v13695_v32, %v14427_v48 }
 0x764   : > { %v10430_v8 = vpop.eup %10429  ;;  %v8026_v24 = vadd.f32 %v8010_v58, %v7994_v49  ;;  %v7995_v61 = vmul.f32 %v10428_v31, %v13761_v36  ;;  %8257 = vmatprep.subr.mxu1 %v8025_v13  ;;  %8187 = vmatpush1.msra.mxu0 %v8022_v52 }
 0x765   : > { %v8028_v11 = vadd.f32 %v8012_v16, %v7996_v12  ;;  %v7997_v30 = vmul.f32 %v10430_v8, %v13765_v54  ;;  %8258 = vmatpush1.msra.mxu1 %v8024_v35  ;;  %9242 = vmatmul.mubr.msk.f32.vlgmr.msra.gmra.mrb[122].mxu0 %vm1623_vm2, %v13783_v6 }
 0x766   : > { %v8027_v34 = vadd.f32 %v8011_v45, %v7995_v61  ;;  %9243 = vmatmul.mubr.msk.f32.vlgmr.msra.gmra.mrb[122].mxu1 %vm1623_vm2, %v13783_v6  ;;  %8392 = vmatprep.mubr.f32.mxu0 %v14382_v10 }
 0x767   : > { %v8029_v36 = vadd.f32 %v8013_v37, %v7997_v30  ;;  %8463 = vmatprep.mubr.f32.mxu1 %v14382_v10 }
 0x768   : > { %8328 = vmatprep.subr.mxu0 %v8027_v34 }
 0x769   : > { %v10432_v20 = vpop.eup %10431  ;;  %8399 = vmatprep.subr.mxu1 %v8029_v36  ;;  %8329 = vmatpush1.msra.mxu0 %v8026_v24 }
 0x76a   : > { %v10434_v54 = vpop.eup %10433  ;;  %v7950_v27 = vadd.f32 1.0, %v10432_v20  ;;  %8400 = vmatpush1.msra.mxu1 %v8028_v11  ;;  %9244 = vmatmul.mubr.msk.f32.vlgmr.msra.gmra.mrb[124].mxu0 %vm1623_vm2, %v13783_v6 }
 0x76b   : > { %v10436_v38 = vpop.eup %10435  ;;  %v7952_v19 = vadd.f32 1.0, %v10434_v54  ;;  %9245 = vmatmul.mubr.msk.f32.vlgmr.msra.gmra.mrb[124].mxu1 %vm1623_vm2, %v13783_v6  ;;  %8534 = vmatprep.mubr.f32.mxu0 %v14382_v10 }
 0x76c   : > { %v10438_v42 = vpop.eup %10437  ;;  %10439 = vrcp.f32 %v7950_v27  ;;  %v7951_v22 = vadd.f32 1.0, %v10436_v38  ;;  %8605 = vmatprep.mubr.f32.mxu1 %v14382_v10 }
 0x76d   : > { %10441 = vrcp.f32 %v7952_v19  ;;  %v7953_v7 = vadd.f32 1.0, %v10438_v42 }
 0x76e   : > { %10443 = vrcp.f32 %v7951_v22 }
 0x76f   : > { %10445 = vrcp.f32 %v7953_v7 }
 0x776   : > { %v10440_v0 = vpop.eup %10439 }
 0x777   : > { %v10442_v59 = vpop.eup %10441  ;;  %v7998_v57 = vmul.f32 %v10440_v0, %v13792_v25  ;;  %v14428_v25 = vld [vmem:[#allocation85_spill] sm:$0xff] }
 0x778   : > { %v10444_v43 = vpop.eup %10443  ;;  %v8000_v21 = vmul.f32 %v10442_v59, %v13795_v17  ;;  %v8017_v4 = vmul.f32 %v13700_v28, %v14428_v25 }
 0x779   : > { %v10446_v44 = vpop.eup %10445  ;;  %v8030_v60 = vadd.f32 %v8014_v40, %v7998_v57  ;;  %v7999_v10 = vmul.f32 %v10444_v43, %v13798_v1 }
 0x77a   : > { %v8032_v63 = vadd.f32 %v8016_v2, %v8000_v21  ;;  %v8001_v41 = vmul.f32 %v10446_v44, %v13802_v39 }
 0x77b   : > { %v8031_v18 = vadd.f32 %v8015_v47, %v7999_v10 }
 0x77c   : > { %v8033_v52 = vadd.f32 %v8017_v4, %v8001_v41 }
 0x77d   : > { %8470 = vmatprep.subr.mxu0 %v8031_v18 }
 0x77e   : > { %8541 = vmatprep.subr.mxu1 %v8033_v52  ;;  %8471 = vmatpush1.msra.mxu0 %v8030_v60 }
 0x77f   : > { %8542 = vmatpush1.msra.mxu1 %v8032_v63  ;;  %9246 = vmatmul.mubr.msk.f32.vlgmr.msra.gmra.mrb[126].mxu0 %vm1623_vm2, %v13783_v6 }
 0x780   : > { %9247 = vmatmul.mubr.msk.f32.vlgmr.msra.gmra.mrb[126].mxu1 %vm1623_vm2, %v13783_v6 }
 0x827   : > { %v8110_v32 = vpop.f32.mrb[120].mxu0 }
 0x828   : > { %v8111_v17 = vadd.f32 %v8110_v32, %v8039_v50  ;;  %v8181_v1 = vpop.f32.mrb[120].mxu1  ;;  %v8112_v39 = vpop.f32.mrb[121].mxu0 }
 0x829   : > { %v8182_v33 = vadd.f32 %v8181_v1, %v8039_v50  ;;  %v8113_v28 = vadd.f32 %v8112_v39, %v8039_v50  ;;  %v8183_v14 = vpop.f32.mrb[121].mxu1 }
 0x82a   : > { %v8184_v51 = vadd.f32 %v8183_v14, %v8039_v50 }
 0x82b   : > { %v8628_v62 = vcombine.low %v8111_v17, %v8113_v28 }
 0x82c   : > { %v8629_v35 = vcombine.low %v8182_v33, %v8184_v51 }
 0x82d   : > { %8644 = vst [vmem:[%s13861_s5] sm:$0xff] %v8628_v62 }
 0x82e   : > { %8645 = vst [vmem:[%s13861_s5 + $0x8] sm:$0xff] %v8629_v35 }
 0x838   : > { %v8252_v6 = vpop.f32.mrb[122].mxu0 }
 0x839   : > { %v8253_v26 = vadd.f32 %v8252_v6, %v8039_v50  ;;  %v8323_v53 = vpop.f32.mrb[122].mxu1  ;;  %v8254_v9 = vpop.f32.mrb[123].mxu0 }
 0x83a   : > { %v8324_v55 = vadd.f32 %v8323_v53, %v8039_v50  ;;  %v8255_v49 = vadd.f32 %v8254_v9, %v8039_v50  ;;  %v8325_v3 = vpop.f32.mrb[123].mxu1 }
 0x83b   : > { %v8326_v58 = vadd.f32 %v8325_v3, %v8039_v50 }
 0x83c   : > { %v8630_v15 = vcombine.low %v8253_v26, %v8255_v49 }
 0x83d   : > { %v8394_v31 = vpop.f32.mrb[124].mxu0  ;;  %v8631_v12 = vcombine.low %v8324_v55, %v8326_v58 }
 0x83e   : > { %v8395_v56 = vadd.f32 %v8394_v31, %v8039_v50  ;;  %v8465_v16 = vpop.f32.mrb[124].mxu1  ;;  %v8396_v13 = vpop.f32.mrb[125].mxu0  ;;  %8646 = vst [vmem:[%s13861_s5 + $0x10] sm:$0xff] %v8630_v15 }
 0x83f   : > { %v8466_v8 = vadd.f32 %v8465_v16, %v8039_v50  ;;  %v8397_v24 = vadd.f32 %v8396_v13, %v8039_v50  ;;  %v8467_v61 = vpop.f32.mrb[125].mxu1  ;;  %8647 = vst [vmem:[%s13861_s5 + $0x18] sm:$0xff] %v8631_v12 }
 0x840   : > { %v8468_v29 = vadd.f32 %v8467_v61, %v8039_v50 }
 0x841   : > { %v8632_v45 = vcombine.low %v8395_v56, %v8397_v24 }
 0x842   : > { %v8633_v11 = vcombine.low %v8466_v8, %v8468_v29 }
 0x843   : > { %8648 = vst [vmem:[%s13861_s5 + $0x20] sm:$0xff] %v8632_v45 }
 0x844   : > { %8649 = vst [vmem:[%s13861_s5 + $0x28] sm:$0xff] %v8633_v11 }
 0x852   : > { %v8536_v30 = vpop.f32.mrb[126].mxu0 }
 0x853   : > { %v8537_v5 = vadd.f32 %v8536_v30, %v8039_v50  ;;  %v8607_v37 = vpop.f32.mrb[126].mxu1  ;;  %v8538_v34 = vpop.f32.mrb[127].mxu0 }
 0x854   : > { %v8608_v36 = vadd.f32 %v8607_v37, %v8039_v50  ;;  %v8539_v20 = vadd.f32 %v8538_v34, %v8039_v50  ;;  %v8609_v54 = vpop.f32.mrb[127].mxu1 }
 0x855   : > { %v8610_v27 = vadd.f32 %v8609_v54, %v8039_v50 }
 0x856   : > { %v8634_v38 = vcombine.low %v8537_v5, %v8539_v20 }
 0x857   : > { %v8635_v19 = vcombine.low %v8608_v36, %v8610_v27 }
 0x858   : > { %8650 = vst [vmem:[%s13861_s5 + $0x30] sm:$0xff] %v8634_v38 }
 0x859   : > { %8651 = vst [vmem:[%s13861_s5 + $0x38] sm:$0xff] %v8635_v19 }
 0x85a   : > { %10580 = shalt.err (!%p10577_p10)
}
 0x85b   : > { %s10581_s16 = scalar_lea.hbm %s13874_s19, 1024  ;;  %s10585_s26 = scalar_lea.hbm %s14430_s15, 2048 }
 0x85c   : > { %p10582_p7 = scmp.ne.s32.totalorder %s13874_s19, %s10581_s16  ;;  %p10586_p1 = scmp.lt.u32.totalorder %s13874_s19, %s14430_s15 }
 0x85d   : > { %p10587_p4 = scmp.lt.u32.totalorder %s10585_s26, %s10581_s16  ;;  %p10589_p9 = scmp.lt.u32.totalorder %s10581_s16, %s13874_s19 }
 0x85e   : > { %p10583_p5 = pnand %p10582_p7, %p14431_p12 }
 0x85f   : > { %p10588_p2 = por %p10587_p4, %p10586_p1 }
 0x860   : > { %p10584_p6 = pneg %p10583_p5 }
 0x861   : > { %p10590_p3 = por %p10589_p9, %p10588_p2 }
 0x863   : > { %p10591_p8 = pnand %p10590_p3, %p10584_p6 }
 0x865   : > { %10594 = shalt.err (!%p10591_p8)
}
 0x866   : > { %9538 = dma.vmem_to_hbm [thread:$0]  (%p14431_p12), %s13876_s3, 1024, %s13874_s19, %s8653_s23  }
 0x867 PF: > { %s14432_s22 = sld [smem:[#allocation15_spill]]  ;;  %s14433_s1 = sld [smem:[#allocation21_spill]] }
 0x868   : > { %s14434_s6 = sld [smem:[#allocation17_spill]] }
 0x86d   : > { %s8679_s4 = sand.u32 1, %s14432_s22   ;;  %p14435_p13 = scmp.ne.s32.totalorder %s14433_s1, 0 }
 0x86e   : > { %p14436_p11 = scmp.ge.s32.totalorder %s14434_s6, 2  ;;  %s8680_s10 = scalar_lea.sflag [#allocation4], %s8679_s4 }
 0x870   : > { %p9554_p0 = pnand %p14436_p11, %p14435_p13 }
 0x872   : > { %10624 = dma.done.wait (!%p9554_p0), %s8680_s10, 1024  }
 0x873   : > { %10626 = vsyncadd (!%p9554_p0), %s8680_s10, 4294966272  ;;  %s14437_s30 = sld [smem:[#allocation18_spill]]  ;;  %s14438_s13 = sld [smem:[#allocation16_spill]] }
 0x874   : > { %s14439_s29 = sld [smem:[#allocation19_spill]]  ;;  %s14440_s3 = smov %s10633_s28 }
 0x879   : > { %p41_p10 = scmp.ge.s32.totalorder %s14437_s30, 4   ;;  %s14441_s28 = smov %s14438_s13 }
 0x87b   :  { %43 = sbr.rel (!%p41_p10) target bundleno = 26 (0x1a), region = 196 }
 0x882   :  { %8685 = vsyncpa [#allocation3], 1 }
 0x883   :  { %8687 = vsyncpa [#allocation3 + $0x1], 1 }
 0x884   :  { %8688 = vsyncpa [#allocation6], 1 }
 0x885   :  { %8690 = vsyncpa [#allocation6 + $0x1], 1 }
 0x886   :  { %8691 = vsyncpa [#allocation9], 1 }
 0x887   :  { %8693 = vsyncpa [#allocation9 + $0x1], 1 }
 0x888   :  { %8694 = vsyncpa [#allocation4], 1 }
 0x889   :  { %8696 = vsyncpa [#allocation4 + $0x1], 1 }

</bundles_post_ra>
